<compile_context>
chip_gen: v5e
topology: v5e:2x2
jax: 0.10.0
libtpu: 0.0.40
codegen_flags: <defaults>
</compile_context>

<pallas_src>
import functools
import math

import jax
import jax.numpy as jnp
from jax.experimental import pallas as pl
from jax.experimental.pallas import tpu as pltpu

KERNELS = [1, 2, 4, 8, 16, 32, 64, 128]   # trend conv kernel sizes (as in COST_E2E)
HIDDEN_DIMS = 64                          # CoSTEncoder internal hidden_dims default

# MXU operand dtype: bf16 operands + f32 accumulation (fast path on v6e/v7x,
# also fine on v5e).  Switch to jnp.float32 for exact fp32 matmuls.
MM_DTYPE = jnp.bfloat16
# Explicit scoped-VMEM budget: comfortably under v7x's 64 MiB physical VMEM,
# above v5e's 16 MiB default so pipelining depth is not silently capped.
VMEM_LIMIT = 48 * 1024 * 1024


# ---------------------------------------------------------------------------
# helpers
# ---------------------------------------------------------------------------
def _rup(n, m):
    return ((n + m - 1) // m) * m


def _pad_to(x, target_shape):
    pads = [(0, t - s) for s, t in zip(x.shape, target_shape)]
    if all(p == (0, 0) for p in pads):
        return x
    return jnp.pad(x, pads)


def _cparams(semantics):
    return pltpu.CompilerParams(dimension_semantics=semantics,
                                vmem_limit_bytes=VMEM_LIMIT)


# ---------------------------------------------------------------------------
# Pallas kernel 1: tiled matmul  y = x @ w + b  (optional fused ReLU)
# ---------------------------------------------------------------------------
def _mm_kernel(x_ref, w_ref, b_ref, o_ref, acc_ref, *, relu):
    @pl.when(pl.program_id(2) == 0)
    def _():
        acc_ref[...] = jnp.zeros_like(acc_ref)

    acc_ref[...] += jnp.dot(x_ref[...], w_ref[...],
                            preferred_element_type=jnp.float32)

    @pl.when(pl.program_id(2) == pl.num_programs(2) - 1)
    def _():
        out = acc_ref[...] + b_ref[...]
        if relu:
            out = jnp.maximum(out, 0.0)
        o_ref[...] = out.astype(o_ref.dtype)


def linear_pallas(x, w, b=None, relu=False):
    """y = x @ w + b.  x: (M, K), w: (K, N), b: (N,).  f32 output."""
    M, K = x.shape
    _, N = w.shape
    if b is None:
        b = jnp.zeros((N,), jnp.float32)

    tm = min(256, _rup(M, 8))
    tn = min(256, _rup(N, 128))
    tk = min(512, _rup(K, 128))
    Mp, Np, Kp = _rup(M, tm), _rup(N, tn), _rup(K, tk)

    xp = _pad_to(x.astype(MM_DTYPE), (Mp, Kp))
    wp = _pad_to(w.astype(MM_DTYPE), (Kp, Np))
    bp = _pad_to(b.astype(jnp.float32).reshape(1, N), (1, Np))

    out = pl.pallas_call(
        functools.partial(_mm_kernel, relu=relu),
        out_shape=jax.ShapeDtypeStruct((Mp, Np), jnp.float32),
        grid=(Mp // tm, Np // tn, Kp // tk),
        in_specs=[
            pl.BlockSpec((tm, tk), lambda i, j, k: (i, k)),
            pl.BlockSpec((tk, tn), lambda i, j, k: (k, j)),
            pl.BlockSpec((1, tn), lambda i, j, k: (0, j)),
        ],
        out_specs=pl.BlockSpec((tm, tn), lambda i, j, k: (i, j)),
        scratch_shapes=[pltpu.VMEM((tm, tn), jnp.float32)],
        compiler_params=_cparams(("parallel", "parallel", "arbitrary")),
    )(xp, wp, bp)
    return out[:M, :N]


# ---------------------------------------------------------------------------
# Pallas kernel 2: batched matmul (several batch entries per grid step,
# optional transposed-B contraction so no HBM transpose is needed)
# ---------------------------------------------------------------------------
def _bmm_kernel(a_ref, b_ref, o_ref, *, transpose_b):
    if transpose_b:
        o_ref[...] = jnp.einsum("gmk,gnk->gmn", a_ref[...], b_ref[...],
                                preferred_element_type=jnp.float32)
    else:
        o_ref[...] = jnp.einsum("gmk,gkn->gmn", a_ref[...], b_ref[...],
                                preferred_element_type=jnp.float32)


def bmm_pallas(a, b, transpose_b=False):
    """a: (G, M, K); b: (G, K, N) or (G, N, K) if transpose_b.  -> (G, M, N)."""
    G, M, K = a.shape
    N = b.shape[1] if transpose_b else b.shape[2]
    gt = min(8, G)
    Gp = _rup(G, gt)
    Mp, Kp, Np = _rup(M, 8), _rup(K, 128), _rup(N, 128)

    ap = _pad_to(a.astype(MM_DTYPE), (Gp, Mp, Kp))
    if transpose_b:
        bp = _pad_to(b.astype(MM_DTYPE), (Gp, Np, Kp))
        b_block = (gt, Np, Kp)
    else:
        bp = _pad_to(b.astype(MM_DTYPE), (Gp, Kp, Np))
        b_block = (gt, Kp, Np)

    out = pl.pallas_call(
        functools.partial(_bmm_kernel, transpose_b=transpose_b),
        out_shape=jax.ShapeDtypeStruct((Gp, Mp, Np), jnp.float32),
        grid=(Gp // gt,),
        in_specs=[
            pl.BlockSpec((gt, Mp, Kp), lambda g: (g, 0, 0)),
            pl.BlockSpec(b_block, lambda g: (g, 0, 0)),
        ],
        out_specs=pl.BlockSpec((gt, Mp, Np), lambda g: (g, 0, 0)),
        compiler_params=_cparams(("parallel",)),
    )(ap, bp)
    return out[:G, :M, :N]


# ---------------------------------------------------------------------------
# Pallas kernel 3: "tap conv" -- dilated / causal conv1d as a sum of shifted
# matmuls over a halo'd, VMEM-resident time block (no im2col in HBM).
# ---------------------------------------------------------------------------
def _tapconv_kernel(xp_ref, w_ref, b_ref, o_ref, acc_ref, *,
                    taps_per_tile, dilation):
    kt = pl.program_id(1)

    @pl.when(kt == 0)
    def _():
        acc_ref[...] = jnp.zeros_like(acc_ref)

    t_out = acc_ref.shape[0]
    base = kt * (taps_per_tile * dilation)
    for j in range(taps_per_tile):                      # static unroll
        window = xp_ref[pl.ds(base + j * dilation, t_out), :]
        acc_ref[...] += jnp.dot(window.astype(MM_DTYPE), w_ref[j],
                                preferred_element_type=jnp.float32)

    @pl.when(kt == pl.num_programs(1) - 1)
    def _():
        o_ref[...] = (acc_ref[...] + b_ref[...]).astype(o_ref.dtype)


def tap_conv(x, w_taps, b, dilation, left_pad):
    """out[b, t] = sum_j x_pad[b, t + j*dilation] @ w_taps[j] + b
    where x_pad is x left-padded (in time) by `left_pad` zeros.
    x: (B, T, Cin); w_taps: (ntaps, Cin, Cout); b: (Cout,)."""
    B, T, Cin = x.shape
    ntaps, _, Cout = w_taps.shape

    tpt = ntaps if ntaps <= 8 else 8
    ntaps_p = _rup(ntaps, tpt)
    Tp = _rup(T, 8)
    Cp = _rup(Cin, 128)
    Np = _rup(Cout, 128)

    # padded time length must cover the furthest read: (ntaps_p-1)*d + Tp
    need = (ntaps_p - 1) * dilation + Tp
    Ttot = _rup(max(need, left_pad + T), 8)

    xp = jnp.zeros((B, Ttot, Cp), jnp.float32)
    xp = xp.at[:, left_pad:left_pad + T, :Cin].set(x.astype(jnp.float32))
    wp = jnp.zeros((ntaps_p, Cp, Np), MM_DTYPE)
    wp = wp.at[:ntaps, :Cin, :Cout].set(w_taps.astype(MM_DTYPE))
    bp = _pad_to(b.astype(jnp.float32).reshape(1, Cout), (1, Np))

    out = pl.pallas_call(
        functools.partial(_tapconv_kernel, taps_per_tile=tpt, dilation=dilation),
        out_shape=jax.ShapeDtypeStruct((B, Tp, Np), jnp.float32),
        grid=(B, ntaps_p // tpt),
        in_specs=[
            pl.BlockSpec((None, Ttot, Cp), lambda bb, kk: (bb, 0, 0)),
            pl.BlockSpec((tpt, Cp, Np), lambda bb, kk: (kk, 0, 0)),
            pl.BlockSpec((1, Np), lambda bb, kk: (0, 0)),
        ],
        out_specs=pl.BlockSpec((None, Tp, Np), lambda bb, kk: (bb, 0, 0)),
        scratch_shapes=[pltpu.VMEM((Tp, Np), jnp.float32)],
        compiler_params=_cparams(("parallel", "arbitrary")),
    )(xp, wp, bp)
    return out[:, :T, :Cout]


# ---------------------------------------------------------------------------
# JAX glue built on the Pallas kernels
# ---------------------------------------------------------------------------
def gelu(x):
    return jax.nn.gelu(x, approximate=False)      # exact erf GELU == torch F.gelu


def l2norm(x, axis=-1, eps=1e-12):
    return x / jnp.maximum(jnp.linalg.norm(x, axis=axis, keepdims=True), eps)


def conv1d_same(x, w, b, dilation):
    """Same-padded dilated conv (kernel=3) via the shifted-window tap kernel."""
    wt = jnp.transpose(w, (2, 1, 0))      # torch (Cout, Cin, k) -> (k, Cin, Cout)
    return tap_conv(x, wt, b, dilation=dilation, left_pad=dilation)


def pointwise_conv(x, w, b):
    B, T, Cin = x.shape
    Cout = w.shape[0]
    return linear_pallas(x.reshape(B * T, Cin), w[:, :, 0].T, b).reshape(B, T, Cout)


def dilated_conv_encoder(blocks, x):
    # Standard CoST / TS2Vec DilatedConvEncoder (residual ConvBlocks, GELU, dilation 2**i).
    for i, blk in enumerate(blocks):
        dilation = 2 ** i
        residual = x if blk["pw"] is None else pointwise_conv(x, blk["pw"], blk["pb"])
        h = gelu(x)
        h = conv1d_same(h, blk["w1"], blk["b1"], dilation)
        h = gelu(h)
        h = conv1d_same(h, blk["w2"], blk["b2"], dilation)
        x = h + residual
    return x


def fuse_trend_weights(tfd, kmax):
    """mean over 8 causal convs == one causal conv (kernel=kmax) with averaged,
    right-aligned zero-padded weights and averaged biases."""
    comp = tfd[0][0].shape[0]
    hid = tfd[0][0].shape[1]
    wsum = jnp.zeros((kmax, hid, comp), jnp.float32)
    bsum = jnp.zeros((comp,), jnp.float32)
    for w, b in tfd:
        k = w.shape[-1]
        wt = jnp.transpose(w, (2, 1, 0))               # (k, hid, comp)
        wsum = wsum.at[kmax - k:].add(wt.astype(jnp.float32))
        bsum = bsum + b.astype(jnp.float32)
    n = float(len(tfd))
    return wsum / n, bsum / n


def trend_conv_fused(z, tfd):
    kmax = KERNELS[-1]
    w_avg, b_avg = fuse_trend_weights(tfd, kmax)
    return tap_conv(z, w_avg, b_avg, dilation=1, left_pad=kmax - 1)


def banded_fourier(p, x):
    """BandedFourierLayer (num_bands=1): rfft -> per-freq complex matmul
    (fused into ONE real batched matmul with [[Wr, Wi], [-Wi, Wr]]) -> irfft."""
    B, T, _ = x.shape
    xf = jnp.fft.rfft(x, axis=1)                       # (B, F, Cin) complex
    xr = jnp.transpose(jnp.real(xf), (1, 0, 2))        # (F, B, Cin)
    xi = jnp.transpose(jnp.imag(xf), (1, 0, 2))
    X = jnp.concatenate([xr, xi], axis=-1)             # (F, B, 2*Cin)
    w_top = jnp.concatenate([p["sfd_wr"], p["sfd_wi"]], axis=-1)    # (F, Cin, 2*Cout)
    w_bot = jnp.concatenate([-p["sfd_wi"], p["sfd_wr"]], axis=-1)   # (F, Cin, 2*Cout)
    W = jnp.concatenate([w_top, w_bot], axis=1)                     # (F, 2*Cin, 2*Cout)
    out = bmm_pallas(X, W)                                          # (F, B, 2*Cout)
    Cout = p["sfd_br"].shape[-1]
    outr = out[..., :Cout] + p["sfd_br"][:, None, :]
    outi = out[..., Cout:] + p["sfd_bi"][:, None, :]
    of = jnp.transpose(outr, (1, 0, 2)) + 1j * jnp.transpose(outi, (1, 0, 2))
    return jnp.fft.irfft(of, n=T, axis=1)


def cost_encoder(p, x):
    """CoSTEncoder.forward with mask='all_true' (x[~mask]=0 is a no-op;
    repr_dropout treated as identity / eval mode)."""
    B, T, _ = x.shape
    h = linear_pallas(x.reshape(B * T, -1), p["fc_w"], p["fc_b"]).reshape(B, T, -1)
    z = dilated_conv_encoder(p["dce"], h)              # (B, T, output_dims)
    trend = trend_conv_fused(z, p["tfd"])              # fused 8 trend convs -> 1 kernel
    season = banded_fourier(p, z)
    return trend, season


def mlp_head(hp, x):
    (w1, b1), (w2, b2) = hp
    h = linear_pallas(x, w1, b1, relu=True)
    return linear_pallas(h, w2, b2)


def decoder(dp, x):
    B, T, H = x.shape
    (w1, b1), (w2, b2) = dp
    h = linear_pallas(x.reshape(B * T, H), w1, b1, relu=True)
    y = linear_pallas(h, w2, b2)
    return y.reshape(B, T, -1)


def convert_coeff(xf, eps=1e-6):
    # Matches the reference literally: eps is added INSIDE the squares and to
    # the real part of atan2.
    re, im = jnp.real(xf), jnp.imag(xf)
    amp = jnp.sqrt((re + eps) ** 2 + (im + eps) ** 2)
    phase = jnp.arctan2(im, re + eps)
    return amp, phase


def instance_contrastive_loss(z1, z2):
    B = z1.shape[0]
    z = jnp.concatenate([z1, z2], axis=0)              # (2B, F, C)
    z = jnp.transpose(z, (1, 0, 2))                    # (F, 2B, C)
    sim = bmm_pallas(z, z, transpose_b=True)           # (F, 2B, 2B), no HBM transpose
    logits = jnp.tril(sim, -1)[:, :, :-1] + jnp.triu(sim, 1)[:, :, 1:]
    logits = -jax.nn.log_softmax(logits, axis=-1)
    i = jnp.arange(B)
    return (logits[:, i, B + i - 1].mean() + logits[:, B + i, i].mean()) / 2


def compute_loss(q, k, queue, temperature=1.0):
    q = l2norm(q)
    k = l2norm(k)
    # queue is (comp, K); the reference does F.normalize(k_negs, dim=-1),
    # i.e. normalization along the queue-length dimension -- matched literally.
    kn = l2norm(queue, axis=-1)
    l_pos = jnp.sum(q * k, axis=-1, keepdims=True)
    l_neg = linear_pallas(q, kn)                       # (B, K) einsum 'nc,ck->nk'
    logits = jnp.concatenate([l_pos, l_neg], axis=1) / temperature
    return jnp.mean(-jax.nn.log_softmax(logits, axis=-1)[:, 0])   # CE, labels == 0


def cost_e2e_forward(p, x, pred_leng, alpha=0.0005, temperature=1.0, rand_idx=0):
    # TODO(synk): rand_idx is np.random.randint in the reference; fixed deterministically here.
    q_t_full, q_s = cost_encoder(p, x)
    enc_out = jnp.concatenate([q_t_full, q_s], axis=-1)
    q_t = l2norm(mlp_head(p["head"], q_t_full[:, rand_idx]))

    # key branch: encoder_k / head_k are deep copies of the q networks and the
    # momentum update of identical copies leaves them unchanged, so the same
    # params are reused.  The seasonal key branch in the reference also runs
    # encoder_q on the same x_k, so ONE encoder pass provides both k_t and k_s.
    # TODO(synk): Data_Aug.cost_transform is stochastic and not provided; treated as identity.
    x_k = x
    k_t_full, k_s = cost_encoder(p, x_k)
    k_t = l2norm(mlp_head(p["head"], k_t_full[:, rand_idx]))

    loss = compute_loss(q_t, k_t, p["queue"], temperature)
    # TODO(synk): _dequeue_and_enqueue mutates a buffer and does not affect returned values; skipped.

    q_s_n = l2norm(q_s)
    k_s_n = l2norm(k_s)
    q_s_freq = jnp.fft.rfft(q_s_n, axis=1)
    k_s_freq = jnp.fft.rfft(k_s_n, axis=1)
    qa, qp_ = convert_coeff(q_s_freq)
    ka, kp_ = convert_coeff(k_s_freq)
    seasonal_loss = instance_contrastive_loss(qa, ka) + instance_contrastive_loss(qp_, kp_)
    loss = loss + alpha * (seasonal_loss / 2)

    y = decoder(p["dec"], enc_out)
    return y[:, -pred_leng:, :], enc_out, loss


# ---------------------------------------------------------------------------
# Deterministic parameter initialization (shapes follow the module __init__)
# ---------------------------------------------------------------------------
def _uniform(key, shape, bound):
    return jax.random.uniform(key, shape, jnp.float32, -bound, bound)


def init_params(key, input_size, hidden_size, output_size, depth, length, K):
    comp = hidden_size // 2
    keys = iter(jax.random.split(key, 128))
    p = {}

    bnd = 1.0 / math.sqrt(input_size)
    p["fc_w"] = _uniform(next(keys), (input_size, HIDDEN_DIMS), bnd)
    p["fc_b"] = _uniform(next(keys), (HIDDEN_DIMS,), bnd)

    channels = [HIDDEN_DIMS] * depth + [hidden_size]
    blocks = []
    for i, ch_out in enumerate(channels):
        ch_in = channels[i - 1] if i > 0 else HIDDEN_DIMS
        final = i == len(channels) - 1
        blk = {}
        b1 = 1.0 / math.sqrt(ch_in * 3)
        blk["w1"] = _uniform(next(keys), (ch_out, ch_in, 3), b1)
        blk["b1"] = _uniform(next(keys), (ch_out,), b1)
        b2 = 1.0 / math.sqrt(ch_out * 3)
        blk["w2"] = _uniform(next(keys), (ch_out, ch_out, 3), b2)
        blk["b2"] = _uniform(next(keys), (ch_out,), b2)
        if ch_in != ch_out or final:
            bp_ = 1.0 / math.sqrt(ch_in)
            blk["pw"] = _uniform(next(keys), (ch_out, ch_in, 1), bp_)
            blk["pb"] = _uniform(next(keys), (ch_out,), bp_)
        else:
            blk["pw"] = None
            blk["pb"] = None
        blocks.append(blk)
    p["dce"] = blocks

    tfd = []
    for k in KERNELS:
        bd = 1.0 / math.sqrt(hidden_size * k)
        tfd.append((_uniform(next(keys), (comp, hidden_size, k), bd),
                    _uniform(next(keys), (comp,), bd)))
    p["tfd"] = tfd

    n_freqs = length // 2 + 1
    bw = 1.0 / math.sqrt(hidden_size)
    p["sfd_wr"] = _uniform(next(keys), (n_freqs, hidden_size, comp), bw)
    p["sfd_wi"] = _uniform(next(keys), (n_freqs, hidden_size, comp), bw)
    p["sfd_br"] = _uniform(next(keys), (n_freqs, comp), bw)
    p["sfd_bi"] = _uniform(next(keys), (n_freqs, comp), bw)

    bh = 1.0 / math.sqrt(comp)
    p["head"] = [(_uniform(next(keys), (comp, comp), bh), _uniform(next(keys), (comp,), bh)),
                 (_uniform(next(keys), (comp, comp), bh), _uniform(next(keys), (comp,), bh))]

    bx1 = math.sqrt(6.0 / (hidden_size + hidden_size))
    bx2 = math.sqrt(6.0 / (hidden_size + output_size))
    p["dec"] = [(_uniform(next(keys), (hidden_size, hidden_size), bx1), jnp.zeros((hidden_size,))),
                (_uniform(next(keys), (hidden_size, output_size), bx2), jnp.zeros((output_size,)))]

    q = jax.random.normal(next(keys), (comp, K), jnp.float32)
    p["queue"] = q / jnp.maximum(jnp.linalg.norm(q, axis=0, keepdims=True), 1e-12)
    return p


# ---------------------------------------------------------------------------
if __name__ == "__main__":
    B, T = 2, 16
    input_size, hidden_size, output_size = 4, 16, 4
    e_layer, pred_leng, K = 2, 4, 32

    key = jax.random.PRNGKey(0)
    pkey, xkey = jax.random.split(key)
    params = init_params(pkey, input_size, hidden_size, output_size, e_layer, T, K)
    x = jax.random.normal(xkey, (B, T, input_size), jnp.float32)

    fwd = jax.jit(functools.partial(cost_e2e_forward, pred_leng=pred_leng))
    y, enc_out, loss = fwd(params, x)
    jax.block_until_ready((y, enc_out, loss))
    assert y.shape == (B, pred_leng, output_size)
    assert enc_out.shape == (B, T, hidden_size)
    print("KERNEL_OK")
</pallas_src>

<mosaic_0001>
module attributes {stable_mosaic.version = 11 : i64} {
  func.func @_mm_kernel(%arg0: i32, %arg1: i32, %arg2: i32, %arg3: memref<32x128xbf16, #tpu.memory_space<vmem>>, %arg4: memref<128x128xbf16, #tpu.memory_space<vmem>>, %arg5: memref<1x128xf32, #tpu.memory_space<vmem>>, %arg6: memref<32x128xf32, #tpu.memory_space<vmem>>, %arg7: memref<32x128xf32, #tpu.memory_space<vmem>>) attributes {dimension_semantics = [#tpu.dimension_semantics<parallel>, #tpu.dimension_semantics<parallel>, #tpu.dimension_semantics<arbitrary>], iteration_bounds = array<i64: 1, 1, 1>, scalar_prefetch = 0 : i64, scratch_operands = 1 : i64, tpu.core_type = #tpu.core_type<tc>, window_params = [{transform_indices = @transform_0, window_bounds = array<i64: 32, 128>}, {transform_indices = @transform_1, window_bounds = array<i64: 128, 128>}, {transform_indices = @transform_2, window_bounds = array<i64: 1, 128>}, {transform_indices = @transform_3, window_bounds = array<i64: 32, 128>}]} {
    %c0_i32 = arith.constant 0 : i32
    %0 = arith.cmpi eq, %arg2, %c0_i32 : i32
    %1 = arith.extui %0 : i1 to i32
    %c0_i32_0 = arith.constant 0 : i32
    %2 = arith.cmpi ne, %1, %c0_i32_0 : i32
    scf.if %2 {
      %cst_10 = arith.constant 0.000000e+00 : f32
      %12 = vector.broadcast %cst_10 : f32 to vector<32x128xf32>
      %c0_11 = arith.constant 0 : index
      %c0_12 = arith.constant 0 : index
      %13 = vector.load %arg7[%c0_11, %c0_12] : memref<32x128xf32, #tpu.memory_space<vmem>>, vector<32x128xf32>
      tpu.vector_store %arg7[%c0_11, %c0_12], %12 {strides = array<i32>} : memref<32x128xf32, #tpu.memory_space<vmem>>, vector<32x128xf32>,
    } else {
    }
    %c0 = arith.constant 0 : index
    %c0_1 = arith.constant 0 : index
    %3 = vector.load %arg7[%c0, %c0_1] : memref<32x128xf32, #tpu.memory_space<vmem>>, vector<32x128xf32>
    %c0_2 = arith.constant 0 : index
    %c0_3 = arith.constant 0 : index
    %4 = vector.load %arg3[%c0_2, %c0_3] : memref<32x128xbf16, #tpu.memory_space<vmem>>, vector<32x128xbf16>
    %c0_4 = arith.constant 0 : index
    %c0_5 = arith.constant 0 : index
    %5 = vector.load %arg4[%c0_4, %c0_5] : memref<128x128xbf16, #tpu.memory_space<vmem>>, vector<128x128xbf16>
    %cst = arith.constant dense<0.000000e+00> : vector<32x128xf32>
    %6 = tpu.matmul %4, %5, %cst {dimension_numbers = #tpu.dot_dimension_numbers<[1], [0], [0], [1], [0, 0, 1, 1], [], []>} : vector<32x128xbf16>, vector<128x128xbf16>, vector<32x128xf32> -> vector<32x128xf32>
    %7 = arith.addf %3, %6 : vector<32x128xf32>
    %c0_6 = arith.constant 0 : index
    %c0_7 = arith.constant 0 : index
    %8 = vector.load %arg7[%c0_6, %c0_7] : memref<32x128xf32, #tpu.memory_space<vmem>>, vector<32x128xf32>
    tpu.vector_store %arg7[%c0_6, %c0_7], %7 {strides = array<i32>} : memref<32x128xf32, #tpu.memory_space<vmem>>, vector<32x128xf32>,
    %c0_i32_8 = arith.constant 0 : i32
    %9 = arith.cmpi eq, %arg2, %c0_i32_8 : i32
    %10 = arith.extui %9 : i1 to i32
    %c0_i32_9 = arith.constant 0 : i32
    %11 = arith.cmpi ne, %10, %c0_i32_9 : i32
    scf.if %11 {
      %c0_10 = arith.constant 0 : index
      %c0_11 = arith.constant 0 : index
      %12 = vector.load %arg7[%c0_10, %c0_11] : memref<32x128xf32, #tpu.memory_space<vmem>>, vector<32x128xf32>
      %c0_12 = arith.constant 0 : index
      %c0_13 = arith.constant 0 : index
      %13 = vector.load %arg5[%c0_12, %c0_13] : memref<1x128xf32, #tpu.memory_space<vmem>>, vector<1x128xf32>
      %14 = vector.broadcast %13 : vector<1x128xf32> to vector<32x128xf32>
      %15 = arith.addf %12, %14 : vector<32x128xf32>
      %c0_14 = arith.constant 0 : index
      %c0_15 = arith.constant 0 : index
      %16 = vector.load %arg6[%c0_14, %c0_15] : memref<32x128xf32, #tpu.memory_space<vmem>>, vector<32x128xf32>
      tpu.vector_store %arg6[%c0_14, %c0_15], %15 {strides = array<i32>} : memref<32x128xf32, #tpu.memory_space<vmem>>, vector<32x128xf32>,
    } else {
    }
    return
  }
  func.func @transform_0(%arg0: i32, %arg1: i32, %arg2: i32) -> (i32, i32) {
    %c0_i32 = arith.constant 0 : i32
    return %arg0, %arg2 : i32, i32
  }
  func.func @transform_1(%arg0: i32, %arg1: i32, %arg2: i32) -> (i32, i32) {
    %c0_i32 = arith.constant 0 : i32
    return %arg2, %arg1 : i32, i32
  }
  func.func @transform_2(%arg0: i32, %arg1: i32, %arg2: i32) -> (i32, i32) {
    %c0_i32 = arith.constant 0 : i32
    %c0_i32_0 = arith.constant 0 : i32
    return %c0_i32, %arg1 : i32, i32
  }
  func.func @transform_3(%arg0: i32, %arg1: i32, %arg2: i32) -> (i32, i32) {
    %c0_i32 = arith.constant 0 : i32
    return %arg0, %arg1 : i32, i32
  }
}

module attributes {stable_mosaic.version = 11 : i64} {
  func.func @_tapconv_kernel(%arg0: i32, %arg1: i32, %arg2: memref<1x24x128xf32, #tpu.memory_space<vmem>>, %arg3: memref<3x128x128xbf16, #tpu.memory_space<vmem>>, %arg4: memref<1x128xf32, #tpu.memory_space<vmem>>, %arg5: memref<1x16x128xf32, #tpu.memory_space<vmem>>, %arg6: memref<16x128xf32, #tpu.memory_space<vmem>>) attributes {dimension_semantics = [#tpu.dimension_semantics<parallel>, #tpu.dimension_semantics<arbitrary>], iteration_bounds = array<i64: 2, 1>, scalar_prefetch = 0 : i64, scratch_operands = 1 : i64, tpu.core_type = #tpu.core_type<tc>, window_params = [{transform_indices = @transform_0, window_bounds = array<i64: 1, 24, 128>}, {transform_indices = @transform_1, window_bounds = array<i64: 3, 128, 128>}, {pipeline_mode = #tpu.pipeline_mode<synchronous>, transform_indices = @transform_2, window_bounds = array<i64: 1, 128>}, {transform_indices = @transform_3, window_bounds = array<i64: 1, 16, 128>}]} {
    %c0_i32 = arith.constant 0 : i32
    %0 = arith.cmpi eq, %arg1, %c0_i32 : i32
    %1 = arith.extui %0 : i1 to i32
    %c0_i32_0 = arith.constant 0 : i32
    %2 = arith.cmpi ne, %1, %c0_i32_0 : i32
    scf.if %2 {
      %cst_30 = arith.constant 0.000000e+00 : f32
      %40 = vector.broadcast %cst_30 : f32 to vector<16x128xf32>
      %c0_31 = arith.constant 0 : index
      %c0_32 = arith.constant 0 : index
      %41 = vector.load %arg6[%c0_31, %c0_32] : memref<16x128xf32, #tpu.memory_space<vmem>>, vector<16x128xf32>
      tpu.vector_store %arg6[%c0_31, %c0_32], %40 {strides = array<i32>} : memref<16x128xf32, #tpu.memory_space<vmem>>, vector<16x128xf32>,
    } else {
    }
    %c3_i32 = arith.constant 3 : i32
    %3 = arith.muli %arg1, %c3_i32 : i32
    %c0_i32_1 = arith.constant 0 : i32
    %4 = arith.addi %3, %c0_i32_1 : i32
    %c0 = arith.constant 0 : index
    %5 = arith.index_cast %4 : i32 to index
    %c0_2 = arith.constant 0 : index
    %6 = vector.load %arg2[%c0, %5, %c0_2] : memref<1x24x128xf32, #tpu.memory_space<vmem>>, vector<1x16x128xf32>
    %7 = vector.shape_cast %6 : vector<1x16x128xf32> to vector<16x128xf32>
    %c0_3 = arith.constant 0 : index
    %c0_4 = arith.constant 0 : index
    %8 = vector.load %arg6[%c0_3, %c0_4] : memref<16x128xf32, #tpu.memory_space<vmem>>, vector<16x128xf32>
    %9 = arith.truncf %7 : vector<16x128xf32> to vector<16x128xbf16>
    %c0_5 = arith.constant 0 : index
    %c0_6 = arith.constant 0 : index
    %c0_7 = arith.constant 0 : index
    %10 = vector.load %arg3[%c0_5, %c0_6, %c0_7] : memref<3x128x128xbf16, #tpu.memory_space<vmem>>, vector<1x128x128xbf16>
    %11 = vector.shape_cast %10 : vector<1x128x128xbf16> to vector<128x128xbf16>
    %cst = arith.constant dense<0.000000e+00> : vector<16x128xf32>
    %12 = tpu.matmul %9, %11, %cst {dimension_numbers = #tpu.dot_dimension_numbers<[1], [0], [0], [1], [0, 0, 1, 1], [], []>} : vector<16x128xbf16>, vector<128x128xbf16>, vector<16x128xf32> -> vector<16x128xf32>
    %13 = arith.addf %8, %12 : vector<16x128xf32>
    %c0_8 = arith.constant 0 : index
    %c0_9 = arith.constant 0 : index
    %14 = vector.load %arg6[%c0_8, %c0_9] : memref<16x128xf32, #tpu.memory_space<vmem>>, vector<16x128xf32>
    tpu.vector_store %arg6[%c0_8, %c0_9], %13 {strides = array<i32>} : memref<16x128xf32, #tpu.memory_space<vmem>>, vector<16x128xf32>,
    %c1_i32 = arith.constant 1 : i32
    %15 = arith.addi %3, %c1_i32 : i32
    %c0_10 = arith.constant 0 : index
    %16 = arith.index_cast %15 : i32 to index
    %c0_11 = arith.constant 0 : index
    %17 = vector.load %arg2[%c0_10, %16, %c0_11] : memref<1x24x128xf32, #tpu.memory_space<vmem>>, vector<1x16x128xf32>
    %18 = vector.shape_cast %17 : vector<1x16x128xf32> to vector<16x128xf32>
    %c0_12 = arith.constant 0 : index
    %c0_13 = arith.constant 0 : index
    %19 = vector.load %arg6[%c0_12, %c0_13] : memref<16x128xf32, #tpu.memory_space<vmem>>, vector<16x128xf32>
    %20 = arith.truncf %18 : vector<16x128xf32> to vector<16x128xbf16>
    %c1 = arith.constant 1 : index
    %c0_14 = arith.constant 0 : index
    %c0_15 = arith.constant 0 : index
    %21 = vector.load %arg3[%c1, %c0_14, %c0_15] : memref<3x128x128xbf16, #tpu.memory_space<vmem>>, vector<1x128x128xbf16>
    %22 = vector.shape_cast %21 : vector<1x128x128xbf16> to vector<128x128xbf16>
    %cst_16 = arith.constant dense<0.000000e+00> : vector<16x128xf32>
    %23 = tpu.matmul %20, %22, %cst_16 {dimension_numbers = #tpu.dot_dimension_numbers<[1], [0], [0], [1], [0, 0, 1, 1], [], []>} : vector<16x128xbf16>, vector<128x128xbf16>, vector<16x128xf32> -> vector<16x128xf32>
    %24 = arith.addf %19, %23 : vector<16x128xf32>
    %c0_17 = arith.constant 0 : index
    %c0_18 = arith.constant 0 : index
    %25 = vector.load %arg6[%c0_17, %c0_18] : memref<16x128xf32, #tpu.memory_space<vmem>>, vector<16x128xf32>
    tpu.vector_store %arg6[%c0_17, %c0_18], %24 {strides = array<i32>} : memref<16x128xf32, #tpu.memory_space<vmem>>, vector<16x128xf32>,
    %c2_i32 = arith.constant 2 : i32
    %26 = arith.addi %3, %c2_i32 : i32
    %c0_19 = arith.constant 0 : index
    %27 = arith.index_cast %26 : i32 to index
    %c0_20 = arith.constant 0 : index
    %28 = vector.load %arg2[%c0_19, %27, %c0_20] : memref<1x24x128xf32, #tpu.memory_space<vmem>>, vector<1x16x128xf32>
    %29 = vector.shape_cast %28 : vector<1x16x128xf32> to vector<16x128xf32>
    %c0_21 = arith.constant 0 : index
    %c0_22 = arith.constant 0 : index
    %30 = vector.load %arg6[%c0_21, %c0_22] : memref<16x128xf32, #tpu.memory_space<vmem>>, vector<16x128xf32>
    %31 = arith.truncf %29 : vector<16x128xf32> to vector<16x128xbf16>
    %c2 = arith.constant 2 : index
    %c0_23 = arith.constant 0 : index
    %c0_24 = arith.constant 0 : index
    %32 = vector.load %arg3[%c2, %c0_23, %c0_24] : memref<3x128x128xbf16, #tpu.memory_space<vmem>>, vector<1x128x128xbf16>
    %33 = vector.shape_cast %32 : vector<1x128x128xbf16> to vector<128x128xbf16>
    %cst_25 = arith.constant dense<0.000000e+00> : vector<16x128xf32>
    %34 = tpu.matmul %31, %33, %cst_25 {dimension_numbers = #tpu.dot_dimension_numbers<[1], [0], [0], [1], [0, 0, 1, 1], [], []>} : vector<16x128xbf16>, vector<128x128xbf16>, vector<16x128xf32> -> vector<16x128xf32>
    %35 = arith.addf %30, %34 : vector<16x128xf32>
    %c0_26 = arith.constant 0 : index
    %c0_27 = arith.constant 0 : index
    %36 = vector.load %arg6[%c0_26, %c0_27] : memref<16x128xf32, #tpu.memory_space<vmem>>, vector<16x128xf32>
    tpu.vector_store %arg6[%c0_26, %c0_27], %35 {strides = array<i32>} : memref<16x128xf32, #tpu.memory_space<vmem>>, vector<16x128xf32>,
    %c0_i32_28 = arith.constant 0 : i32
    %37 = arith.cmpi eq, %arg1, %c0_i32_28 : i32
    %38 = arith.extui %37 : i1 to i32
    %c0_i32_29 = arith.constant 0 : i32
    %39 = arith.cmpi ne, %38, %c0_i32_29 : i32
    scf.if %39 {
      %c0_30 = arith.constant 0 : index
      %c0_31 = arith.constant 0 : index
      %40 = vector.load %arg6[%c0_30, %c0_31] : memref<16x128xf32, #tpu.memory_space<vmem>>, vector<16x128xf32>
      %c0_32 = arith.constant 0 : index
      %c0_33 = arith.constant 0 : index
      %41 = vector.load %arg4[%c0_32, %c0_33] : memref<1x128xf32, #tpu.memory_space<vmem>>, vector<1x128xf32>
      %42 = vector.broadcast %41 : vector<1x128xf32> to vector<16x128xf32>
      %43 = arith.addf %40, %42 : vector<16x128xf32>
      %c0_34 = arith.constant 0 : index
      %c0_35 = arith.constant 0 : index
      %c0_36 = arith.constant 0 : index
      %44 = vector.load %arg5[%c0_34, %c0_35, %c0_36] : memref<1x16x128xf32, #tpu.memory_space<vmem>>, vector<1x16x128xf32>
      %45 = vector.shape_cast %44 : vector<1x16x128xf32> to vector<16x128xf32>
      %46 = vector.shape_cast %43 : vector<16x128xf32> to vector<1x16x128xf32>
      tpu.vector_store %arg5[%c0_34, %c0_35, %c0_36], %46 {strides = array<i32>} : memref<1x16x128xf32, #tpu.memory_space<vmem>>, vector<1x16x128xf32>,
    } else {
    }
    return
  }
  func.func @transform_0(%arg0: i32, %arg1: i32) -> (i32, i32, i32) {
    %c0_i32 = arith.constant 0 : i32
    %c0_i32_0 = arith.constant 0 : i32
    %c0_i32_1 = arith.constant 0 : i32
    return %arg0, %c0_i32, %c0_i32_0 : i32, i32, i32
  }
  func.func @transform_1(%arg0: i32, %arg1: i32) -> (i32, i32, i32) {
    %c0_i32 = arith.constant 0 : i32
    %c0_i32_0 = arith.constant 0 : i32
    %c0_i32_1 = arith.constant 0 : i32
    return %arg1, %c0_i32, %c0_i32_0 : i32, i32, i32
  }
  func.func @transform_2(%arg0: i32, %arg1: i32) -> (i32, i32) {
    %c0_i32 = arith.constant 0 : i32
    %c0_i32_0 = arith.constant 0 : i32
    %c0_i32_1 = arith.constant 0 : i32
    return %c0_i32, %c0_i32_0 : i32, i32
  }
  func.func @transform_3(%arg0: i32, %arg1: i32) -> (i32, i32, i32) {
    %c0_i32 = arith.constant 0 : i32
    %c0_i32_0 = arith.constant 0 : i32
    %c0_i32_1 = arith.constant 0 : i32
    return %arg0, %c0_i32, %c0_i32_0 : i32, i32, i32
  }
}

module attributes {stable_mosaic.version = 11 : i64} {
  func.func @_tapconv_kernel(%arg0: i32, %arg1: i32, %arg2: memref<1x24x128xf32, #tpu.memory_space<vmem>>, %arg3: memref<3x128x128xbf16, #tpu.memory_space<vmem>>, %arg4: memref<1x128xf32, #tpu.memory_space<vmem>>, %arg5: memref<1x16x128xf32, #tpu.memory_space<vmem>>, %arg6: memref<16x128xf32, #tpu.memory_space<vmem>>) attributes {dimension_semantics = [#tpu.dimension_semantics<parallel>, #tpu.dimension_semantics<arbitrary>], iteration_bounds = array<i64: 2, 1>, scalar_prefetch = 0 : i64, scratch_operands = 1 : i64, tpu.core_type = #tpu.core_type<tc>, window_params = [{transform_indices = @transform_0, window_bounds = array<i64: 1, 24, 128>}, {transform_indices = @transform_1, window_bounds = array<i64: 3, 128, 128>}, {pipeline_mode = #tpu.pipeline_mode<synchronous>, transform_indices = @transform_2, window_bounds = array<i64: 1, 128>}, {transform_indices = @transform_3, window_bounds = array<i64: 1, 16, 128>}]} {
    %c0_i32 = arith.constant 0 : i32
    %0 = arith.cmpi eq, %arg1, %c0_i32 : i32
    %1 = arith.extui %0 : i1 to i32
    %c0_i32_0 = arith.constant 0 : i32
    %2 = arith.cmpi ne, %1, %c0_i32_0 : i32
    scf.if %2 {
      %cst_30 = arith.constant 0.000000e+00 : f32
      %40 = vector.broadcast %cst_30 : f32 to vector<16x128xf32>
      %c0_31 = arith.constant 0 : index
      %c0_32 = arith.constant 0 : index
      %41 = vector.load %arg6[%c0_31, %c0_32] : memref<16x128xf32, #tpu.memory_space<vmem>>, vector<16x128xf32>
      tpu.vector_store %arg6[%c0_31, %c0_32], %40 {strides = array<i32>} : memref<16x128xf32, #tpu.memory_space<vmem>>, vector<16x128xf32>,
    } else {
    }
    %c6_i32 = arith.constant 6 : i32
    %3 = arith.muli %arg1, %c6_i32 : i32
    %c0_i32_1 = arith.constant 0 : i32
    %4 = arith.addi %3, %c0_i32_1 : i32
    %c0 = arith.constant 0 : index
    %5 = arith.index_cast %4 : i32 to index
    %c0_2 = arith.constant 0 : index
    %6 = vector.load %arg2[%c0, %5, %c0_2] : memref<1x24x128xf32, #tpu.memory_space<vmem>>, vector<1x16x128xf32>
    %7 = vector.shape_cast %6 : vector<1x16x128xf32> to vector<16x128xf32>
    %c0_3 = arith.constant 0 : index
    %c0_4 = arith.constant 0 : index
    %8 = vector.load %arg6[%c0_3, %c0_4] : memref<16x128xf32, #tpu.memory_space<vmem>>, vector<16x128xf32>
    %9 = arith.truncf %7 : vector<16x128xf32> to vector<16x128xbf16>
    %c0_5 = arith.constant 0 : index
    %c0_6 = arith.constant 0 : index
    %c0_7 = arith.constant 0 : index
    %10 = vector.load %arg3[%c0_5, %c0_6, %c0_7] : memref<3x128x128xbf16, #tpu.memory_space<vmem>>, vector<1x128x128xbf16>
    %11 = vector.shape_cast %10 : vector<1x128x128xbf16> to vector<128x128xbf16>
    %cst = arith.constant dense<0.000000e+00> : vector<16x128xf32>
    %12 = tpu.matmul %9, %11, %cst {dimension_numbers = #tpu.dot_dimension_numbers<[1], [0], [0], [1], [0, 0, 1, 1], [], []>} : vector<16x128xbf16>, vector<128x128xbf16>, vector<16x128xf32> -> vector<16x128xf32>
    %13 = arith.addf %8, %12 : vector<16x128xf32>
    %c0_8 = arith.constant 0 : index
    %c0_9 = arith.constant 0 : index
    %14 = vector.load %arg6[%c0_8, %c0_9] : memref<16x128xf32, #tpu.memory_space<vmem>>, vector<16x128xf32>
    tpu.vector_store %arg6[%c0_8, %c0_9], %13 {strides = array<i32>} : memref<16x128xf32, #tpu.memory_space<vmem>>, vector<16x128xf32>,
    %c2_i32 = arith.constant 2 : i32
    %15 = arith.addi %3, %c2_i32 : i32
    %c0_10 = arith.constant 0 : index
    %16 = arith.index_cast %15 : i32 to index
    %c0_11 = arith.constant 0 : index
    %17 = vector.load %arg2[%c0_10, %16, %c0_11] : memref<1x24x128xf32, #tpu.memory_space<vmem>>, vector<1x16x128xf32>
    %18 = vector.shape_cast %17 : vector<1x16x128xf32> to vector<16x128xf32>
    %c0_12 = arith.constant 0 : index
    %c0_13 = arith.constant 0 : index
    %19 = vector.load %arg6[%c0_12, %c0_13] : memref<16x128xf32, #tpu.memory_space<vmem>>, vector<16x128xf32>
    %20 = arith.truncf %18 : vector<16x128xf32> to vector<16x128xbf16>
    %c1 = arith.constant 1 : index
    %c0_14 = arith.constant 0 : index
    %c0_15 = arith.constant 0 : index
    %21 = vector.load %arg3[%c1, %c0_14, %c0_15] : memref<3x128x128xbf16, #tpu.memory_space<vmem>>, vector<1x128x128xbf16>
    %22 = vector.shape_cast %21 : vector<1x128x128xbf16> to vector<128x128xbf16>
    %cst_16 = arith.constant dense<0.000000e+00> : vector<16x128xf32>
    %23 = tpu.matmul %20, %22, %cst_16 {dimension_numbers = #tpu.dot_dimension_numbers<[1], [0], [0], [1], [0, 0, 1, 1], [], []>} : vector<16x128xbf16>, vector<128x128xbf16>, vector<16x128xf32> -> vector<16x128xf32>
    %24 = arith.addf %19, %23 : vector<16x128xf32>
    %c0_17 = arith.constant 0 : index
    %c0_18 = arith.constant 0 : index
    %25 = vector.load %arg6[%c0_17, %c0_18] : memref<16x128xf32, #tpu.memory_space<vmem>>, vector<16x128xf32>
    tpu.vector_store %arg6[%c0_17, %c0_18], %24 {strides = array<i32>} : memref<16x128xf32, #tpu.memory_space<vmem>>, vector<16x128xf32>,
    %c4_i32 = arith.constant 4 : i32
    %26 = arith.addi %3, %c4_i32 : i32
    %c0_19 = arith.constant 0 : index
    %27 = arith.index_cast %26 : i32 to index
    %c0_20 = arith.constant 0 : index
    %28 = vector.load %arg2[%c0_19, %27, %c0_20] : memref<1x24x128xf32, #tpu.memory_space<vmem>>, vector<1x16x128xf32>
    %29 = vector.shape_cast %28 : vector<1x16x128xf32> to vector<16x128xf32>
    %c0_21 = arith.constant 0 : index
    %c0_22 = arith.constant 0 : index
    %30 = vector.load %arg6[%c0_21, %c0_22] : memref<16x128xf32, #tpu.memory_space<vmem>>, vector<16x128xf32>
    %31 = arith.truncf %29 : vector<16x128xf32> to vector<16x128xbf16>
    %c2 = arith.constant 2 : index
    %c0_23 = arith.constant 0 : index
    %c0_24 = arith.constant 0 : index
    %32 = vector.load %arg3[%c2, %c0_23, %c0_24] : memref<3x128x128xbf16, #tpu.memory_space<vmem>>, vector<1x128x128xbf16>
    %33 = vector.shape_cast %32 : vector<1x128x128xbf16> to vector<128x128xbf16>
    %cst_25 = arith.constant dense<0.000000e+00> : vector<16x128xf32>
    %34 = tpu.matmul %31, %33, %cst_25 {dimension_numbers = #tpu.dot_dimension_numbers<[1], [0], [0], [1], [0, 0, 1, 1], [], []>} : vector<16x128xbf16>, vector<128x128xbf16>, vector<16x128xf32> -> vector<16x128xf32>
    %35 = arith.addf %30, %34 : vector<16x128xf32>
    %c0_26 = arith.constant 0 : index
    %c0_27 = arith.constant 0 : index
    %36 = vector.load %arg6[%c0_26, %c0_27] : memref<16x128xf32, #tpu.memory_space<vmem>>, vector<16x128xf32>
    tpu.vector_store %arg6[%c0_26, %c0_27], %35 {strides = array<i32>} : memref<16x128xf32, #tpu.memory_space<vmem>>, vector<16x128xf32>,
    %c0_i32_28 = arith.constant 0 : i32
    %37 = arith.cmpi eq, %arg1, %c0_i32_28 : i32
    %38 = arith.extui %37 : i1 to i32
    %c0_i32_29 = arith.constant 0 : i32
    %39 = arith.cmpi ne, %38, %c0_i32_29 : i32
    scf.if %39 {
      %c0_30 = arith.constant 0 : index
      %c0_31 = arith.constant 0 : index
      %40 = vector.load %arg6[%c0_30, %c0_31] : memref<16x128xf32, #tpu.memory_space<vmem>>, vector<16x128xf32>
      %c0_32 = arith.constant 0 : index
      %c0_33 = arith.constant 0 : index
      %41 = vector.load %arg4[%c0_32, %c0_33] : memref<1x128xf32, #tpu.memory_space<vmem>>, vector<1x128xf32>
      %42 = vector.broadcast %41 : vector<1x128xf32> to vector<16x128xf32>
      %43 = arith.addf %40, %42 : vector<16x128xf32>
      %c0_34 = arith.constant 0 : index
      %c0_35 = arith.constant 0 : index
      %c0_36 = arith.constant 0 : index
      %44 = vector.load %arg5[%c0_34, %c0_35, %c0_36] : memref<1x16x128xf32, #tpu.memory_space<vmem>>, vector<1x16x128xf32>
      %45 = vector.shape_cast %44 : vector<1x16x128xf32> to vector<16x128xf32>
      %46 = vector.shape_cast %43 : vector<16x128xf32> to vector<1x16x128xf32>
      tpu.vector_store %arg5[%c0_34, %c0_35, %c0_36], %46 {strides = array<i32>} : memref<1x16x128xf32, #tpu.memory_space<vmem>>, vector<1x16x128xf32>,
    } else {
    }
    return
  }
  func.func @transform_0(%arg0: i32, %arg1: i32) -> (i32, i32, i32) {
    %c0_i32 = arith.constant 0 : i32
    %c0_i32_0 = arith.constant 0 : i32
    %c0_i32_1 = arith.constant 0 : i32
    return %arg0, %c0_i32, %c0_i32_0 : i32, i32, i32
  }
  func.func @transform_1(%arg0: i32, %arg1: i32) -> (i32, i32, i32) {
    %c0_i32 = arith.constant 0 : i32
    %c0_i32_0 = arith.constant 0 : i32
    %c0_i32_1 = arith.constant 0 : i32
    return %arg1, %c0_i32, %c0_i32_0 : i32, i32, i32
  }
  func.func @transform_2(%arg0: i32, %arg1: i32) -> (i32, i32) {
    %c0_i32 = arith.constant 0 : i32
    %c0_i32_0 = arith.constant 0 : i32
    %c0_i32_1 = arith.constant 0 : i32
    return %c0_i32, %c0_i32_0 : i32, i32
  }
  func.func @transform_3(%arg0: i32, %arg1: i32) -> (i32, i32, i32) {
    %c0_i32 = arith.constant 0 : i32
    %c0_i32_0 = arith.constant 0 : i32
    %c0_i32_1 = arith.constant 0 : i32
    return %arg0, %c0_i32, %c0_i32_0 : i32, i32, i32
  }
}

module attributes {stable_mosaic.version = 11 : i64} {
  func.func @_tapconv_kernel(%arg0: i32, %arg1: i32, %arg2: memref<1x24x128xf32, #tpu.memory_space<vmem>>, %arg3: memref<3x128x128xbf16, #tpu.memory_space<vmem>>, %arg4: memref<1x128xf32, #tpu.memory_space<vmem>>, %arg5: memref<1x16x128xf32, #tpu.memory_space<vmem>>, %arg6: memref<16x128xf32, #tpu.memory_space<vmem>>) attributes {dimension_semantics = [#tpu.dimension_semantics<parallel>, #tpu.dimension_semantics<arbitrary>], iteration_bounds = array<i64: 2, 1>, scalar_prefetch = 0 : i64, scratch_operands = 1 : i64, tpu.core_type = #tpu.core_type<tc>, window_params = [{transform_indices = @transform_0, window_bounds = array<i64: 1, 24, 128>}, {transform_indices = @transform_1, window_bounds = array<i64: 3, 128, 128>}, {pipeline_mode = #tpu.pipeline_mode<synchronous>, transform_indices = @transform_2, window_bounds = array<i64: 1, 128>}, {transform_indices = @transform_3, window_bounds = array<i64: 1, 16, 128>}]} {
    %c0_i32 = arith.constant 0 : i32
    %0 = arith.cmpi eq, %arg1, %c0_i32 : i32
    %1 = arith.extui %0 : i1 to i32
    %c0_i32_0 = arith.constant 0 : i32
    %2 = arith.cmpi ne, %1, %c0_i32_0 : i32
    scf.if %2 {
      %cst_30 = arith.constant 0.000000e+00 : f32
      %40 = vector.broadcast %cst_30 : f32 to vector<16x128xf32>
      %c0_31 = arith.constant 0 : index
      %c0_32 = arith.constant 0 : index
      %41 = vector.load %arg6[%c0_31, %c0_32] : memref<16x128xf32, #tpu.memory_space<vmem>>, vector<16x128xf32>
      tpu.vector_store %arg6[%c0_31, %c0_32], %40 {strides = array<i32>} : memref<16x128xf32, #tpu.memory_space<vmem>>, vector<16x128xf32>,
    } else {
    }
    %c12_i32 = arith.constant 12 : i32
    %3 = arith.muli %arg1, %c12_i32 : i32
    %c0_i32_1 = arith.constant 0 : i32
    %4 = arith.addi %3, %c0_i32_1 : i32
    %c0 = arith.constant 0 : index
    %5 = arith.index_cast %4 : i32 to index
    %c0_2 = arith.constant 0 : index
    %6 = vector.load %arg2[%c0, %5, %c0_2] : memref<1x24x128xf32, #tpu.memory_space<vmem>>, vector<1x16x128xf32>
    %7 = vector.shape_cast %6 : vector<1x16x128xf32> to vector<16x128xf32>
    %c0_3 = arith.constant 0 : index
    %c0_4 = arith.constant 0 : index
    %8 = vector.load %arg6[%c0_3, %c0_4] : memref<16x128xf32, #tpu.memory_space<vmem>>, vector<16x128xf32>
    %9 = arith.truncf %7 : vector<16x128xf32> to vector<16x128xbf16>
    %c0_5 = arith.constant 0 : index
    %c0_6 = arith.constant 0 : index
    %c0_7 = arith.constant 0 : index
    %10 = vector.load %arg3[%c0_5, %c0_6, %c0_7] : memref<3x128x128xbf16, #tpu.memory_space<vmem>>, vector<1x128x128xbf16>
    %11 = vector.shape_cast %10 : vector<1x128x128xbf16> to vector<128x128xbf16>
    %cst = arith.constant dense<0.000000e+00> : vector<16x128xf32>
    %12 = tpu.matmul %9, %11, %cst {dimension_numbers = #tpu.dot_dimension_numbers<[1], [0], [0], [1], [0, 0, 1, 1], [], []>} : vector<16x128xbf16>, vector<128x128xbf16>, vector<16x128xf32> -> vector<16x128xf32>
    %13 = arith.addf %8, %12 : vector<16x128xf32>
    %c0_8 = arith.constant 0 : index
    %c0_9 = arith.constant 0 : index
    %14 = vector.load %arg6[%c0_8, %c0_9] : memref<16x128xf32, #tpu.memory_space<vmem>>, vector<16x128xf32>
    tpu.vector_store %arg6[%c0_8, %c0_9], %13 {strides = array<i32>} : memref<16x128xf32, #tpu.memory_space<vmem>>, vector<16x128xf32>,
    %c4_i32 = arith.constant 4 : i32
    %15 = arith.addi %3, %c4_i32 : i32
    %c0_10 = arith.constant 0 : index
    %16 = arith.index_cast %15 : i32 to index
    %c0_11 = arith.constant 0 : index
    %17 = vector.load %arg2[%c0_10, %16, %c0_11] : memref<1x24x128xf32, #tpu.memory_space<vmem>>, vector<1x16x128xf32>
    %18 = vector.shape_cast %17 : vector<1x16x128xf32> to vector<16x128xf32>
    %c0_12 = arith.constant 0 : index
    %c0_13 = arith.constant 0 : index
    %19 = vector.load %arg6[%c0_12, %c0_13] : memref<16x128xf32, #tpu.memory_space<vmem>>, vector<16x128xf32>
    %20 = arith.truncf %18 : vector<16x128xf32> to vector<16x128xbf16>
    %c1 = arith.constant 1 : index
    %c0_14 = arith.constant 0 : index
    %c0_15 = arith.constant 0 : index
    %21 = vector.load %arg3[%c1, %c0_14, %c0_15] : memref<3x128x128xbf16, #tpu.memory_space<vmem>>, vector<1x128x128xbf16>
    %22 = vector.shape_cast %21 : vector<1x128x128xbf16> to vector<128x128xbf16>
    %cst_16 = arith.constant dense<0.000000e+00> : vector<16x128xf32>
    %23 = tpu.matmul %20, %22, %cst_16 {dimension_numbers = #tpu.dot_dimension_numbers<[1], [0], [0], [1], [0, 0, 1, 1], [], []>} : vector<16x128xbf16>, vector<128x128xbf16>, vector<16x128xf32> -> vector<16x128xf32>
    %24 = arith.addf %19, %23 : vector<16x128xf32>
    %c0_17 = arith.constant 0 : index
    %c0_18 = arith.constant 0 : index
    %25 = vector.load %arg6[%c0_17, %c0_18] : memref<16x128xf32, #tpu.memory_space<vmem>>, vector<16x128xf32>
    tpu.vector_store %arg6[%c0_17, %c0_18], %24 {strides = array<i32>} : memref<16x128xf32, #tpu.memory_space<vmem>>, vector<16x128xf32>,
    %c8_i32 = arith.constant 8 : i32
    %26 = arith.addi %3, %c8_i32 : i32
    %c0_19 = arith.constant 0 : index
    %27 = arith.index_cast %26 : i32 to index
    %c0_20 = arith.constant 0 : index
    %28 = vector.load %arg2[%c0_19, %27, %c0_20] : memref<1x24x128xf32, #tpu.memory_space<vmem>>, vector<1x16x128xf32>
    %29 = vector.shape_cast %28 : vector<1x16x128xf32> to vector<16x128xf32>
    %c0_21 = arith.constant 0 : index
    %c0_22 = arith.constant 0 : index
    %30 = vector.load %arg6[%c0_21, %c0_22] : memref<16x128xf32, #tpu.memory_space<vmem>>, vector<16x128xf32>
    %31 = arith.truncf %29 : vector<16x128xf32> to vector<16x128xbf16>
    %c2 = arith.constant 2 : index
    %c0_23 = arith.constant 0 : index
    %c0_24 = arith.constant 0 : index
    %32 = vector.load %arg3[%c2, %c0_23, %c0_24] : memref<3x128x128xbf16, #tpu.memory_space<vmem>>, vector<1x128x128xbf16>
    %33 = vector.shape_cast %32 : vector<1x128x128xbf16> to vector<128x128xbf16>
    %cst_25 = arith.constant dense<0.000000e+00> : vector<16x128xf32>
    %34 = tpu.matmul %31, %33, %cst_25 {dimension_numbers = #tpu.dot_dimension_numbers<[1], [0], [0], [1], [0, 0, 1, 1], [], []>} : vector<16x128xbf16>, vector<128x128xbf16>, vector<16x128xf32> -> vector<16x128xf32>
    %35 = arith.addf %30, %34 : vector<16x128xf32>
    %c0_26 = arith.constant 0 : index
    %c0_27 = arith.constant 0 : index
    %36 = vector.load %arg6[%c0_26, %c0_27] : memref<16x128xf32, #tpu.memory_space<vmem>>, vector<16x128xf32>
    tpu.vector_store %arg6[%c0_26, %c0_27], %35 {strides = array<i32>} : memref<16x128xf32, #tpu.memory_space<vmem>>, vector<16x128xf32>,
    %c0_i32_28 = arith.constant 0 : i32
    %37 = arith.cmpi eq, %arg1, %c0_i32_28 : i32
    %38 = arith.extui %37 : i1 to i32
    %c0_i32_29 = arith.constant 0 : i32
    %39 = arith.cmpi ne, %38, %c0_i32_29 : i32
    scf.if %39 {
      %c0_30 = arith.constant 0 : index
      %c0_31 = arith.constant 0 : index
      %40 = vector.load %arg6[%c0_30, %c0_31] : memref<16x128xf32, #tpu.memory_space<vmem>>, vector<16x128xf32>
      %c0_32 = arith.constant 0 : index
      %c0_33 = arith.constant 0 : index
      %41 = vector.load %arg4[%c0_32, %c0_33] : memref<1x128xf32, #tpu.memory_space<vmem>>, vector<1x128xf32>
      %42 = vector.broadcast %41 : vector<1x128xf32> to vector<16x128xf32>
      %43 = arith.addf %40, %42 : vector<16x128xf32>
      %c0_34 = arith.constant 0 : index
      %c0_35 = arith.constant 0 : index
      %c0_36 = arith.constant 0 : index
      %44 = vector.load %arg5[%c0_34, %c0_35, %c0_36] : memref<1x16x128xf32, #tpu.memory_space<vmem>>, vector<1x16x128xf32>
      %45 = vector.shape_cast %44 : vector<1x16x128xf32> to vector<16x128xf32>
      %46 = vector.shape_cast %43 : vector<16x128xf32> to vector<1x16x128xf32>
      tpu.vector_store %arg5[%c0_34, %c0_35, %c0_36], %46 {strides = array<i32>} : memref<1x16x128xf32, #tpu.memory_space<vmem>>, vector<1x16x128xf32>,
    } else {
    }
    return
  }
  func.func @transform_0(%arg0: i32, %arg1: i32) -> (i32, i32, i32) {
    %c0_i32 = arith.constant 0 : i32
    %c0_i32_0 = arith.constant 0 : i32
    %c0_i32_1 = arith.constant 0 : i32
    return %arg0, %c0_i32, %c0_i32_0 : i32, i32, i32
  }
  func.func @transform_1(%arg0: i32, %arg1: i32) -> (i32, i32, i32) {
    %c0_i32 = arith.constant 0 : i32
    %c0_i32_0 = arith.constant 0 : i32
    %c0_i32_1 = arith.constant 0 : i32
    return %arg1, %c0_i32, %c0_i32_0 : i32, i32, i32
  }
  func.func @transform_2(%arg0: i32, %arg1: i32) -> (i32, i32) {
    %c0_i32 = arith.constant 0 : i32
    %c0_i32_0 = arith.constant 0 : i32
    %c0_i32_1 = arith.constant 0 : i32
    return %c0_i32, %c0_i32_0 : i32, i32
  }
  func.func @transform_3(%arg0: i32, %arg1: i32) -> (i32, i32, i32) {
    %c0_i32 = arith.constant 0 : i32
    %c0_i32_0 = arith.constant 0 : i32
    %c0_i32_1 = arith.constant 0 : i32
    return %arg0, %c0_i32, %c0_i32_0 : i32, i32, i32
  }
}

module attributes {stable_mosaic.version = 11 : i64} {
  func.func @_bmm_kernel(%arg0: i32, %arg1: memref<8x8x128xbf16, #tpu.memory_space<vmem>>, %arg2: memref<8x128x128xbf16, #tpu.memory_space<vmem>>, %arg3: memref<8x8x128xf32, #tpu.memory_space<vmem>>) attributes {dimension_semantics = [#tpu.dimension_semantics<parallel>], iteration_bounds = array<i64: 2>, scalar_prefetch = 0 : i64, scratch_operands = 0 : i64, tpu.core_type = #tpu.core_type<tc>, window_params = [{transform_indices = @transform_0, window_bounds = array<i64: 8, 8, 128>}, {transform_indices = @transform_1, window_bounds = array<i64: 8, 128, 128>}, {transform_indices = @transform_2, window_bounds = array<i64: 8, 8, 128>}]} {
    %c0 = arith.constant 0 : index
    %c0_0 = arith.constant 0 : index
    %c0_1 = arith.constant 0 : index
    %0 = vector.load %arg1[%c0, %c0_0, %c0_1] : memref<8x8x128xbf16, #tpu.memory_space<vmem>>, vector<8x8x128xbf16>
    %c0_2 = arith.constant 0 : index
    %c0_3 = arith.constant 0 : index
    %c0_4 = arith.constant 0 : index
    %1 = vector.load %arg2[%c0_2, %c0_3, %c0_4] : memref<8x128x128xbf16, #tpu.memory_space<vmem>>, vector<8x128x128xbf16>
    "tpu.trace_start"() <{level = 10 : i32, message = "gmk,gkn->gmn"}> : () -> ()
    %cst = arith.constant dense<0.000000e+00> : vector<8x8x128xf32>
    %2 = tpu.matmul %0, %1, %cst {dimension_numbers = #tpu.dot_dimension_numbers<[2], [1], [1], [2], [0, 0, 0, 1, 1, 2], [0], [0]>} : vector<8x8x128xbf16>, vector<8x128x128xbf16>, vector<8x8x128xf32> -> vector<8x8x128xf32>
    "tpu.trace_stop"() : () -> ()
    %c0_5 = arith.constant 0 : index
    %c0_6 = arith.constant 0 : index
    %c0_7 = arith.constant 0 : index
    %3 = vector.load %arg3[%c0_5, %c0_6, %c0_7] : memref<8x8x128xf32, #tpu.memory_space<vmem>>, vector<8x8x128xf32>
    tpu.vector_store %arg3[%c0_5, %c0_6, %c0_7], %2 {strides = array<i32>} : memref<8x8x128xf32, #tpu.memory_space<vmem>>, vector<8x8x128xf32>,
    return
  }
  func.func @transform_0(%arg0: i32) -> (i32, i32, i32) {
    %c0_i32 = arith.constant 0 : i32
    %c0_i32_0 = arith.constant 0 : i32
    %c0_i32_1 = arith.constant 0 : i32
    return %arg0, %c0_i32, %c0_i32_0 : i32, i32, i32
  }
  func.func @transform_1(%arg0: i32) -> (i32, i32, i32) {
    %c0_i32 = arith.constant 0 : i32
    %c0_i32_0 = arith.constant 0 : i32
    %c0_i32_1 = arith.constant 0 : i32
    return %arg0, %c0_i32, %c0_i32_0 : i32, i32, i32
  }
  func.func @transform_2(%arg0: i32) -> (i32, i32, i32) {
    %c0_i32 = arith.constant 0 : i32
    %c0_i32_0 = arith.constant 0 : i32
    %c0_i32_1 = arith.constant 0 : i32
    return %arg0, %c0_i32, %c0_i32_0 : i32, i32, i32
  }
}

module attributes {stable_mosaic.version = 11 : i64} {
  func.func @_bmm_kernel(%arg0: i32, %arg1: memref<8x8x128xbf16, #tpu.memory_space<vmem>>, %arg2: memref<8x128x128xbf16, #tpu.memory_space<vmem>>, %arg3: memref<8x8x128xf32, #tpu.memory_space<vmem>>) attributes {dimension_semantics = [#tpu.dimension_semantics<parallel>], iteration_bounds = array<i64: 2>, scalar_prefetch = 0 : i64, scratch_operands = 0 : i64, tpu.core_type = #tpu.core_type<tc>, window_params = [{transform_indices = @transform_0, window_bounds = array<i64: 8, 8, 128>}, {transform_indices = @transform_1, window_bounds = array<i64: 8, 128, 128>}, {transform_indices = @transform_2, window_bounds = array<i64: 8, 8, 128>}]} {
    %c0 = arith.constant 0 : index
    %c0_0 = arith.constant 0 : index
    %c0_1 = arith.constant 0 : index
    %0 = vector.load %arg1[%c0, %c0_0, %c0_1] : memref<8x8x128xbf16, #tpu.memory_space<vmem>>, vector<8x8x128xbf16>
    %c0_2 = arith.constant 0 : index
    %c0_3 = arith.constant 0 : index
    %c0_4 = arith.constant 0 : index
    %1 = vector.load %arg2[%c0_2, %c0_3, %c0_4] : memref<8x128x128xbf16, #tpu.memory_space<vmem>>, vector<8x128x128xbf16>
    "tpu.trace_start"() <{level = 10 : i32, message = "gmk,gnk->gmn"}> : () -> ()
    %cst = arith.constant dense<0.000000e+00> : vector<8x8x128xf32>
    %2 = tpu.matmul %0, %1, %cst {dimension_numbers = #tpu.dot_dimension_numbers<[2], [2], [1], [1], [0, 0, 0, 1, 1, 1], [0], [0]>} : vector<8x8x128xbf16>, vector<8x128x128xbf16>, vector<8x8x128xf32> -> vector<8x8x128xf32>
    "tpu.trace_stop"() : () -> ()
    %c0_5 = arith.constant 0 : index
    %c0_6 = arith.constant 0 : index
    %c0_7 = arith.constant 0 : index
    %3 = vector.load %arg3[%c0_5, %c0_6, %c0_7] : memref<8x8x128xf32, #tpu.memory_space<vmem>>, vector<8x8x128xf32>
    tpu.vector_store %arg3[%c0_5, %c0_6, %c0_7], %2 {strides = array<i32>} : memref<8x8x128xf32, #tpu.memory_space<vmem>>, vector<8x8x128xf32>,
    return
  }
  func.func @transform_0(%arg0: i32) -> (i32, i32, i32) {
    %c0_i32 = arith.constant 0 : i32
    %c0_i32_0 = arith.constant 0 : i32
    %c0_i32_1 = arith.constant 0 : i32
    return %arg0, %c0_i32, %c0_i32_0 : i32, i32, i32
  }
  func.func @transform_1(%arg0: i32) -> (i32, i32, i32) {
    %c0_i32 = arith.constant 0 : i32
    %c0_i32_0 = arith.constant 0 : i32
    %c0_i32_1 = arith.constant 0 : i32
    return %arg0, %c0_i32, %c0_i32_0 : i32, i32, i32
  }
  func.func @transform_2(%arg0: i32) -> (i32, i32, i32) {
    %c0_i32 = arith.constant 0 : i32
    %c0_i32_0 = arith.constant 0 : i32
    %c0_i32_1 = arith.constant 0 : i32
    return %arg0, %c0_i32, %c0_i32_0 : i32, i32, i32
  }
}

module attributes {stable_mosaic.version = 11 : i64} {
  func.func @_tapconv_kernel(%arg0: i32, %arg1: i32, %arg2: memref<1x144x128xf32, #tpu.memory_space<vmem>>, %arg3: memref<8x128x128xbf16, #tpu.memory_space<vmem>>, %arg4: memref<1x128xf32, #tpu.memory_space<vmem>>, %arg5: memref<1x16x128xf32, #tpu.memory_space<vmem>>, %arg6: memref<16x128xf32, #tpu.memory_space<vmem>>) attributes {dimension_semantics = [#tpu.dimension_semantics<parallel>, #tpu.dimension_semantics<arbitrary>], iteration_bounds = array<i64: 2, 16>, scalar_prefetch = 0 : i64, scratch_operands = 1 : i64, tpu.core_type = #tpu.core_type<tc>, window_params = [{transform_indices = @transform_0, window_bounds = array<i64: 1, 144, 128>}, {transform_indices = @transform_1, window_bounds = array<i64: 8, 128, 128>}, {pipeline_mode = #tpu.pipeline_mode<synchronous>, transform_indices = @transform_2, window_bounds = array<i64: 1, 128>}, {transform_indices = @transform_3, window_bounds = array<i64: 1, 16, 128>}]} {
    %c0_i32 = arith.constant 0 : i32
    %0 = arith.cmpi eq, %arg1, %c0_i32 : i32
    %1 = arith.extui %0 : i1 to i32
    %c0_i32_0 = arith.constant 0 : i32
    %2 = arith.cmpi ne, %1, %c0_i32_0 : i32
    scf.if %2 {
      %cst_74 = arith.constant 0.000000e+00 : f32
      %95 = vector.broadcast %cst_74 : f32 to vector<16x128xf32>
      %c0_75 = arith.constant 0 : index
      %c0_76 = arith.constant 0 : index
      %96 = vector.load %arg6[%c0_75, %c0_76] : memref<16x128xf32, #tpu.memory_space<vmem>>, vector<16x128xf32>
      tpu.vector_store %arg6[%c0_75, %c0_76], %95 {strides = array<i32>} : memref<16x128xf32, #tpu.memory_space<vmem>>, vector<16x128xf32>,
    } else {
    }
    %c8_i32 = arith.constant 8 : i32
    %3 = arith.muli %arg1, %c8_i32 : i32
    %c0_i32_1 = arith.constant 0 : i32
    %4 = arith.addi %3, %c0_i32_1 : i32
    %c0 = arith.constant 0 : index
    %5 = arith.index_cast %4 : i32 to index
    %c0_2 = arith.constant 0 : index
    %6 = vector.load %arg2[%c0, %5, %c0_2] : memref<1x144x128xf32, #tpu.memory_space<vmem>>, vector<1x16x128xf32>
    %7 = vector.shape_cast %6 : vector<1x16x128xf32> to vector<16x128xf32>
    %c0_3 = arith.constant 0 : index
    %c0_4 = arith.constant 0 : index
    %8 = vector.load %arg6[%c0_3, %c0_4] : memref<16x128xf32, #tpu.memory_space<vmem>>, vector<16x128xf32>
    %9 = arith.truncf %7 : vector<16x128xf32> to vector<16x128xbf16>
    %c0_5 = arith.constant 0 : index
    %c0_6 = arith.constant 0 : index
    %c0_7 = arith.constant 0 : index
    %10 = vector.load %arg3[%c0_5, %c0_6, %c0_7] : memref<8x128x128xbf16, #tpu.memory_space<vmem>>, vector<1x128x128xbf16>
    %11 = vector.shape_cast %10 : vector<1x128x128xbf16> to vector<128x128xbf16>
    %cst = arith.constant dense<0.000000e+00> : vector<16x128xf32>
    %12 = tpu.matmul %9, %11, %cst {dimension_numbers = #tpu.dot_dimension_numbers<[1], [0], [0], [1], [0, 0, 1, 1], [], []>} : vector<16x128xbf16>, vector<128x128xbf16>, vector<16x128xf32> -> vector<16x128xf32>
    %13 = arith.addf %8, %12 : vector<16x128xf32>
    %c0_8 = arith.constant 0 : index
    %c0_9 = arith.constant 0 : index
    %14 = vector.load %arg6[%c0_8, %c0_9] : memref<16x128xf32, #tpu.memory_space<vmem>>, vector<16x128xf32>
    tpu.vector_store %arg6[%c0_8, %c0_9], %13 {strides = array<i32>} : memref<16x128xf32, #tpu.memory_space<vmem>>, vector<16x128xf32>,
    %c1_i32 = arith.constant 1 : i32
    %15 = arith.addi %3, %c1_i32 : i32
    %c0_10 = arith.constant 0 : index
    %16 = arith.index_cast %15 : i32 to index
    %c0_11 = arith.constant 0 : index
    %17 = vector.load %arg2[%c0_10, %16, %c0_11] : memref<1x144x128xf32, #tpu.memory_space<vmem>>, vector<1x16x128xf32>
    %18 = vector.shape_cast %17 : vector<1x16x128xf32> to vector<16x128xf32>
    %c0_12 = arith.constant 0 : index
    %c0_13 = arith.constant 0 : index
    %19 = vector.load %arg6[%c0_12, %c0_13] : memref<16x128xf32, #tpu.memory_space<vmem>>, vector<16x128xf32>
    %20 = arith.truncf %18 : vector<16x128xf32> to vector<16x128xbf16>
    %c1 = arith.constant 1 : index
    %c0_14 = arith.constant 0 : index
    %c0_15 = arith.constant 0 : index
    %21 = vector.load %arg3[%c1, %c0_14, %c0_15] : memref<8x128x128xbf16, #tpu.memory_space<vmem>>, vector<1x128x128xbf16>
    %22 = vector.shape_cast %21 : vector<1x128x128xbf16> to vector<128x128xbf16>
    %cst_16 = arith.constant dense<0.000000e+00> : vector<16x128xf32>
    %23 = tpu.matmul %20, %22, %cst_16 {dimension_numbers = #tpu.dot_dimension_numbers<[1], [0], [0], [1], [0, 0, 1, 1], [], []>} : vector<16x128xbf16>, vector<128x128xbf16>, vector<16x128xf32> -> vector<16x128xf32>
    %24 = arith.addf %19, %23 : vector<16x128xf32>
    %c0_17 = arith.constant 0 : index
    %c0_18 = arith.constant 0 : index
    %25 = vector.load %arg6[%c0_17, %c0_18] : memref<16x128xf32, #tpu.memory_space<vmem>>, vector<16x128xf32>
    tpu.vector_store %arg6[%c0_17, %c0_18], %24 {strides = array<i32>} : memref<16x128xf32, #tpu.memory_space<vmem>>, vector<16x128xf32>,
    %c2_i32 = arith.constant 2 : i32
    %26 = arith.addi %3, %c2_i32 : i32
    %c0_19 = arith.constant 0 : index
    %27 = arith.index_cast %26 : i32 to index
    %c0_20 = arith.constant 0 : index
    %28 = vector.load %arg2[%c0_19, %27, %c0_20] : memref<1x144x128xf32, #tpu.memory_space<vmem>>, vector<1x16x128xf32>
    %29 = vector.shape_cast %28 : vector<1x16x128xf32> to vector<16x128xf32>
    %c0_21 = arith.constant 0 : index
    %c0_22 = arith.constant 0 : index
    %30 = vector.load %arg6[%c0_21, %c0_22] : memref<16x128xf32, #tpu.memory_space<vmem>>, vector<16x128xf32>
    %31 = arith.truncf %29 : vector<16x128xf32> to vector<16x128xbf16>
    %c2 = arith.constant 2 : index
    %c0_23 = arith.constant 0 : index
    %c0_24 = arith.constant 0 : index
    %32 = vector.load %arg3[%c2, %c0_23, %c0_24] : memref<8x128x128xbf16, #tpu.memory_space<vmem>>, vector<1x128x128xbf16>
    %33 = vector.shape_cast %32 : vector<1x128x128xbf16> to vector<128x128xbf16>
    %cst_25 = arith.constant dense<0.000000e+00> : vector<16x128xf32>
    %34 = tpu.matmul %31, %33, %cst_25 {dimension_numbers = #tpu.dot_dimension_numbers<[1], [0], [0], [1], [0, 0, 1, 1], [], []>} : vector<16x128xbf16>, vector<128x128xbf16>, vector<16x128xf32> -> vector<16x128xf32>
    %35 = arith.addf %30, %34 : vector<16x128xf32>
    %c0_26 = arith.constant 0 : index
    %c0_27 = arith.constant 0 : index
    %36 = vector.load %arg6[%c0_26, %c0_27] : memref<16x128xf32, #tpu.memory_space<vmem>>, vector<16x128xf32>
    tpu.vector_store %arg6[%c0_26, %c0_27], %35 {strides = array<i32>} : memref<16x128xf32, #tpu.memory_space<vmem>>, vector<16x128xf32>,
    %c3_i32 = arith.constant 3 : i32
    %37 = arith.addi %3, %c3_i32 : i32
    %c0_28 = arith.constant 0 : index
    %38 = arith.index_cast %37 : i32 to index
    %c0_29 = arith.constant 0 : index
    %39 = vector.load %arg2[%c0_28, %38, %c0_29] : memref<1x144x128xf32, #tpu.memory_space<vmem>>, vector<1x16x128xf32>
    %40 = vector.shape_cast %39 : vector<1x16x128xf32> to vector<16x128xf32>
    %c0_30 = arith.constant 0 : index
    %c0_31 = arith.constant 0 : index
    %41 = vector.load %arg6[%c0_30, %c0_31] : memref<16x128xf32, #tpu.memory_space<vmem>>, vector<16x128xf32>
    %42 = arith.truncf %40 : vector<16x128xf32> to vector<16x128xbf16>
    %c3 = arith.constant 3 : index
    %c0_32 = arith.constant 0 : index
    %c0_33 = arith.constant 0 : index
    %43 = vector.load %arg3[%c3, %c0_32, %c0_33] : memref<8x128x128xbf16, #tpu.memory_space<vmem>>, vector<1x128x128xbf16>
    %44 = vector.shape_cast %43 : vector<1x128x128xbf16> to vector<128x128xbf16>
    %cst_34 = arith.constant dense<0.000000e+00> : vector<16x128xf32>
    %45 = tpu.matmul %42, %44, %cst_34 {dimension_numbers = #tpu.dot_dimension_numbers<[1], [0], [0], [1], [0, 0, 1, 1], [], []>} : vector<16x128xbf16>, vector<128x128xbf16>, vector<16x128xf32> -> vector<16x128xf32>
    %46 = arith.addf %41, %45 : vector<16x128xf32>
    %c0_35 = arith.constant 0 : index
    %c0_36 = arith.constant 0 : index
    %47 = vector.load %arg6[%c0_35, %c0_36] : memref<16x128xf32, #tpu.memory_space<vmem>>, vector<16x128xf32>
    tpu.vector_store %arg6[%c0_35, %c0_36], %46 {strides = array<i32>} : memref<16x128xf32, #tpu.memory_space<vmem>>, vector<16x128xf32>,
    %c4_i32 = arith.constant 4 : i32
    %48 = arith.addi %3, %c4_i32 : i32
    %c0_37 = arith.constant 0 : index
    %49 = arith.index_cast %48 : i32 to index
    %c0_38 = arith.constant 0 : index
    %50 = vector.load %arg2[%c0_37, %49, %c0_38] : memref<1x144x128xf32, #tpu.memory_space<vmem>>, vector<1x16x128xf32>
    %51 = vector.shape_cast %50 : vector<1x16x128xf32> to vector<16x128xf32>
    %c0_39 = arith.constant 0 : index
    %c0_40 = arith.constant 0 : index
    %52 = vector.load %arg6[%c0_39, %c0_40] : memref<16x128xf32, #tpu.memory_space<vmem>>, vector<16x128xf32>
    %53 = arith.truncf %51 : vector<16x128xf32> to vector<16x128xbf16>
    %c4 = arith.constant 4 : index
    %c0_41 = arith.constant 0 : index
    %c0_42 = arith.constant 0 : index
    %54 = vector.load %arg3[%c4, %c0_41, %c0_42] : memref<8x128x128xbf16, #tpu.memory_space<vmem>>, vector<1x128x128xbf16>
    %55 = vector.shape_cast %54 : vector<1x128x128xbf16> to vector<128x128xbf16>
    %cst_43 = arith.constant dense<0.000000e+00> : vector<16x128xf32>
    %56 = tpu.matmul %53, %55, %cst_43 {dimension_numbers = #tpu.dot_dimension_numbers<[1], [0], [0], [1], [0, 0, 1, 1], [], []>} : vector<16x128xbf16>, vector<128x128xbf16>, vector<16x128xf32> -> vector<16x128xf32>
    %57 = arith.addf %52, %56 : vector<16x128xf32>
    %c0_44 = arith.constant 0 : index
    %c0_45 = arith.constant 0 : index
    %58 = vector.load %arg6[%c0_44, %c0_45] : memref<16x128xf32, #tpu.memory_space<vmem>>, vector<16x128xf32>
    tpu.vector_store %arg6[%c0_44, %c0_45], %57 {strides = array<i32>} : memref<16x128xf32, #tpu.memory_space<vmem>>, vector<16x128xf32>,
    %c5_i32 = arith.constant 5 : i32
    %59 = arith.addi %3, %c5_i32 : i32
    %c0_46 = arith.constant 0 : index
    %60 = arith.index_cast %59 : i32 to index
    %c0_47 = arith.constant 0 : index
    %61 = vector.load %arg2[%c0_46, %60, %c0_47] : memref<1x144x128xf32, #tpu.memory_space<vmem>>, vector<1x16x128xf32>
    %62 = vector.shape_cast %61 : vector<1x16x128xf32> to vector<16x128xf32>
    %c0_48 = arith.constant 0 : index
    %c0_49 = arith.constant 0 : index
    %63 = vector.load %arg6[%c0_48, %c0_49] : memref<16x128xf32, #tpu.memory_space<vmem>>, vector<16x128xf32>
    %64 = arith.truncf %62 : vector<16x128xf32> to vector<16x128xbf16>
    %c5 = arith.constant 5 : index
    %c0_50 = arith.constant 0 : index
    %c0_51 = arith.constant 0 : index
    %65 = vector.load %arg3[%c5, %c0_50, %c0_51] : memref<8x128x128xbf16, #tpu.memory_space<vmem>>, vector<1x128x128xbf16>
    %66 = vector.shape_cast %65 : vector<1x128x128xbf16> to vector<128x128xbf16>
    %cst_52 = arith.constant dense<0.000000e+00> : vector<16x128xf32>
    %67 = tpu.matmul %64, %66, %cst_52 {dimension_numbers = #tpu.dot_dimension_numbers<[1], [0], [0], [1], [0, 0, 1, 1], [], []>} : vector<16x128xbf16>, vector<128x128xbf16>, vector<16x128xf32> -> vector<16x128xf32>
    %68 = arith.addf %63, %67 : vector<16x128xf32>
    %c0_53 = arith.constant 0 : index
    %c0_54 = arith.constant 0 : index
    %69 = vector.load %arg6[%c0_53, %c0_54] : memref<16x128xf32, #tpu.memory_space<vmem>>, vector<16x128xf32>
    tpu.vector_store %arg6[%c0_53, %c0_54], %68 {strides = array<i32>} : memref<16x128xf32, #tpu.memory_space<vmem>>, vector<16x128xf32>,
    %c6_i32 = arith.constant 6 : i32
    %70 = arith.addi %3, %c6_i32 : i32
    %c0_55 = arith.constant 0 : index
    %71 = arith.index_cast %70 : i32 to index
    %c0_56 = arith.constant 0 : index
    %72 = vector.load %arg2[%c0_55, %71, %c0_56] : memref<1x144x128xf32, #tpu.memory_space<vmem>>, vector<1x16x128xf32>
    %73 = vector.shape_cast %72 : vector<1x16x128xf32> to vector<16x128xf32>
    %c0_57 = arith.constant 0 : index
    %c0_58 = arith.constant 0 : index
    %74 = vector.load %arg6[%c0_57, %c0_58] : memref<16x128xf32, #tpu.memory_space<vmem>>, vector<16x128xf32>
    %75 = arith.truncf %73 : vector<16x128xf32> to vector<16x128xbf16>
    %c6 = arith.constant 6 : index
    %c0_59 = arith.constant 0 : index
    %c0_60 = arith.constant 0 : index
    %76 = vector.load %arg3[%c6, %c0_59, %c0_60] : memref<8x128x128xbf16, #tpu.memory_space<vmem>>, vector<1x128x128xbf16>
    %77 = vector.shape_cast %76 : vector<1x128x128xbf16> to vector<128x128xbf16>
    %cst_61 = arith.constant dense<0.000000e+00> : vector<16x128xf32>
    %78 = tpu.matmul %75, %77, %cst_61 {dimension_numbers = #tpu.dot_dimension_numbers<[1], [0], [0], [1], [0, 0, 1, 1], [], []>} : vector<16x128xbf16>, vector<128x128xbf16>, vector<16x128xf32> -> vector<16x128xf32>
    %79 = arith.addf %74, %78 : vector<16x128xf32>
    %c0_62 = arith.constant 0 : index
    %c0_63 = arith.constant 0 : index
    %80 = vector.load %arg6[%c0_62, %c0_63] : memref<16x128xf32, #tpu.memory_space<vmem>>, vector<16x128xf32>
    tpu.vector_store %arg6[%c0_62, %c0_63], %79 {strides = array<i32>} : memref<16x128xf32, #tpu.memory_space<vmem>>, vector<16x128xf32>,
    %c7_i32 = arith.constant 7 : i32
    %81 = arith.addi %3, %c7_i32 : i32
    %c0_64 = arith.constant 0 : index
    %82 = arith.index_cast %81 : i32 to index
    %c0_65 = arith.constant 0 : index
    %83 = vector.load %arg2[%c0_64, %82, %c0_65] : memref<1x144x128xf32, #tpu.memory_space<vmem>>, vector<1x16x128xf32>
    %84 = vector.shape_cast %83 : vector<1x16x128xf32> to vector<16x128xf32>
    %c0_66 = arith.constant 0 : index
    %c0_67 = arith.constant 0 : index
    %85 = vector.load %arg6[%c0_66, %c0_67] : memref<16x128xf32, #tpu.memory_space<vmem>>, vector<16x128xf32>
    %86 = arith.truncf %84 : vector<16x128xf32> to vector<16x128xbf16>
    %c7 = arith.constant 7 : index
    %c0_68 = arith.constant 0 : index
    %c0_69 = arith.constant 0 : index
    %87 = vector.load %arg3[%c7, %c0_68, %c0_69] : memref<8x128x128xbf16, #tpu.memory_space<vmem>>, vector<1x128x128xbf16>
    %88 = vector.shape_cast %87 : vector<1x128x128xbf16> to vector<128x128xbf16>
    %cst_70 = arith.constant dense<0.000000e+00> : vector<16x128xf32>
    %89 = tpu.matmul %86, %88, %cst_70 {dimension_numbers = #tpu.dot_dimension_numbers<[1], [0], [0], [1], [0, 0, 1, 1], [], []>} : vector<16x128xbf16>, vector<128x128xbf16>, vector<16x128xf32> -> vector<16x128xf32>
    %90 = arith.addf %85, %89 : vector<16x128xf32>
    %c0_71 = arith.constant 0 : index
    %c0_72 = arith.constant 0 : index
    %91 = vector.load %arg6[%c0_71, %c0_72] : memref<16x128xf32, #tpu.memory_space<vmem>>, vector<16x128xf32>
    tpu.vector_store %arg6[%c0_71, %c0_72], %90 {strides = array<i32>} : memref<16x128xf32, #tpu.memory_space<vmem>>, vector<16x128xf32>,
    %c15_i32 = arith.constant 15 : i32
    %92 = arith.cmpi eq, %arg1, %c15_i32 : i32
    %93 = arith.extui %92 : i1 to i32
    %c0_i32_73 = arith.constant 0 : i32
    %94 = arith.cmpi ne, %93, %c0_i32_73 : i32
    scf.if %94 {
      %c0_74 = arith.constant 0 : index
      %c0_75 = arith.constant 0 : index
      %95 = vector.load %arg6[%c0_74, %c0_75] : memref<16x128xf32, #tpu.memory_space<vmem>>, vector<16x128xf32>
      %c0_76 = arith.constant 0 : index
      %c0_77 = arith.constant 0 : index
      %96 = vector.load %arg4[%c0_76, %c0_77] : memref<1x128xf32, #tpu.memory_space<vmem>>, vector<1x128xf32>
      %97 = vector.broadcast %96 : vector<1x128xf32> to vector<16x128xf32>
      %98 = arith.addf %95, %97 : vector<16x128xf32>
      %c0_78 = arith.constant 0 : index
      %c0_79 = arith.constant 0 : index
      %c0_80 = arith.constant 0 : index
      %99 = vector.load %arg5[%c0_78, %c0_79, %c0_80] : memref<1x16x128xf32, #tpu.memory_space<vmem>>, vector<1x16x128xf32>
      %100 = vector.shape_cast %99 : vector<1x16x128xf32> to vector<16x128xf32>
      %101 = vector.shape_cast %98 : vector<16x128xf32> to vector<1x16x128xf32>
      tpu.vector_store %arg5[%c0_78, %c0_79, %c0_80], %101 {strides = array<i32>} : memref<1x16x128xf32, #tpu.memory_space<vmem>>, vector<1x16x128xf32>,
    } else {
    }
    return
  }
  func.func @transform_0(%arg0: i32, %arg1: i32) -> (i32, i32, i32) {
    %c0_i32 = arith.constant 0 : i32
    %c0_i32_0 = arith.constant 0 : i32
    %c0_i32_1 = arith.constant 0 : i32
    return %arg0, %c0_i32, %c0_i32_0 : i32, i32, i32
  }
  func.func @transform_1(%arg0: i32, %arg1: i32) -> (i32, i32, i32) {
    %c0_i32 = arith.constant 0 : i32
    %c0_i32_0 = arith.constant 0 : i32
    %c0_i32_1 = arith.constant 0 : i32
    return %arg1, %c0_i32, %c0_i32_0 : i32, i32, i32
  }
  func.func @transform_2(%arg0: i32, %arg1: i32) -> (i32, i32) {
    %c0_i32 = arith.constant 0 : i32
    %c0_i32_0 = arith.constant 0 : i32
    %c0_i32_1 = arith.constant 0 : i32
    return %c0_i32, %c0_i32_0 : i32, i32
  }
  func.func @transform_3(%arg0: i32, %arg1: i32) -> (i32, i32, i32) {
    %c0_i32 = arith.constant 0 : i32
    %c0_i32_0 = arith.constant 0 : i32
    %c0_i32_1 = arith.constant 0 : i32
    return %arg0, %c0_i32, %c0_i32_0 : i32, i32, i32
  }
}

module attributes {stable_mosaic.version = 11 : i64} {
  func.func @_mm_kernel(%arg0: i32, %arg1: i32, %arg2: i32, %arg3: memref<8x128xbf16, #tpu.memory_space<vmem>>, %arg4: memref<128x128xbf16, #tpu.memory_space<vmem>>, %arg5: memref<1x128xf32, #tpu.memory_space<vmem>>, %arg6: memref<8x128xf32, #tpu.memory_space<vmem>>, %arg7: memref<8x128xf32, #tpu.memory_space<vmem>>) attributes {dimension_semantics = [#tpu.dimension_semantics<parallel>, #tpu.dimension_semantics<parallel>, #tpu.dimension_semantics<arbitrary>], iteration_bounds = array<i64: 1, 1, 1>, scalar_prefetch = 0 : i64, scratch_operands = 1 : i64, tpu.core_type = #tpu.core_type<tc>, window_params = [{transform_indices = @transform_0, window_bounds = array<i64: 8, 128>}, {transform_indices = @transform_1, window_bounds = array<i64: 128, 128>}, {transform_indices = @transform_2, window_bounds = array<i64: 1, 128>}, {transform_indices = @transform_3, window_bounds = array<i64: 8, 128>}]} {
    %c0_i32 = arith.constant 0 : i32
    %0 = arith.cmpi eq, %arg2, %c0_i32 : i32
    %1 = arith.extui %0 : i1 to i32
    %c0_i32_0 = arith.constant 0 : i32
    %2 = arith.cmpi ne, %1, %c0_i32_0 : i32
    scf.if %2 {
      %cst_10 = arith.constant 0.000000e+00 : f32
      %12 = vector.broadcast %cst_10 : f32 to vector<8x128xf32>
      %c0_11 = arith.constant 0 : index
      %c0_12 = arith.constant 0 : index
      %13 = vector.load %arg7[%c0_11, %c0_12] : memref<8x128xf32, #tpu.memory_space<vmem>>, vector<8x128xf32>
      tpu.vector_store %arg7[%c0_11, %c0_12], %12 {strides = array<i32>} : memref<8x128xf32, #tpu.memory_space<vmem>>, vector<8x128xf32>,
    } else {
    }
    %c0 = arith.constant 0 : index
    %c0_1 = arith.constant 0 : index
    %3 = vector.load %arg7[%c0, %c0_1] : memref<8x128xf32, #tpu.memory_space<vmem>>, vector<8x128xf32>
    %c0_2 = arith.constant 0 : index
    %c0_3 = arith.constant 0 : index
    %4 = vector.load %arg3[%c0_2, %c0_3] : memref<8x128xbf16, #tpu.memory_space<vmem>>, vector<8x128xbf16>
    %c0_4 = arith.constant 0 : index
    %c0_5 = arith.constant 0 : index
    %5 = vector.load %arg4[%c0_4, %c0_5] : memref<128x128xbf16, #tpu.memory_space<vmem>>, vector<128x128xbf16>
    %cst = arith.constant dense<0.000000e+00> : vector<8x128xf32>
    %6 = tpu.matmul %4, %5, %cst {dimension_numbers = #tpu.dot_dimension_numbers<[1], [0], [0], [1], [0, 0, 1, 1], [], []>} : vector<8x128xbf16>, vector<128x128xbf16>, vector<8x128xf32> -> vector<8x128xf32>
    %7 = arith.addf %3, %6 : vector<8x128xf32>
    %c0_6 = arith.constant 0 : index
    %c0_7 = arith.constant 0 : index
    %8 = vector.load %arg7[%c0_6, %c0_7] : memref<8x128xf32, #tpu.memory_space<vmem>>, vector<8x128xf32>
    tpu.vector_store %arg7[%c0_6, %c0_7], %7 {strides = array<i32>} : memref<8x128xf32, #tpu.memory_space<vmem>>, vector<8x128xf32>,
    %c0_i32_8 = arith.constant 0 : i32
    %9 = arith.cmpi eq, %arg2, %c0_i32_8 : i32
    %10 = arith.extui %9 : i1 to i32
    %c0_i32_9 = arith.constant 0 : i32
    %11 = arith.cmpi ne, %10, %c0_i32_9 : i32
    scf.if %11 {
      %c0_10 = arith.constant 0 : index
      %c0_11 = arith.constant 0 : index
      %12 = vector.load %arg7[%c0_10, %c0_11] : memref<8x128xf32, #tpu.memory_space<vmem>>, vector<8x128xf32>
      %c0_12 = arith.constant 0 : index
      %c0_13 = arith.constant 0 : index
      %13 = vector.load %arg5[%c0_12, %c0_13] : memref<1x128xf32, #tpu.memory_space<vmem>>, vector<1x128xf32>
      %14 = vector.broadcast %13 : vector<1x128xf32> to vector<8x128xf32>
      %15 = arith.addf %12, %14 : vector<8x128xf32>
      %cst_14 = arith.constant 0.000000e+00 : f32
      %16 = vector.broadcast %cst_14 : f32 to vector<8x128xf32>
      %17 = arith.maximumf %15, %16 : vector<8x128xf32>
      %c0_15 = arith.constant 0 : index
      %c0_16 = arith.constant 0 : index
      %18 = vector.load %arg6[%c0_15, %c0_16] : memref<8x128xf32, #tpu.memory_space<vmem>>, vector<8x128xf32>
      tpu.vector_store %arg6[%c0_15, %c0_16], %17 {strides = array<i32>} : memref<8x128xf32, #tpu.memory_space<vmem>>, vector<8x128xf32>,
    } else {
    }
    return
  }
  func.func @transform_0(%arg0: i32, %arg1: i32, %arg2: i32) -> (i32, i32) {
    %c0_i32 = arith.constant 0 : i32
    return %arg0, %arg2 : i32, i32
  }
  func.func @transform_1(%arg0: i32, %arg1: i32, %arg2: i32) -> (i32, i32) {
    %c0_i32 = arith.constant 0 : i32
    return %arg2, %arg1 : i32, i32
  }
  func.func @transform_2(%arg0: i32, %arg1: i32, %arg2: i32) -> (i32, i32) {
    %c0_i32 = arith.constant 0 : i32
    %c0_i32_0 = arith.constant 0 : i32
    return %c0_i32, %arg1 : i32, i32
  }
  func.func @transform_3(%arg0: i32, %arg1: i32, %arg2: i32) -> (i32, i32) {
    %c0_i32 = arith.constant 0 : i32
    return %arg0, %arg1 : i32, i32
  }
}

module attributes {stable_mosaic.version = 11 : i64} {
  func.func @_mm_kernel(%arg0: i32, %arg1: i32, %arg2: i32, %arg3: memref<8x128xbf16, #tpu.memory_space<vmem>>, %arg4: memref<128x128xbf16, #tpu.memory_space<vmem>>, %arg5: memref<1x128xf32, #tpu.memory_space<vmem>>, %arg6: memref<8x128xf32, #tpu.memory_space<vmem>>, %arg7: memref<8x128xf32, #tpu.memory_space<vmem>>) attributes {dimension_semantics = [#tpu.dimension_semantics<parallel>, #tpu.dimension_semantics<parallel>, #tpu.dimension_semantics<arbitrary>], iteration_bounds = array<i64: 1, 1, 1>, scalar_prefetch = 0 : i64, scratch_operands = 1 : i64, tpu.core_type = #tpu.core_type<tc>, window_params = [{transform_indices = @transform_0, window_bounds = array<i64: 8, 128>}, {transform_indices = @transform_1, window_bounds = array<i64: 128, 128>}, {transform_indices = @transform_2, window_bounds = array<i64: 1, 128>}, {transform_indices = @transform_3, window_bounds = array<i64: 8, 128>}]} {
    %c0_i32 = arith.constant 0 : i32
    %0 = arith.cmpi eq, %arg2, %c0_i32 : i32
    %1 = arith.extui %0 : i1 to i32
    %c0_i32_0 = arith.constant 0 : i32
    %2 = arith.cmpi ne, %1, %c0_i32_0 : i32
    scf.if %2 {
      %cst_10 = arith.constant 0.000000e+00 : f32
      %12 = vector.broadcast %cst_10 : f32 to vector<8x128xf32>
      %c0_11 = arith.constant 0 : index
      %c0_12 = arith.constant 0 : index
      %13 = vector.load %arg7[%c0_11, %c0_12] : memref<8x128xf32, #tpu.memory_space<vmem>>, vector<8x128xf32>
      tpu.vector_store %arg7[%c0_11, %c0_12], %12 {strides = array<i32>} : memref<8x128xf32, #tpu.memory_space<vmem>>, vector<8x128xf32>,
    } else {
    }
    %c0 = arith.constant 0 : index
    %c0_1 = arith.constant 0 : index
    %3 = vector.load %arg7[%c0, %c0_1] : memref<8x128xf32, #tpu.memory_space<vmem>>, vector<8x128xf32>
    %c0_2 = arith.constant 0 : index
    %c0_3 = arith.constant 0 : index
    %4 = vector.load %arg3[%c0_2, %c0_3] : memref<8x128xbf16, #tpu.memory_space<vmem>>, vector<8x128xbf16>
    %c0_4 = arith.constant 0 : index
    %c0_5 = arith.constant 0 : index
    %5 = vector.load %arg4[%c0_4, %c0_5] : memref<128x128xbf16, #tpu.memory_space<vmem>>, vector<128x128xbf16>
    %cst = arith.constant dense<0.000000e+00> : vector<8x128xf32>
    %6 = tpu.matmul %4, %5, %cst {dimension_numbers = #tpu.dot_dimension_numbers<[1], [0], [0], [1], [0, 0, 1, 1], [], []>} : vector<8x128xbf16>, vector<128x128xbf16>, vector<8x128xf32> -> vector<8x128xf32>
    %7 = arith.addf %3, %6 : vector<8x128xf32>
    %c0_6 = arith.constant 0 : index
    %c0_7 = arith.constant 0 : index
    %8 = vector.load %arg7[%c0_6, %c0_7] : memref<8x128xf32, #tpu.memory_space<vmem>>, vector<8x128xf32>
    tpu.vector_store %arg7[%c0_6, %c0_7], %7 {strides = array<i32>} : memref<8x128xf32, #tpu.memory_space<vmem>>, vector<8x128xf32>,
    %c0_i32_8 = arith.constant 0 : i32
    %9 = arith.cmpi eq, %arg2, %c0_i32_8 : i32
    %10 = arith.extui %9 : i1 to i32
    %c0_i32_9 = arith.constant 0 : i32
    %11 = arith.cmpi ne, %10, %c0_i32_9 : i32
    scf.if %11 {
      %c0_10 = arith.constant 0 : index
      %c0_11 = arith.constant 0 : index
      %12 = vector.load %arg7[%c0_10, %c0_11] : memref<8x128xf32, #tpu.memory_space<vmem>>, vector<8x128xf32>
      %c0_12 = arith.constant 0 : index
      %c0_13 = arith.constant 0 : index
      %13 = vector.load %arg5[%c0_12, %c0_13] : memref<1x128xf32, #tpu.memory_space<vmem>>, vector<1x128xf32>
      %14 = vector.broadcast %13 : vector<1x128xf32> to vector<8x128xf32>
      %15 = arith.addf %12, %14 : vector<8x128xf32>
      %c0_14 = arith.constant 0 : index
      %c0_15 = arith.constant 0 : index
      %16 = vector.load %arg6[%c0_14, %c0_15] : memref<8x128xf32, #tpu.memory_space<vmem>>, vector<8x128xf32>
      tpu.vector_store %arg6[%c0_14, %c0_15], %15 {strides = array<i32>} : memref<8x128xf32, #tpu.memory_space<vmem>>, vector<8x128xf32>,
    } else {
    }
    return
  }
  func.func @transform_0(%arg0: i32, %arg1: i32, %arg2: i32) -> (i32, i32) {
    %c0_i32 = arith.constant 0 : i32
    return %arg0, %arg2 : i32, i32
  }
  func.func @transform_1(%arg0: i32, %arg1: i32, %arg2: i32) -> (i32, i32) {
    %c0_i32 = arith.constant 0 : i32
    return %arg2, %arg1 : i32, i32
  }
  func.func @transform_2(%arg0: i32, %arg1: i32, %arg2: i32) -> (i32, i32) {
    %c0_i32 = arith.constant 0 : i32
    %c0_i32_0 = arith.constant 0 : i32
    return %c0_i32, %arg1 : i32, i32
  }
  func.func @transform_3(%arg0: i32, %arg1: i32, %arg2: i32) -> (i32, i32) {
    %c0_i32 = arith.constant 0 : i32
    return %arg0, %arg1 : i32, i32
  }
}

module attributes {stable_mosaic.version = 11 : i64} {
  func.func @_mm_kernel(%arg0: i32, %arg1: i32, %arg2: i32, %arg3: memref<32x128xbf16, #tpu.memory_space<vmem>>, %arg4: memref<128x128xbf16, #tpu.memory_space<vmem>>, %arg5: memref<1x128xf32, #tpu.memory_space<vmem>>, %arg6: memref<32x128xf32, #tpu.memory_space<vmem>>, %arg7: memref<32x128xf32, #tpu.memory_space<vmem>>) attributes {dimension_semantics = [#tpu.dimension_semantics<parallel>, #tpu.dimension_semantics<parallel>, #tpu.dimension_semantics<arbitrary>], iteration_bounds = array<i64: 1, 1, 1>, scalar_prefetch = 0 : i64, scratch_operands = 1 : i64, tpu.core_type = #tpu.core_type<tc>, window_params = [{transform_indices = @transform_0, window_bounds = array<i64: 32, 128>}, {transform_indices = @transform_1, window_bounds = array<i64: 128, 128>}, {transform_indices = @transform_2, window_bounds = array<i64: 1, 128>}, {transform_indices = @transform_3, window_bounds = array<i64: 32, 128>}]} {
    %c0_i32 = arith.constant 0 : i32
    %0 = arith.cmpi eq, %arg2, %c0_i32 : i32
    %1 = arith.extui %0 : i1 to i32
    %c0_i32_0 = arith.constant 0 : i32
    %2 = arith.cmpi ne, %1, %c0_i32_0 : i32
    scf.if %2 {
      %cst_10 = arith.constant 0.000000e+00 : f32
      %12 = vector.broadcast %cst_10 : f32 to vector<32x128xf32>
      %c0_11 = arith.constant 0 : index
      %c0_12 = arith.constant 0 : index
      %13 = vector.load %arg7[%c0_11, %c0_12] : memref<32x128xf32, #tpu.memory_space<vmem>>, vector<32x128xf32>
      tpu.vector_store %arg7[%c0_11, %c0_12], %12 {strides = array<i32>} : memref<32x128xf32, #tpu.memory_space<vmem>>, vector<32x128xf32>,
    } else {
    }
    %c0 = arith.constant 0 : index
    %c0_1 = arith.constant 0 : index
    %3 = vector.load %arg7[%c0, %c0_1] : memref<32x128xf32, #tpu.memory_space<vmem>>, vector<32x128xf32>
    %c0_2 = arith.constant 0 : index
    %c0_3 = arith.constant 0 : index
    %4 = vector.load %arg3[%c0_2, %c0_3] : memref<32x128xbf16, #tpu.memory_space<vmem>>, vector<32x128xbf16>
    %c0_4 = arith.constant 0 : index
    %c0_5 = arith.constant 0 : index
    %5 = vector.load %arg4[%c0_4, %c0_5] : memref<128x128xbf16, #tpu.memory_space<vmem>>, vector<128x128xbf16>
    %cst = arith.constant dense<0.000000e+00> : vector<32x128xf32>
    %6 = tpu.matmul %4, %5, %cst {dimension_numbers = #tpu.dot_dimension_numbers<[1], [0], [0], [1], [0, 0, 1, 1], [], []>} : vector<32x128xbf16>, vector<128x128xbf16>, vector<32x128xf32> -> vector<32x128xf32>
    %7 = arith.addf %3, %6 : vector<32x128xf32>
    %c0_6 = arith.constant 0 : index
    %c0_7 = arith.constant 0 : index
    %8 = vector.load %arg7[%c0_6, %c0_7] : memref<32x128xf32, #tpu.memory_space<vmem>>, vector<32x128xf32>
    tpu.vector_store %arg7[%c0_6, %c0_7], %7 {strides = array<i32>} : memref<32x128xf32, #tpu.memory_space<vmem>>, vector<32x128xf32>,
    %c0_i32_8 = arith.constant 0 : i32
    %9 = arith.cmpi eq, %arg2, %c0_i32_8 : i32
    %10 = arith.extui %9 : i1 to i32
    %c0_i32_9 = arith.constant 0 : i32
    %11 = arith.cmpi ne, %10, %c0_i32_9 : i32
    scf.if %11 {
      %c0_10 = arith.constant 0 : index
      %c0_11 = arith.constant 0 : index
      %12 = vector.load %arg7[%c0_10, %c0_11] : memref<32x128xf32, #tpu.memory_space<vmem>>, vector<32x128xf32>
      %c0_12 = arith.constant 0 : index
      %c0_13 = arith.constant 0 : index
      %13 = vector.load %arg5[%c0_12, %c0_13] : memref<1x128xf32, #tpu.memory_space<vmem>>, vector<1x128xf32>
      %14 = vector.broadcast %13 : vector<1x128xf32> to vector<32x128xf32>
      %15 = arith.addf %12, %14 : vector<32x128xf32>
      %cst_14 = arith.constant 0.000000e+00 : f32
      %16 = vector.broadcast %cst_14 : f32 to vector<32x128xf32>
      %17 = arith.maximumf %15, %16 : vector<32x128xf32>
      %c0_15 = arith.constant 0 : index
      %c0_16 = arith.constant 0 : index
      %18 = vector.load %arg6[%c0_15, %c0_16] : memref<32x128xf32, #tpu.memory_space<vmem>>, vector<32x128xf32>
      tpu.vector_store %arg6[%c0_15, %c0_16], %17 {strides = array<i32>} : memref<32x128xf32, #tpu.memory_space<vmem>>, vector<32x128xf32>,
    } else {
    }
    return
  }
  func.func @transform_0(%arg0: i32, %arg1: i32, %arg2: i32) -> (i32, i32) {
    %c0_i32 = arith.constant 0 : i32
    return %arg0, %arg2 : i32, i32
  }
  func.func @transform_1(%arg0: i32, %arg1: i32, %arg2: i32) -> (i32, i32) {
    %c0_i32 = arith.constant 0 : i32
    return %arg2, %arg1 : i32, i32
  }
  func.func @transform_2(%arg0: i32, %arg1: i32, %arg2: i32) -> (i32, i32) {
    %c0_i32 = arith.constant 0 : i32
    %c0_i32_0 = arith.constant 0 : i32
    return %c0_i32, %arg1 : i32, i32
  }
  func.func @transform_3(%arg0: i32, %arg1: i32, %arg2: i32) -> (i32, i32) {
    %c0_i32 = arith.constant 0 : i32
    return %arg0, %arg1 : i32, i32
  }
}

</mosaic_0001>

<bundles_post_ra>
// kernel: cost_e2e_forward.29
= control target key start
LH: loop header
LB: loop body
LE: loop exit
PB: predicated region body
PF: predicated region fallthrough
CT: control target
= control target key end

     0   :  { %s280_s1 = inlined_call_operand.vmem [shape: bf16[128,128], index: 1, kind: input, shape index: {}]   ;;  %s281_s2 = inlined_call_operand.vmem [shape: f32[1,128], index: 2, kind: input, shape index: {}]   ;;  %s282_s0 = inlined_call_operand.vmem [shape: bf16[32,128], index: 0, kind: input, shape index: {}]   ;;  %s283_s3 = inlined_call_operand.vmem [shape: f32[32,128], index: 3, kind: output, shape index: {}]  }
   0x1   :  { %v205_v0 = vld [vmem:[%s280_s1 + $0x38] sm:$0xff]  ;;  %v204_v1 = vld [vmem:[%s280_s1 + $0x30] sm:$0xff]  ;;  %v203_v2 = vld [vmem:[%s280_s1 + $0x28] sm:$0xff] }
   0x2   :  { %106 = vmatpush.bf16.msra.mxu0 %v205_v0  ;;  %206 = vmatpush.bf16.msra.mxu1 %v205_v0  ;;  %v202_v3 = vld [vmem:[%s280_s1 + $0x20] sm:$0xff]  ;;  %v201_v4 = vld [vmem:[%s280_s1 + $0x18] sm:$0xff]  ;;  %v200_v5 = vld [vmem:[%s280_s1 + $0x10] sm:$0xff] }
   0x3   :  { %v199_v6 = vld [vmem:[%s280_s1 + $0x8] sm:$0xff]  ;;  %v198_v7 = vld [vmem:[%s280_s1] sm:$0xff] }
   0x4   :  { %v196_v8 = vld [vmem:[%s282_s0] sm:$0xff]  ;;  %v197_v9 = vld [vmem:[%s282_s0 + $0x8] sm:$0xff] }
   0x5   :  { %v214_v10 = vld [vmem:[%s281_s2] ss:$0 sm:$0xff] }
   0x6   :  { %107 = vmatpush.bf16.msra.mxu0 %v204_v1  ;;  %207 = vmatpush.bf16.msra.mxu1 %v204_v1 }
   0xa   :  { %108 = vmatpush.bf16.msra.mxu0 %v203_v2  ;;  %208 = vmatpush.bf16.msra.mxu1 %v203_v2 }
   0xe   :  { %109 = vmatpush.bf16.msra.mxu0 %v202_v3  ;;  %209 = vmatpush.bf16.msra.mxu1 %v202_v3 }
  0x12   :  { %110 = vmatpush.bf16.msra.mxu0 %v201_v4  ;;  %210 = vmatpush.bf16.msra.mxu1 %v201_v4 }
  0x16   :  { %111 = vmatpush.bf16.msra.mxu0 %v200_v5  ;;  %211 = vmatpush.bf16.msra.mxu1 %v200_v5 }
  0x1a   :  { %112 = vmatpush.bf16.msra.mxu0 %v199_v6  ;;  %212 = vmatpush.bf16.msra.mxu1 %v199_v6 }
  0x1e   :  { %113 = vmatpush.bf16.msra.mxu0 %v198_v7  ;;  %213 = vmatpush.bf16.msra.mxu1 %v198_v7 }
  0x21   :  { %114 = vmatmul.bf16.vlgmr.msra.gmra.mxu0 %v196_v8  ;;  %119 = vmatmul.bf16.vlgmr.msra.gmra.mxu1 %v197_v9 }
  0x9e   :  { %v115_v11 = vpop.f32.mrf.mxu0  ;;  %v120_v12 = vpop.f32.mrf.mxu1 }
  0x9f   :  { %v144_v13 = vadd.f32 %v214_v10, %v115_v11  ;;  %v146_v14 = vadd.f32 %v214_v10, %v120_v12 }
  0xa1   :  { %148 = vst [vmem:[%s283_s3] sm:$0xff] %v144_v13 }
  0xa2   :  { %150 = vst [vmem:[%s283_s3 + $0x10] sm:$0xff] %v146_v14 }
  0xa6   :  { %v117_v15 = vpop.f32.mrf.mxu0  ;;  %v122_v16 = vpop.f32.mrf.mxu1 }
  0xa7   :  { %v145_v17 = vadd.f32 %v214_v10, %v117_v15  ;;  %v147_v18 = vadd.f32 %v214_v10, %v122_v16 }
  0xa9   :  { %149 = vst [vmem:[%s283_s3 + $0x8] sm:$0xff] %v145_v17 }
  0xaa   :  { %151 = vst [vmem:[%s283_s3 + $0x18] sm:$0xff] %v147_v18 }

// kernel: cost_e2e_forward.30
= control target key start
LH: loop header
LB: loop body
LE: loop exit
PB: predicated region body
PF: predicated region fallthrough
CT: control target
= control target key end

     0   :  { %s821_s12 = smov 0   ;;  %s823_s13 = smov 0   ;;  %s937_s0 = inlined_call_operand.vmem [shape: f32[2,24,128], index: 0, kind: input, shape index: {}]   ;;  %s938_s1 = inlined_call_operand.vmem [shape: bf16[3,128,128], index: 1, kind: input, shape index: {}]   ;;  %s939_s2 = inlined_call_operand.vmem [shape: f32[1,128], index: 2, kind: input, shape index: {}]   ;;  %s940_s3 = inlined_call_operand.vmem [shape: f32[2,16,128], index: 3, kind: output, shape index: {}]  }
   0x1   :  { %s825_s14 = smov 0  }
   0x2 LB: > { %s25_s15 = sadd.s32 1, %s795_s13  ;;  %p588_p0 = scmp.ge.s32.totalorder %s799_s14, 1  ;;  %s799_s14 = sphi %s825_s14, %s13_s14   ;;  %s795_s13 = sphi %s823_s13, %s942_s13   ;;  %s791_s12 = sphi %s821_s12, %s941_s12  }
   0x3   : > { %p27_p1 = scmp.ge.s32.totalorder %s25_s15, 2  ;;  %p161_p2 = scmp.lt.s32.totalorder %s799_s14, 3 }
   0x5   : > { %s944_s15 = smov (%p27_p1, %s25_s15), 0  ;;  %p162_p3 = pnand %p588_p0, %p161_p2 }
   0x6   : > { %p191_p4 = scmp.lt.s32.totalorder (!%p162_p3), %s791_s12, 1 }
   0x7   : > { %165 = sbr.rel (%p162_p3) target bundleno = 191 (0xbf), region = 32 }
   0xc   : > { %v734_v0 = vld [vmem:[%s938_s1 + $0x38] sm:$0xff]  ;;  %v733_v3 = vld [vmem:[%s938_s1 + $0x30] sm:$0xff]  ;;  %v732_v6 = vld [vmem:[%s938_s1 + $0x28] sm:$0xff]  ;;  %s946_s12 = smov (!%p191_p4, %s791_s12), 1 }
   0xd   : > { %v742_v1 = vld [vmem:[%s938_s1 + $0x78] sm:$0xff]  ;;  %285 = vmatpush.bf16.msra.mxu0 %v734_v0  ;;  %v741_v4 = vld [vmem:[%s938_s1 + $0x70] sm:$0xff]  ;;  %v740_v7 = vld [vmem:[%s938_s1 + $0x68] sm:$0xff]  ;;  %s751_s27 = smul.u32 24, %s946_s12  ;;  %s726_s22 = sshll.u32 %s946_s12, 4 }
   0xe   : > { %v750_v2 = vld [vmem:[%s938_s1 + $0xb8] sm:$0xff]  ;;  %375 = vmatpush.bf16.msra.mxu1 %v742_v1  ;;  %v749_v5 = vld [vmem:[%s938_s1 + $0xb0] sm:$0xff]  ;;  %v748_v8 = vld [vmem:[%s938_s1 + $0xa8] sm:$0xff] }
   0xf   : > { %465 = vmatpush.bf16.msra.mxu2 %v750_v2  ;;  %v731_v9 = vld [vmem:[%s938_s1 + $0x20] sm:$0xff]  ;;  %v730_v12 = vld [vmem:[%s938_s1 + $0x18] sm:$0xff]  ;;  %v729_v15 = vld [vmem:[%s938_s1 + $0x10] sm:$0xff]  ;;  %s195_s9 = scalar_lea.vmem %s937_s0, %s751_s27  ;;  %s207_s27 = scalar_lea.vmem %s940_s3, %s726_s22 }
  0x10   : > { %v739_v10 = vld [vmem:[%s938_s1 + $0x60] sm:$0xff]  ;;  %v738_v13 = vld [vmem:[%s938_s1 + $0x58] sm:$0xff]  ;;  %v737_v16 = vld [vmem:[%s938_s1 + $0x50] sm:$0xff] }
  0x11   : > { %286 = vmatpush.bf16.msra.mxu0 %v733_v3  ;;  %v747_v11 = vld [vmem:[%s938_s1 + $0xa0] sm:$0xff]  ;;  %v746_v14 = vld [vmem:[%s938_s1 + $0x98] sm:$0xff]  ;;  %v745_v17 = vld [vmem:[%s938_s1 + $0x90] sm:$0xff] }
  0x12   : > { %376 = vmatpush.bf16.msra.mxu1 %v741_v4  ;;  %v728_v18 = vld [vmem:[%s938_s1 + $0x8] sm:$0xff]  ;;  %v727_v21 = vld [vmem:[%s938_s1] sm:$0xff] }
  0x13   : > { %466 = vmatpush.bf16.msra.mxu2 %v749_v5  ;;  %v736_v19 = vld [vmem:[%s938_s1 + $0x48] sm:$0xff]  ;;  %v735_v22 = vld [vmem:[%s938_s1 + $0x40] sm:$0xff] }
  0x14   : > { %v744_v20 = vld [vmem:[%s938_s1 + $0x88] sm:$0xff]  ;;  %v216_v23 = vld [vmem:[%s195_s9] sm:$0xff] }
  0x15   : > { %287 = vmatpush.bf16.msra.mxu0 %v732_v6  ;;  %v217_v24 = vld [vmem:[%s195_s9 + $0x8] sm:$0xff]  ;;  %v743_v27 = vld [vmem:[%s938_s1 + $0x80] sm:$0xff] }
  0x16   : > { %377 = vmatpush.bf16.msra.mxu1 %v740_v7  ;;  %v624_v25 = vld [vmem:[%s195_s9 + $0x1] sm:$0xff]  ;;  %v625_v26 = vld [vmem:[%s195_s9 + $0x9] sm:$0xff]  ;;  %v220_v30 = vpack.c.bf16 %v217_v24, %v216_v23  ;;  %v776_v36 = vld [vmem:[%s939_s2] ss:$0 sm:$0xff] }
  0x17   : > { %467 = vmatpush.bf16.msra.mxu2 %v748_v8  ;;  %v674_v28 = vld [vmem:[%s195_s9 + $0x2] sm:$0xff]  ;;  %v675_v29 = vld [vmem:[%s195_s9 + $0xa] sm:$0xff]  ;;  %v309_v31 = vpack.c.bf16 %v625_v26, %v624_v25 }
  0x18   : > { %v399_v32 = vpack.c.bf16 %v675_v29, %v674_v28 }
  0x19   : > { %288 = vmatpush.bf16.msra.mxu0 %v731_v9 }
  0x1a   : > { %378 = vmatpush.bf16.msra.mxu1 %v739_v10 }
  0x1b   : > { %468 = vmatpush.bf16.msra.mxu2 %v747_v11 }
  0x1d   : > { %289 = vmatpush.bf16.msra.mxu0 %v730_v12 }
  0x1e   : > { %379 = vmatpush.bf16.msra.mxu1 %v738_v13 }
  0x1f   : > { %469 = vmatpush.bf16.msra.mxu2 %v746_v14 }
  0x21   : > { %290 = vmatpush.bf16.msra.mxu0 %v729_v15 }
  0x22   : > { %380 = vmatpush.bf16.msra.mxu1 %v737_v16 }
  0x23   : > { %470 = vmatpush.bf16.msra.mxu2 %v745_v17 }
  0x25   : > { %291 = vmatpush.bf16.msra.mxu0 %v728_v18 }
  0x26   : > { %381 = vmatpush.bf16.msra.mxu1 %v736_v19 }
  0x27   : > { %471 = vmatpush.bf16.msra.mxu2 %v744_v20 }
  0x29   : > { %292 = vmatpush.bf16.msra.mxu0 %v727_v21 }
  0x2a   : > { %382 = vmatpush.bf16.msra.mxu1 %v735_v22 }
  0x2b   : > { %472 = vmatpush.bf16.msra.mxu2 %v743_v27 }
  0x2c   : > { %293 = vmatmul.bf16.vlgmr.msra.gmra.mxu0 %v220_v30 }
  0x2d   : > { %383 = vmatmul.bf16.vlgmr.msra.gmra.mxu1 %v309_v31 }
  0x2e   : > { %473 = vmatmul.bf16.vlgmr.msra.gmra.mxu2 %v399_v32 }
  0xa9   : > { %v294_v33 = vpop.f32.mrf.mxu0 }
  0xaa   : > { %v384_v34 = vpop.f32.mrf.mxu1 }
  0xab   : > { %v389_v35 = vadd.f32 %v384_v34, %v294_v33 }
  0xb1   : > { %v474_v37 = vpop.f32.mrf.mxu2  ;;  %v296_v40 = vpop.f32.mrf.mxu0 }
  0xb2   : > { %v479_v38 = vadd.f32 %v474_v37, %v389_v35  ;;  %v386_v41 = vpop.f32.mrf.mxu1 }
  0xb3   : > { %v390_v42 = vadd.f32 %v386_v41, %v296_v40 }
  0xb4   : > { %v492_v39 = vadd.f32 %v776_v36, %v479_v38 }
  0xb6   : > { %494 = vst [vmem:[%s207_s27] sm:$0xff] %v492_v39 }
  0xb9   : > { %v476_v43 = vpop.f32.mrf.mxu2 }
  0xba   : > { %v480_v44 = vadd.f32 %v476_v43, %v390_v42 }
  0xbc   : > { %v493_v45 = vadd.f32 %v776_v36, %v480_v44 }
  0xbe   : > { %495 = vst [vmem:[%s207_s27 + $0x8] sm:$0xff] %v493_v45 }
  0xbf PF: > { %s13_s14 = sadd.s32 1, %s799_s14   ;;  %s941_s12 = smov %s795_s13 }
  0xc0   : > { %p10_p5 = scmp.ge.s32.totalorder %s13_s14, 4   ;;  %s942_s13 = smov %s944_s15 }
  0xc2   :  { %12 = sbr.rel (!%p10_p5) target bundleno = 2 (0x2), region = 78 }

// kernel: cost_e2e_forward.32
= control target key start
LH: loop header
LB: loop body
LE: loop exit
PB: predicated region body
PF: predicated region fallthrough
CT: control target
= control target key end

     0   :  { %s821_s12 = smov 0   ;;  %s823_s13 = smov 0   ;;  %s937_s0 = inlined_call_operand.vmem [shape: f32[2,24,128], index: 0, kind: input, shape index: {}]   ;;  %s938_s1 = inlined_call_operand.vmem [shape: bf16[3,128,128], index: 1, kind: input, shape index: {}]   ;;  %s939_s2 = inlined_call_operand.vmem [shape: f32[1,128], index: 2, kind: input, shape index: {}]   ;;  %s940_s3 = inlined_call_operand.vmem [shape: f32[2,16,128], index: 3, kind: output, shape index: {}]  }
   0x1   :  { %s825_s14 = smov 0  }
   0x2 LB: > { %s25_s15 = sadd.s32 1, %s795_s13  ;;  %p588_p0 = scmp.ge.s32.totalorder %s799_s14, 1  ;;  %s799_s14 = sphi %s825_s14, %s13_s14   ;;  %s795_s13 = sphi %s823_s13, %s942_s13   ;;  %s791_s12 = sphi %s821_s12, %s941_s12  }
   0x3   : > { %p27_p1 = scmp.ge.s32.totalorder %s25_s15, 2  ;;  %p161_p2 = scmp.lt.s32.totalorder %s799_s14, 3 }
   0x5   : > { %s944_s15 = smov (%p27_p1, %s25_s15), 0  ;;  %p162_p3 = pnand %p588_p0, %p161_p2 }
   0x6   : > { %p191_p4 = scmp.lt.s32.totalorder (!%p162_p3), %s791_s12, 1 }
   0x7   : > { %165 = sbr.rel (%p162_p3) target bundleno = 191 (0xbf), region = 32 }
   0xc   : > { %v734_v0 = vld [vmem:[%s938_s1 + $0x38] sm:$0xff]  ;;  %v733_v3 = vld [vmem:[%s938_s1 + $0x30] sm:$0xff]  ;;  %v732_v6 = vld [vmem:[%s938_s1 + $0x28] sm:$0xff]  ;;  %s946_s12 = smov (!%p191_p4, %s791_s12), 1 }
   0xd   : > { %v742_v1 = vld [vmem:[%s938_s1 + $0x78] sm:$0xff]  ;;  %285 = vmatpush.bf16.msra.mxu0 %v734_v0  ;;  %v741_v4 = vld [vmem:[%s938_s1 + $0x70] sm:$0xff]  ;;  %v740_v7 = vld [vmem:[%s938_s1 + $0x68] sm:$0xff]  ;;  %s751_s27 = smul.u32 24, %s946_s12  ;;  %s726_s22 = sshll.u32 %s946_s12, 4 }
   0xe   : > { %v750_v2 = vld [vmem:[%s938_s1 + $0xb8] sm:$0xff]  ;;  %375 = vmatpush.bf16.msra.mxu1 %v742_v1  ;;  %v749_v5 = vld [vmem:[%s938_s1 + $0xb0] sm:$0xff]  ;;  %v748_v8 = vld [vmem:[%s938_s1 + $0xa8] sm:$0xff] }
   0xf   : > { %465 = vmatpush.bf16.msra.mxu2 %v750_v2  ;;  %v731_v9 = vld [vmem:[%s938_s1 + $0x20] sm:$0xff]  ;;  %v730_v12 = vld [vmem:[%s938_s1 + $0x18] sm:$0xff]  ;;  %v729_v15 = vld [vmem:[%s938_s1 + $0x10] sm:$0xff]  ;;  %s195_s9 = scalar_lea.vmem %s937_s0, %s751_s27  ;;  %s207_s27 = scalar_lea.vmem %s940_s3, %s726_s22 }
  0x10   : > { %v739_v10 = vld [vmem:[%s938_s1 + $0x60] sm:$0xff]  ;;  %v738_v13 = vld [vmem:[%s938_s1 + $0x58] sm:$0xff]  ;;  %v737_v16 = vld [vmem:[%s938_s1 + $0x50] sm:$0xff] }
  0x11   : > { %286 = vmatpush.bf16.msra.mxu0 %v733_v3  ;;  %v747_v11 = vld [vmem:[%s938_s1 + $0xa0] sm:$0xff]  ;;  %v746_v14 = vld [vmem:[%s938_s1 + $0x98] sm:$0xff]  ;;  %v745_v17 = vld [vmem:[%s938_s1 + $0x90] sm:$0xff] }
  0x12   : > { %376 = vmatpush.bf16.msra.mxu1 %v741_v4  ;;  %v728_v18 = vld [vmem:[%s938_s1 + $0x8] sm:$0xff]  ;;  %v727_v21 = vld [vmem:[%s938_s1] sm:$0xff] }
  0x13   : > { %466 = vmatpush.bf16.msra.mxu2 %v749_v5  ;;  %v736_v19 = vld [vmem:[%s938_s1 + $0x48] sm:$0xff]  ;;  %v735_v22 = vld [vmem:[%s938_s1 + $0x40] sm:$0xff] }
  0x14   : > { %v744_v20 = vld [vmem:[%s938_s1 + $0x88] sm:$0xff]  ;;  %v216_v23 = vld [vmem:[%s195_s9] sm:$0xff] }
  0x15   : > { %287 = vmatpush.bf16.msra.mxu0 %v732_v6  ;;  %v217_v24 = vld [vmem:[%s195_s9 + $0x8] sm:$0xff]  ;;  %v743_v27 = vld [vmem:[%s938_s1 + $0x80] sm:$0xff] }
  0x16   : > { %377 = vmatpush.bf16.msra.mxu1 %v740_v7  ;;  %v624_v25 = vld [vmem:[%s195_s9 + $0x2] sm:$0xff]  ;;  %v625_v26 = vld [vmem:[%s195_s9 + $0xa] sm:$0xff]  ;;  %v220_v30 = vpack.c.bf16 %v217_v24, %v216_v23  ;;  %v776_v36 = vld [vmem:[%s939_s2] ss:$0 sm:$0xff] }
  0x17   : > { %467 = vmatpush.bf16.msra.mxu2 %v748_v8  ;;  %v674_v28 = vld [vmem:[%s195_s9 + $0x4] sm:$0xff]  ;;  %v675_v29 = vld [vmem:[%s195_s9 + $0xc] sm:$0xff]  ;;  %v309_v31 = vpack.c.bf16 %v625_v26, %v624_v25 }
  0x18   : > { %v399_v32 = vpack.c.bf16 %v675_v29, %v674_v28 }
  0x19   : > { %288 = vmatpush.bf16.msra.mxu0 %v731_v9 }
  0x1a   : > { %378 = vmatpush.bf16.msra.mxu1 %v739_v10 }
  0x1b   : > { %468 = vmatpush.bf16.msra.mxu2 %v747_v11 }
  0x1d   : > { %289 = vmatpush.bf16.msra.mxu0 %v730_v12 }
  0x1e   : > { %379 = vmatpush.bf16.msra.mxu1 %v738_v13 }
  0x1f   : > { %469 = vmatpush.bf16.msra.mxu2 %v746_v14 }
  0x21   : > { %290 = vmatpush.bf16.msra.mxu0 %v729_v15 }
  0x22   : > { %380 = vmatpush.bf16.msra.mxu1 %v737_v16 }
  0x23   : > { %470 = vmatpush.bf16.msra.mxu2 %v745_v17 }
  0x25   : > { %291 = vmatpush.bf16.msra.mxu0 %v728_v18 }
  0x26   : > { %381 = vmatpush.bf16.msra.mxu1 %v736_v19 }
  0x27   : > { %471 = vmatpush.bf16.msra.mxu2 %v744_v20 }
  0x29   : > { %292 = vmatpush.bf16.msra.mxu0 %v727_v21 }
  0x2a   : > { %382 = vmatpush.bf16.msra.mxu1 %v735_v22 }
  0x2b   : > { %472 = vmatpush.bf16.msra.mxu2 %v743_v27 }
  0x2c   : > { %293 = vmatmul.bf16.vlgmr.msra.gmra.mxu0 %v220_v30 }
  0x2d   : > { %383 = vmatmul.bf16.vlgmr.msra.gmra.mxu1 %v309_v31 }
  0x2e   : > { %473 = vmatmul.bf16.vlgmr.msra.gmra.mxu2 %v399_v32 }
  0xa9   : > { %v294_v33 = vpop.f32.mrf.mxu0 }
  0xaa   : > { %v384_v34 = vpop.f32.mrf.mxu1 }
  0xab   : > { %v389_v35 = vadd.f32 %v384_v34, %v294_v33 }
  0xb1   : > { %v474_v37 = vpop.f32.mrf.mxu2  ;;  %v296_v40 = vpop.f32.mrf.mxu0 }
  0xb2   : > { %v479_v38 = vadd.f32 %v474_v37, %v389_v35  ;;  %v386_v41 = vpop.f32.mrf.mxu1 }
  0xb3   : > { %v390_v42 = vadd.f32 %v386_v41, %v296_v40 }
  0xb4   : > { %v492_v39 = vadd.f32 %v776_v36, %v479_v38 }
  0xb6   : > { %494 = vst [vmem:[%s207_s27] sm:$0xff] %v492_v39 }
  0xb9   : > { %v476_v43 = vpop.f32.mrf.mxu2 }
  0xba   : > { %v480_v44 = vadd.f32 %v476_v43, %v390_v42 }
  0xbc   : > { %v493_v45 = vadd.f32 %v776_v36, %v480_v44 }
  0xbe   : > { %495 = vst [vmem:[%s207_s27 + $0x8] sm:$0xff] %v493_v45 }
  0xbf PF: > { %s13_s14 = sadd.s32 1, %s799_s14   ;;  %s941_s12 = smov %s795_s13 }
  0xc0   : > { %p10_p5 = scmp.ge.s32.totalorder %s13_s14, 4   ;;  %s942_s13 = smov %s944_s15 }
  0xc2   :  { %12 = sbr.rel (!%p10_p5) target bundleno = 2 (0x2), region = 78 }

// kernel: cost_e2e_forward.34
= control target key start
LH: loop header
LB: loop body
LE: loop exit
PB: predicated region body
PF: predicated region fallthrough
CT: control target
= control target key end

     0   :  { %s821_s12 = smov 0   ;;  %s823_s13 = smov 0   ;;  %s937_s0 = inlined_call_operand.vmem [shape: f32[2,24,128], index: 0, kind: input, shape index: {}]   ;;  %s938_s1 = inlined_call_operand.vmem [shape: bf16[3,128,128], index: 1, kind: input, shape index: {}]   ;;  %s939_s2 = inlined_call_operand.vmem [shape: f32[1,128], index: 2, kind: input, shape index: {}]   ;;  %s940_s3 = inlined_call_operand.vmem [shape: f32[2,16,128], index: 3, kind: output, shape index: {}]  }
   0x1   :  { %s825_s14 = smov 0  }
   0x2 LB: > { %s25_s15 = sadd.s32 1, %s795_s13  ;;  %p588_p0 = scmp.ge.s32.totalorder %s799_s14, 1  ;;  %s799_s14 = sphi %s825_s14, %s13_s14   ;;  %s795_s13 = sphi %s823_s13, %s942_s13   ;;  %s791_s12 = sphi %s821_s12, %s941_s12  }
   0x3   : > { %p27_p1 = scmp.ge.s32.totalorder %s25_s15, 2  ;;  %p161_p2 = scmp.lt.s32.totalorder %s799_s14, 3 }
   0x5   : > { %s944_s15 = smov (%p27_p1, %s25_s15), 0  ;;  %p162_p3 = pnand %p588_p0, %p161_p2 }
   0x6   : > { %p191_p4 = scmp.lt.s32.totalorder (!%p162_p3), %s791_s12, 1 }
   0x7   : > { %165 = sbr.rel (%p162_p3) target bundleno = 191 (0xbf), region = 32 }
   0xc   : > { %v734_v0 = vld [vmem:[%s938_s1 + $0x38] sm:$0xff]  ;;  %v733_v3 = vld [vmem:[%s938_s1 + $0x30] sm:$0xff]  ;;  %v732_v6 = vld [vmem:[%s938_s1 + $0x28] sm:$0xff]  ;;  %s946_s12 = smov (!%p191_p4, %s791_s12), 1 }
   0xd   : > { %v742_v1 = vld [vmem:[%s938_s1 + $0x78] sm:$0xff]  ;;  %285 = vmatpush.bf16.msra.mxu0 %v734_v0  ;;  %v741_v4 = vld [vmem:[%s938_s1 + $0x70] sm:$0xff]  ;;  %v740_v7 = vld [vmem:[%s938_s1 + $0x68] sm:$0xff]  ;;  %s751_s27 = smul.u32 24, %s946_s12  ;;  %s726_s22 = sshll.u32 %s946_s12, 4 }
   0xe   : > { %v750_v2 = vld [vmem:[%s938_s1 + $0xb8] sm:$0xff]  ;;  %375 = vmatpush.bf16.msra.mxu1 %v742_v1  ;;  %v749_v5 = vld [vmem:[%s938_s1 + $0xb0] sm:$0xff]  ;;  %v748_v8 = vld [vmem:[%s938_s1 + $0xa8] sm:$0xff] }
   0xf   : > { %465 = vmatpush.bf16.msra.mxu2 %v750_v2  ;;  %v731_v9 = vld [vmem:[%s938_s1 + $0x20] sm:$0xff]  ;;  %v730_v12 = vld [vmem:[%s938_s1 + $0x18] sm:$0xff]  ;;  %v729_v15 = vld [vmem:[%s938_s1 + $0x10] sm:$0xff]  ;;  %s195_s9 = scalar_lea.vmem %s937_s0, %s751_s27  ;;  %s207_s27 = scalar_lea.vmem %s940_s3, %s726_s22 }
  0x10   : > { %v739_v10 = vld [vmem:[%s938_s1 + $0x60] sm:$0xff]  ;;  %v738_v13 = vld [vmem:[%s938_s1 + $0x58] sm:$0xff]  ;;  %v737_v16 = vld [vmem:[%s938_s1 + $0x50] sm:$0xff] }
  0x11   : > { %286 = vmatpush.bf16.msra.mxu0 %v733_v3  ;;  %v747_v11 = vld [vmem:[%s938_s1 + $0xa0] sm:$0xff]  ;;  %v746_v14 = vld [vmem:[%s938_s1 + $0x98] sm:$0xff]  ;;  %v745_v17 = vld [vmem:[%s938_s1 + $0x90] sm:$0xff] }
  0x12   : > { %376 = vmatpush.bf16.msra.mxu1 %v741_v4  ;;  %v728_v18 = vld [vmem:[%s938_s1 + $0x8] sm:$0xff]  ;;  %v727_v21 = vld [vmem:[%s938_s1] sm:$0xff]  ;;  %v675_v28 = vld [vmem:[%s195_s9 + $0x10] sm:$0xff] }
  0x13   : > { %466 = vmatpush.bf16.msra.mxu2 %v749_v5  ;;  %v736_v19 = vld [vmem:[%s938_s1 + $0x48] sm:$0xff]  ;;  %v735_v22 = vld [vmem:[%s938_s1 + $0x40] sm:$0xff] }
  0x14   : > { %v744_v20 = vld [vmem:[%s938_s1 + $0x88] sm:$0xff]  ;;  %v216_v23 = vld [vmem:[%s195_s9] sm:$0xff] }
  0x15   : > { %287 = vmatpush.bf16.msra.mxu0 %v732_v6  ;;  %v217_v24 = vld [vmem:[%s195_s9 + $0x8] sm:$0xff]  ;;  %v743_v27 = vld [vmem:[%s938_s1 + $0x80] sm:$0xff] }
  0x16   : > { %377 = vmatpush.bf16.msra.mxu1 %v740_v7  ;;  %v624_v25 = vld [vmem:[%s195_s9 + $0x4] sm:$0xff]  ;;  %v625_v26 = vld [vmem:[%s195_s9 + $0xc] sm:$0xff]  ;;  %v220_v29 = vpack.c.bf16 %v217_v24, %v216_v23  ;;  %v399_v31 = vpack.c.bf16 %v675_v28, %v217_v24  ;;  %v776_v35 = vld [vmem:[%s939_s2] ss:$0 sm:$0xff] }
  0x17   : > { %467 = vmatpush.bf16.msra.mxu2 %v748_v8  ;;  %v309_v30 = vpack.c.bf16 %v625_v26, %v624_v25 }
  0x19   : > { %288 = vmatpush.bf16.msra.mxu0 %v731_v9 }
  0x1a   : > { %378 = vmatpush.bf16.msra.mxu1 %v739_v10 }
  0x1b   : > { %468 = vmatpush.bf16.msra.mxu2 %v747_v11 }
  0x1d   : > { %289 = vmatpush.bf16.msra.mxu0 %v730_v12 }
  0x1e   : > { %379 = vmatpush.bf16.msra.mxu1 %v738_v13 }
  0x1f   : > { %469 = vmatpush.bf16.msra.mxu2 %v746_v14 }
  0x21   : > { %290 = vmatpush.bf16.msra.mxu0 %v729_v15 }
  0x22   : > { %380 = vmatpush.bf16.msra.mxu1 %v737_v16 }
  0x23   : > { %470 = vmatpush.bf16.msra.mxu2 %v745_v17 }
  0x25   : > { %291 = vmatpush.bf16.msra.mxu0 %v728_v18 }
  0x26   : > { %381 = vmatpush.bf16.msra.mxu1 %v736_v19 }
  0x27   : > { %471 = vmatpush.bf16.msra.mxu2 %v744_v20 }
  0x29   : > { %292 = vmatpush.bf16.msra.mxu0 %v727_v21 }
  0x2a   : > { %382 = vmatpush.bf16.msra.mxu1 %v735_v22 }
  0x2b   : > { %472 = vmatpush.bf16.msra.mxu2 %v743_v27 }
  0x2c   : > { %293 = vmatmul.bf16.vlgmr.msra.gmra.mxu0 %v220_v29 }
  0x2d   : > { %383 = vmatmul.bf16.vlgmr.msra.gmra.mxu1 %v309_v30 }
  0x2e   : > { %473 = vmatmul.bf16.vlgmr.msra.gmra.mxu2 %v399_v31 }
  0xa9   : > { %v294_v32 = vpop.f32.mrf.mxu0 }
  0xaa   : > { %v384_v33 = vpop.f32.mrf.mxu1 }
  0xab   : > { %v389_v34 = vadd.f32 %v384_v33, %v294_v32 }
  0xb1   : > { %v474_v36 = vpop.f32.mrf.mxu2  ;;  %v296_v39 = vpop.f32.mrf.mxu0 }
  0xb2   : > { %v479_v37 = vadd.f32 %v474_v36, %v389_v34  ;;  %v386_v40 = vpop.f32.mrf.mxu1 }
  0xb3   : > { %v390_v41 = vadd.f32 %v386_v40, %v296_v39 }
  0xb4   : > { %v492_v38 = vadd.f32 %v776_v35, %v479_v37 }
  0xb6   : > { %494 = vst [vmem:[%s207_s27] sm:$0xff] %v492_v38 }
  0xb9   : > { %v476_v42 = vpop.f32.mrf.mxu2 }
  0xba   : > { %v480_v43 = vadd.f32 %v476_v42, %v390_v41 }
  0xbc   : > { %v493_v44 = vadd.f32 %v776_v35, %v480_v43 }
  0xbe   : > { %495 = vst [vmem:[%s207_s27 + $0x8] sm:$0xff] %v493_v44 }
  0xbf PF: > { %s13_s14 = sadd.s32 1, %s799_s14   ;;  %s941_s12 = smov %s795_s13 }
  0xc0   : > { %p10_p5 = scmp.ge.s32.totalorder %s13_s14, 4   ;;  %s942_s13 = smov %s944_s15 }
  0xc2   :  { %12 = sbr.rel (!%p10_p5) target bundleno = 2 (0x2), region = 78 }

// kernel: neg.23
= control target key start
LH: loop header
LB: loop body
LE: loop exit
PB: predicated region body
PF: predicated region fallthrough
CT: control target
= control target key end

     0   :  { %2 = vsyncpa [#allocation1], 0  ;;  %s156_s8 = smov [#allocation0]   ;;  %s157_s10 = smov 128   ;;  %s187_s0 = inlined_call_operand.hbm [shape: f32[9,16,8], index: 0, kind: input, shape index: {}]   ;;  %s188_s1 = inlined_call_operand.vmem [shape: bf16[9,16,8], index: 1, kind: output, shape index: {}]  }
   0x1   :  { %s5_s0 = sshll.u32 %s187_s0, 4  ;;  %s7_s9 = sshll.u32 %s156_s8, 4  ;;  %s6_s0 = int_to_ptr.hbm [resolvable:$true] %s5_s0  ;;  %s8_s9 = int_to_ptr.vmem [resolvable:$true] %s7_s9 }
   0x2   :  { %s158_s11 = smov 8  }
   0x3   :  { %13 = dma.hbm_to_vmem [thread:$0]  %s6_s0, 1152, %s8_s9, [#allocation1], %s157_s10, %s157_s10, %s158_s11  }
   0x4   :  { %154 = dma.done.wait [#allocation1], 1152  }
   0x5   :  { %155 = vsyncadd [#allocation1], 4294966144  ;;  %v16_v0 = vld [vmem:[#allocation0] sm:$0xff]  ;;  %v24_v1 = vld [vmem:[#allocation0 + $0x8] sm:$0xff] }
   0x6   :  { %v33_v2 = vld [vmem:[#allocation0 + $0x10] sm:$0xff]  ;;  %v19_v3 = vxor.u32 2147483648, %v16_v0  ;;  %v27_v4 = vxor.u32 2147483648, %v24_v1  ;;  %v42_v6 = vld [vmem:[#allocation0 + $0x18] sm:$0xff]  ;;  %v51_v7 = vld [vmem:[#allocation0 + $0x20] sm:$0xff] }
   0x7   :  { %v36_v5 = vxor.u32 2147483648, %v33_v2  ;;  %v60_v8 = vld [vmem:[#allocation0 + $0x28] sm:$0xff]  ;;  %v45_v9 = vxor.u32 2147483648, %v42_v6  ;;  %v54_v10 = vxor.u32 2147483648, %v51_v7  ;;  %v69_v12 = vld [vmem:[#allocation0 + $0x30] sm:$0xff]  ;;  %v78_v13 = vld [vmem:[#allocation0 + $0x38] sm:$0xff] }
   0x8   :  { %v63_v11 = vxor.u32 2147483648, %v60_v8  ;;  %v87_v14 = vld [vmem:[#allocation0 + $0x40] sm:$0xff]  ;;  %v107_v15 = vpack.c.bf16 %v27_v4, %v19_v3  ;;  %v72_v16 = vxor.u32 2147483648, %v69_v12  ;;  %v81_v17 = vxor.u32 2147483648, %v78_v13 }
   0x9   :  { %v90_v18 = vxor.u32 2147483648, %v87_v14  ;;  %v112_v19 = vpack.c.bf16 %v45_v9, %v36_v5 }
   0xa   :  { %v117_v20 = vpack.c.bf16 %v63_v11, %v54_v10  ;;  %108 = vst [vmem:[%s188_s1] sm:$0xff] %v107_v15   ;;  %v122_v21 = vpack.c.bf16 %v81_v17, %v72_v16 }
   0xb   :  { %v93_v22 = vpack.c.bf16 0.0, %v90_v18  ;;  %124 = vst [vmem:[%s188_s1 + $0x8] sm:$0xff] %v112_v19  }
   0xc   :  { %125 = vst [vmem:[%s188_s1 + $0x10] sm:$0xff] %v117_v20  }
   0xd   :  { %126 = vst [vmem:[%s188_s1 + $0x18] sm:$0xff] %v122_v21  }
   0xe   :  { %103 = vst [vmem:[%s188_s1 + $0x20] sm:$0xf] %v93_v22 }
   0xf   :  { %95 = vsyncpa [#allocation1], 1 }

// kernel: reverse.2
= control target key start
LH: loop header
LB: loop body
LE: loop exit
PB: predicated region body
PF: predicated region fallthrough
CT: control target
= control target key end

     0   :  { %s92_s0 = inlined_call_operand.vmem [shape: f32[2,8,7], index: 0, kind: input, shape index: {}]   ;;  %s93_s1 = inlined_call_operand.vmem [shape: f32[2,8,7], index: 1, kind: output, shape index: {}]  }
   0x1   :  { %v28_v0 = vld [vmem:[%s92_s0 + $0xc] sm:$0x3]  ;;  %v29_v1 = vld [vmem:[%s92_s0 + $0xa] sm:$0x3]  ;;  %v31_v2 = vld [vmem:[%s92_s0 + $0x8] sm:$0x3] }
   0x2   :  { %4 = vst [vmem:[%s93_s1] sm:$0x3] %v28_v0  ;;  %v33_v3 = vld [vmem:[%s92_s0 + $0x6] sm:$0x3]  ;;  %v35_v4 = vld [vmem:[%s92_s0 + $0x4] sm:$0x3] }
   0x3   :  { %30 = vst [vmem:[%s93_s1 + $0x2] sm:$0x3] %v29_v1  ;;  %v37_v5 = vld [vmem:[%s92_s0 + $0x2] sm:$0x3]  ;;  %v25_v6 = vld [vmem:[%s92_s0] sm:$0x3] }
   0x4   :  { %32 = vst [vmem:[%s93_s1 + $0x4] sm:$0x3] %v31_v2 }
   0x5   :  { %34 = vst [vmem:[%s93_s1 + $0x6] sm:$0x3] %v33_v3 }
   0x6   :  { %36 = vst [vmem:[%s93_s1 + $0x8] sm:$0x3] %v35_v4 }
   0x7   :  { %38 = vst [vmem:[%s93_s1 + $0xa] sm:$0x3] %v37_v5 }
   0x8   :  { %39 = vst [vmem:[%s93_s1 + $0xc] sm:$0x3] %v25_v6 }

// kernel: cost_e2e_forward.38
= control target key start
LH: loop header
LB: loop body
LE: loop exit
PB: predicated region body
PF: predicated region fallthrough
CT: control target
= control target key end

     0   :  { %s1238_s9 = smov 0   ;;  %s1339_s0 = inlined_call_operand.vmem [shape: bf16[16,8,128], index: 0, kind: input, shape index: {}]   ;;  %s1340_s1 = inlined_call_operand.vmem [shape: bf16[16,128,128], index: 1, kind: input, shape index: {}]   ;;  %s1341_s2 = inlined_call_operand.vmem [shape: f32[16,8,128], index: 2, kind: output, shape index: {}]  }
   0x1 LB: > { %s872_s10 = sadd.s32 4294967295, %s1221_s9   ;;  %p876_p0 = scmp.ge.s32.totalorder %s1221_s9, 1  ;;  %s1221_s9 = sphi %s1238_s9, %s12_s9  }
   0x2   : > { %p125_p1 = scmp.lt.s32.totalorder %s1221_s9, 3 }
   0x4   : > { %p126_p2 = pnand %p876_p0, %p125_p1 }
   0x5   : > { %s877_s11 = sshll.u32 (!%p126_p2), %s872_s10, 3 }
   0x6   : > { %129 = sbr.rel (%p126_p2) target bundleno = 221 (0xdd), region = 28  ;;  %p154_p3 = scmp.lt.s32.totalorder (!%p126_p2), %s877_s11, 15 }
   0xb   : > { %s1343_s11 = smov (!%p154_p3, %s877_s11), 15 }
   0xc   : > { %s1142_s12 = sshll.u32 %s1343_s11, 6  ;;  %s878_s16 = sshll.u32 %s1343_s11, 2 }
   0xd   : > { %s1252_s15 = scalar_lea.vmem %s1340_s1, %s1142_s12  ;;  %s1292_s19 = scalar_lea.vmem %s1339_s0, %s878_s16 }
   0xe   : > { %v1150_v0 = vld [vmem:[%s1252_s15 + $0x38] sm:$0xff]  ;;  %v1149_v4 = vld [vmem:[%s1252_s15 + $0x30] sm:$0xff]  ;;  %v1148_v8 = vld [vmem:[%s1252_s15 + $0x28] sm:$0xff]  ;;  %s883_s20 = sshll.u32 %s1343_s11, 3 }
   0xf   : > { %v1158_v1 = vld [vmem:[%s1252_s15 + $0x78] sm:$0xff]  ;;  %356 = vmatpush.bf16.msra.mxu0 %v1150_v0  ;;  %v1157_v5 = vld [vmem:[%s1252_s15 + $0x70] sm:$0xff]  ;;  %v1156_v9 = vld [vmem:[%s1252_s15 + $0x68] sm:$0xff]  ;;  %s170_s23 = scalar_lea.vmem %s1341_s2, %s883_s20 }
  0x10   : > { %v1166_v2 = vld [vmem:[%s1252_s15 + $0xb8] sm:$0xff]  ;;  %417 = vmatpush.bf16.msra.mxu1 %v1158_v1  ;;  %v1165_v6 = vld [vmem:[%s1252_s15 + $0xb0] sm:$0xff]  ;;  %v1164_v10 = vld [vmem:[%s1252_s15 + $0xa8] sm:$0xff] }
  0x11   : > { %v1174_v3 = vld [vmem:[%s1252_s15 + $0xf8] sm:$0xff]  ;;  %478 = vmatpush.bf16.msra.mxu2 %v1166_v2  ;;  %v1173_v7 = vld [vmem:[%s1252_s15 + $0xf0] sm:$0xff]  ;;  %v1172_v11 = vld [vmem:[%s1252_s15 + $0xe8] sm:$0xff] }
  0x12   : > { %539 = vmatpush.bf16.msra.mxu3 %v1174_v3  ;;  %v1147_v12 = vld [vmem:[%s1252_s15 + $0x20] sm:$0xff]  ;;  %v1146_v16 = vld [vmem:[%s1252_s15 + $0x18] sm:$0xff]  ;;  %v1145_v20 = vld [vmem:[%s1252_s15 + $0x10] sm:$0xff] }
  0x13   : > { %357 = vmatpush.bf16.msra.mxu0 %v1149_v4  ;;  %v1155_v13 = vld [vmem:[%s1252_s15 + $0x60] sm:$0xff]  ;;  %v1154_v17 = vld [vmem:[%s1252_s15 + $0x58] sm:$0xff]  ;;  %v1153_v21 = vld [vmem:[%s1252_s15 + $0x50] sm:$0xff] }
  0x14   : > { %418 = vmatpush.bf16.msra.mxu1 %v1157_v5  ;;  %v1163_v14 = vld [vmem:[%s1252_s15 + $0xa0] sm:$0xff]  ;;  %v1162_v18 = vld [vmem:[%s1252_s15 + $0x98] sm:$0xff]  ;;  %v1161_v22 = vld [vmem:[%s1252_s15 + $0x90] sm:$0xff] }
  0x15   : > { %479 = vmatpush.bf16.msra.mxu2 %v1165_v6  ;;  %v1171_v15 = vld [vmem:[%s1252_s15 + $0xe0] sm:$0xff]  ;;  %v1170_v19 = vld [vmem:[%s1252_s15 + $0xd8] sm:$0xff]  ;;  %v1169_v23 = vld [vmem:[%s1252_s15 + $0xd0] sm:$0xff] }
  0x16   : > { %540 = vmatpush.bf16.msra.mxu3 %v1173_v7  ;;  %v1144_v24 = vld [vmem:[%s1252_s15 + $0x8] sm:$0xff]  ;;  %v1143_v28 = vld [vmem:[%s1252_s15] sm:$0xff]  ;;  %v1182_v32 = vld [vmem:[%s1252_s15 + $0x138] sm:$0xff] }
  0x17   : > { %358 = vmatpush.bf16.msra.mxu0 %v1148_v8  ;;  %v1152_v25 = vld [vmem:[%s1252_s15 + $0x48] sm:$0xff]  ;;  %v1151_v29 = vld [vmem:[%s1252_s15 + $0x40] sm:$0xff]  ;;  %v1190_v33 = vld [vmem:[%s1252_s15 + $0x178] sm:$0xff] }
  0x18   : > { %419 = vmatpush.bf16.msra.mxu1 %v1156_v9  ;;  %v1160_v26 = vld [vmem:[%s1252_s15 + $0x88] sm:$0xff]  ;;  %v1159_v30 = vld [vmem:[%s1252_s15 + $0x80] sm:$0xff]  ;;  %v1198_v34 = vld [vmem:[%s1252_s15 + $0x1b8] sm:$0xff] }
  0x19   : > { %480 = vmatpush.bf16.msra.mxu2 %v1164_v10  ;;  %v1168_v27 = vld [vmem:[%s1252_s15 + $0xc8] sm:$0xff]  ;;  %v1167_v31 = vld [vmem:[%s1252_s15 + $0xc0] sm:$0xff]  ;;  %v1206_v35 = vld [vmem:[%s1252_s15 + $0x1f8] sm:$0xff] }
  0x1a   : > { %541 = vmatpush.bf16.msra.mxu3 %v1172_v11  ;;  %v1181_v36 = vld [vmem:[%s1252_s15 + $0x130] sm:$0xff]  ;;  %v174_v37 = vld [vmem:[%s1292_s19 + $0x8] sm:$0xf]  ;;  %v175_v38 = vld [vmem:[%s1292_s19 + $0xc] sm:$0xf] }
  0x1b   : > { %359 = vmatpush.bf16.msra.mxu0 %v1147_v12  ;;  %v1189_v39 = vld [vmem:[%s1252_s15 + $0x170] sm:$0xff]  ;;  %v172_v40 = vld [vmem:[%s1292_s19] sm:$0xf]  ;;  %v173_v41 = vld [vmem:[%s1292_s19 + $0x4] sm:$0xf] }
  0x1c   : > { %420 = vmatpush.bf16.msra.mxu1 %v1155_v13  ;;  %v1197_v42 = vld [vmem:[%s1252_s15 + $0x1b0] sm:$0xff]  ;;  %v1180_v44 = vld [vmem:[%s1252_s15 + $0x128] sm:$0xff]  ;;  %v1179_v48 = vld [vmem:[%s1252_s15 + $0x120] sm:$0xff] }
  0x1d   : > { %481 = vmatpush.bf16.msra.mxu2 %v1163_v14  ;;  %v1205_v43 = vld [vmem:[%s1252_s15 + $0x1f0] sm:$0xff]  ;;  %v1188_v45 = vld [vmem:[%s1252_s15 + $0x168] sm:$0xff]  ;;  %v1187_v49 = vld [vmem:[%s1252_s15 + $0x160] sm:$0xff] }
  0x1e   : > { %542 = vmatpush.bf16.msra.mxu3 %v1171_v15  ;;  %v1196_v46 = vld [vmem:[%s1252_s15 + $0x1a8] sm:$0xff]  ;;  %v1195_v50 = vld [vmem:[%s1252_s15 + $0x1a0] sm:$0xff]  ;;  %v1178_v52 = vld [vmem:[%s1252_s15 + $0x118] sm:$0xff] }
  0x1f   : > { %360 = vmatpush.bf16.msra.mxu0 %v1146_v16  ;;  %v1204_v47 = vld [vmem:[%s1252_s15 + $0x1e8] sm:$0xff]  ;;  %v1203_v51 = vld [vmem:[%s1252_s15 + $0x1e0] sm:$0xff]  ;;  %v1186_v53 = vld [vmem:[%s1252_s15 + $0x158] sm:$0xff] }
  0x20   : > { %421 = vmatpush.bf16.msra.mxu1 %v1154_v17  ;;  %v1194_v54 = vld [vmem:[%s1252_s15 + $0x198] sm:$0xff]  ;;  %v1177_v56 = vld [vmem:[%s1252_s15 + $0x110] sm:$0xff]  ;;  %v1176_v60 = vld [vmem:[%s1252_s15 + $0x108] sm:$0xff] }
  0x21   : > { %482 = vmatpush.bf16.msra.mxu2 %v1162_v18  ;;  %v1202_v55 = vld [vmem:[%s1252_s15 + $0x1d8] sm:$0xff]  ;;  %v1185_v57 = vld [vmem:[%s1252_s15 + $0x150] sm:$0xff]  ;;  %v1184_v61 = vld [vmem:[%s1252_s15 + $0x148] sm:$0xff] }
  0x22   : > { %543 = vmatpush.bf16.msra.mxu3 %v1170_v19  ;;  %v1193_v58 = vld [vmem:[%s1252_s15 + $0x190] sm:$0xff]  ;;  %v1192_v62 = vld [vmem:[%s1252_s15 + $0x188] sm:$0xff]  ;;  %v1175_v0 = vld [vmem:[%s1252_s15 + $0x100] sm:$0xff] }
  0x23   : > { %361 = vmatpush.bf16.msra.mxu0 %v1145_v20  ;;  %v1201_v59 = vld [vmem:[%s1252_s15 + $0x1d0] sm:$0xff]  ;;  %v1200_v63 = vld [vmem:[%s1252_s15 + $0x1c8] sm:$0xff]  ;;  %v1183_v1 = vld [vmem:[%s1252_s15 + $0x140] sm:$0xff] }
  0x24   : > { %422 = vmatpush.bf16.msra.mxu1 %v1153_v21  ;;  %v1191_v2 = vld [vmem:[%s1252_s15 + $0x180] sm:$0xff]  ;;  %v176_v4 = vld [vmem:[%s1292_s19 + $0x10] sm:$0xf]  ;;  %v177_v5 = vld [vmem:[%s1292_s19 + $0x14] sm:$0xf] }
  0x25   : > { %483 = vmatpush.bf16.msra.mxu2 %v1161_v22  ;;  %v1199_v3 = vld [vmem:[%s1252_s15 + $0x1c0] sm:$0xff]  ;;  %v178_v6 = vld [vmem:[%s1292_s19 + $0x18] sm:$0xf]  ;;  %v179_v7 = vld [vmem:[%s1292_s19 + $0x1c] sm:$0xf] }
  0x26   : > { %544 = vmatpush.bf16.msra.mxu3 %v1169_v23 }
  0x27   : > { %362 = vmatpush.bf16.msra.mxu0 %v1144_v24 }
  0x28   : > { %423 = vmatpush.bf16.msra.mxu1 %v1152_v25 }
  0x29   : > { %484 = vmatpush.bf16.msra.mxu2 %v1160_v26 }
  0x2a   : > { %545 = vmatpush.bf16.msra.mxu3 %v1168_v27 }
  0x2b   : > { %363 = vmatpush.bf16.msra.mxu0 %v1143_v28 }
  0x2c   : > { %424 = vmatpush.bf16.msra.mxu1 %v1151_v29 }
  0x2d   : > { %485 = vmatpush.bf16.msra.mxu2 %v1159_v30 }
  0x2e   : > { %546 = vmatpush.bf16.msra.mxu3 %v1167_v31  ;;  %364 = vmatmul.bf16.vlgmr.msra.gmra.mxu0 %v172_v40 }
  0x2f   : > { %600 = vmatpush.bf16.msrb.mxu0 %v1182_v32  ;;  %425 = vmatmul.bf16.vlgmr.msra.gmra.mxu1 %v173_v41 }
  0x30   : > { %661 = vmatpush.bf16.msrb.mxu1 %v1190_v33  ;;  %486 = vmatmul.bf16.vlgmr.msra.gmra.mxu2 %v174_v37 }
  0x31   : > { %722 = vmatpush.bf16.msrb.mxu2 %v1198_v34  ;;  %547 = vmatmul.bf16.vlgmr.msra.gmra.mxu3 %v175_v38 }
  0x32   : > { %783 = vmatpush.bf16.msrb.mxu3 %v1206_v35 }
  0x33   : > { %601 = vmatpush.bf16.msrb.mxu0 %v1181_v36 }
  0x34   : > { %662 = vmatpush.bf16.msrb.mxu1 %v1189_v39 }
  0x35   : > { %723 = vmatpush.bf16.msrb.mxu2 %v1197_v42 }
  0x36   : > { %784 = vmatpush.bf16.msrb.mxu3 %v1205_v43 }
  0x37   : > { %602 = vmatpush.bf16.msrb.mxu0 %v1180_v44 }
  0x38   : > { %663 = vmatpush.bf16.msrb.mxu1 %v1188_v45 }
  0x39   : > { %724 = vmatpush.bf16.msrb.mxu2 %v1196_v46 }
  0x3a   : > { %785 = vmatpush.bf16.msrb.mxu3 %v1204_v47 }
  0x3b   : > { %603 = vmatpush.bf16.msrb.mxu0 %v1179_v48 }
  0x3c   : > { %664 = vmatpush.bf16.msrb.mxu1 %v1187_v49 }
  0x3d   : > { %725 = vmatpush.bf16.msrb.mxu2 %v1195_v50 }
  0x3e   : > { %786 = vmatpush.bf16.msrb.mxu3 %v1203_v51 }
  0x3f   : > { %604 = vmatpush.bf16.msrb.mxu0 %v1178_v52 }
  0x40   : > { %665 = vmatpush.bf16.msrb.mxu1 %v1186_v53 }
  0x41   : > { %726 = vmatpush.bf16.msrb.mxu2 %v1194_v54 }
  0x42   : > { %787 = vmatpush.bf16.msrb.mxu3 %v1202_v55 }
  0x43   : > { %605 = vmatpush.bf16.msrb.mxu0 %v1177_v56 }
  0x44   : > { %666 = vmatpush.bf16.msrb.mxu1 %v1185_v57 }
  0x45   : > { %727 = vmatpush.bf16.msrb.mxu2 %v1193_v58 }
  0x46   : > { %788 = vmatpush.bf16.msrb.mxu3 %v1201_v59 }
  0x47   : > { %606 = vmatpush.bf16.msrb.mxu0 %v1176_v60 }
  0x48   : > { %667 = vmatpush.bf16.msrb.mxu1 %v1184_v61 }
  0x49   : > { %728 = vmatpush.bf16.msrb.mxu2 %v1192_v62 }
  0x4a   : > { %789 = vmatpush.bf16.msrb.mxu3 %v1200_v63 }
  0x4b   : > { %607 = vmatpush.bf16.msrb.mxu0 %v1175_v0 }
  0x4c   : > { %668 = vmatpush.bf16.msrb.mxu1 %v1183_v1 }
  0x4d   : > { %729 = vmatpush.bf16.msrb.mxu2 %v1191_v2 }
  0x4e   : > { %790 = vmatpush.bf16.msrb.mxu3 %v1199_v3  ;;  %608 = vmatmul.bf16.vlgmr.msrb.gmra.mxu0 %v176_v4 }
  0x4f   : > { %669 = vmatmul.bf16.vlgmr.msrb.gmra.mxu1 %v177_v5 }
  0x50   : > { %730 = vmatmul.bf16.vlgmr.msrb.gmra.mxu2 %v178_v6 }
  0x51   : > { %791 = vmatmul.bf16.vlgmr.msrb.gmra.mxu3 %v179_v7 }
  0xab   : > { %v365_v8 = vpop.f32.mrf.mxu0 }
  0xac   : > { %v426_v9 = vpop.f32.mrf.mxu1  ;;  %796 = vst [vmem:[%s170_s23] sm:$0xff] %v365_v8 }
  0xad   : > { %797 = vst [vmem:[%s170_s23 + $0x8] sm:$0xff] %v426_v9 }
  0xb3   : > { %v487_v10 = vpop.f32.mrf.mxu2  ;;  %v367_v12 = vpop.f32.mrf.mxu0 }
  0xb4   : > { %v548_v11 = vpop.f32.mrf.mxu3  ;;  %798 = vst [vmem:[%s170_s23 + $0x10] sm:$0xff] %v487_v10  ;;  %v428_v13 = vpop.f32.mrf.mxu1 }
  0xb5   : > { %799 = vst [vmem:[%s170_s23 + $0x18] sm:$0xff] %v548_v11 }
  0xbb   : > { %v489_v14 = vpop.f32.mrf.mxu2 }
  0xbc   : > { %v550_v15 = vpop.f32.mrf.mxu3 }
  0xcb   : > { %v609_v16 = vpop.f32.mrf.mxu0 }
  0xcc   : > { %v670_v17 = vpop.f32.mrf.mxu1  ;;  %800 = vst [vmem:[%s170_s23 + $0x20] sm:$0xff] %v609_v16 }
  0xcd   : > { %801 = vst [vmem:[%s170_s23 + $0x28] sm:$0xff] %v670_v17 }
  0xd3   : > { %v731_v18 = vpop.f32.mrf.mxu2  ;;  %v611_v20 = vpop.f32.mrf.mxu0 }
  0xd4   : > { %v792_v19 = vpop.f32.mrf.mxu3  ;;  %802 = vst [vmem:[%s170_s23 + $0x30] sm:$0xff] %v731_v18  ;;  %v672_v21 = vpop.f32.mrf.mxu1 }
  0xd5   : > { %803 = vst [vmem:[%s170_s23 + $0x38] sm:$0xff] %v792_v19 }
  0xdb   : > { %v733_v22 = vpop.f32.mrf.mxu2 }
  0xdc   : > { %v794_v23 = vpop.f32.mrf.mxu3 }
  0xdd PF: > { %s12_s9 = sadd.s32 1, %s1221_s9  }
  0xde   : > { %p9_p4 = scmp.ge.s32.totalorder %s12_s9, 4  }
  0xe0   :  { %11 = sbr.rel (!%p9_p4) target bundleno = 1 (0x1), region = 61 }

// kernel: cost_e2e_forward.45
= control target key start
LH: loop header
LB: loop body
LE: loop exit
PB: predicated region body
PF: predicated region fallthrough
CT: control target
= control target key end

     0   :  { %s1238_s9 = smov 0   ;;  %s1339_s0 = inlined_call_operand.vmem [shape: bf16[16,8,128], index: 0, kind: input, shape index: {}]   ;;  %s1340_s1 = inlined_call_operand.vmem [shape: bf16[16,128,128], index: 1, kind: input, shape index: {}]   ;;  %s1341_s2 = inlined_call_operand.vmem [shape: f32[16,8,128], index: 2, kind: output, shape index: {}]  }
   0x1 LB: > { %s872_s10 = sadd.s32 4294967295, %s1221_s9   ;;  %p876_p0 = scmp.ge.s32.totalorder %s1221_s9, 1  ;;  %s1221_s9 = sphi %s1238_s9, %s12_s9  }
   0x2   : > { %p125_p1 = scmp.lt.s32.totalorder %s1221_s9, 3 }
   0x4   : > { %p126_p2 = pnand %p876_p0, %p125_p1 }
   0x5   : > { %s877_s11 = sshll.u32 (!%p126_p2), %s872_s10, 3 }
   0x6   : > { %129 = sbr.rel (%p126_p2) target bundleno = 285 (0x11d), region = 28  ;;  %p154_p3 = scmp.lt.s32.totalorder (!%p126_p2), %s877_s11, 15 }
   0xb   : > { %s1343_s11 = smov (!%p154_p3, %s877_s11), 15 }
   0xc   : > { %s1142_s12 = sshll.u32 %s1343_s11, 6  ;;  %s878_s16 = sshll.u32 %s1343_s11, 2 }
   0xd   : > { %s1252_s15 = scalar_lea.vmem %s1340_s1, %s1142_s12  ;;  %s1294_s19 = scalar_lea.vmem %s1339_s0, %s878_s16 }
   0xe   : > { %v1150_v0 = vld [vmem:[%s1252_s15 + $0x38] sm:$0xff]  ;;  %v1149_v4 = vld [vmem:[%s1252_s15 + $0x30] sm:$0xff]  ;;  %v1148_v8 = vld [vmem:[%s1252_s15 + $0x28] sm:$0xff]  ;;  %s883_s20 = sshll.u32 %s1343_s11, 3 }
   0xf   : > { %v1158_v1 = vld [vmem:[%s1252_s15 + $0x78] sm:$0xff]  ;;  %356 = vmatpush.bf16.xpose.msra.mxu0 %v1150_v0  ;;  %v1157_v5 = vld [vmem:[%s1252_s15 + $0x70] sm:$0xff]  ;;  %v1156_v9 = vld [vmem:[%s1252_s15 + $0x68] sm:$0xff]  ;;  %s170_s23 = scalar_lea.vmem %s1341_s2, %s883_s20 }
  0x10   : > { %v1166_v2 = vld [vmem:[%s1252_s15 + $0xb8] sm:$0xff]  ;;  %417 = vmatpush.bf16.xpose.msra.mxu1 %v1158_v1  ;;  %v1165_v6 = vld [vmem:[%s1252_s15 + $0xb0] sm:$0xff]  ;;  %v1164_v10 = vld [vmem:[%s1252_s15 + $0xa8] sm:$0xff] }
  0x11   : > { %v1174_v3 = vld [vmem:[%s1252_s15 + $0xf8] sm:$0xff]  ;;  %478 = vmatpush.bf16.xpose.msra.mxu2 %v1166_v2  ;;  %v1173_v7 = vld [vmem:[%s1252_s15 + $0xf0] sm:$0xff]  ;;  %v1172_v11 = vld [vmem:[%s1252_s15 + $0xe8] sm:$0xff] }
  0x12   : > { %539 = vmatpush.bf16.xpose.msra.mxu3 %v1174_v3  ;;  %v1147_v12 = vld [vmem:[%s1252_s15 + $0x20] sm:$0xff]  ;;  %v1146_v16 = vld [vmem:[%s1252_s15 + $0x18] sm:$0xff]  ;;  %v1145_v20 = vld [vmem:[%s1252_s15 + $0x10] sm:$0xff] }
  0x13   : > { %v1155_v13 = vld [vmem:[%s1252_s15 + $0x60] sm:$0xff]  ;;  %v1154_v17 = vld [vmem:[%s1252_s15 + $0x58] sm:$0xff]  ;;  %v1153_v21 = vld [vmem:[%s1252_s15 + $0x50] sm:$0xff] }
  0x14   : > { %v1163_v14 = vld [vmem:[%s1252_s15 + $0xa0] sm:$0xff]  ;;  %v1162_v18 = vld [vmem:[%s1252_s15 + $0x98] sm:$0xff]  ;;  %v1161_v22 = vld [vmem:[%s1252_s15 + $0x90] sm:$0xff] }
  0x15   : > { %v1171_v15 = vld [vmem:[%s1252_s15 + $0xe0] sm:$0xff]  ;;  %v1170_v19 = vld [vmem:[%s1252_s15 + $0xd8] sm:$0xff]  ;;  %v1169_v23 = vld [vmem:[%s1252_s15 + $0xd0] sm:$0xff] }
  0x16   : > { %v1144_v24 = vld [vmem:[%s1252_s15 + $0x8] sm:$0xff]  ;;  %v1143_v28 = vld [vmem:[%s1252_s15] sm:$0xff]  ;;  %v1182_v32 = vld [vmem:[%s1252_s15 + $0x138] sm:$0xff] }
  0x17   : > { %357 = vmatpush.bf16.xpose.msra.mxu0 %v1149_v4  ;;  %v1152_v25 = vld [vmem:[%s1252_s15 + $0x48] sm:$0xff]  ;;  %v1151_v29 = vld [vmem:[%s1252_s15 + $0x40] sm:$0xff]  ;;  %v1190_v33 = vld [vmem:[%s1252_s15 + $0x178] sm:$0xff] }
  0x18   : > { %418 = vmatpush.bf16.xpose.msra.mxu1 %v1157_v5  ;;  %v1160_v26 = vld [vmem:[%s1252_s15 + $0x88] sm:$0xff]  ;;  %v1159_v30 = vld [vmem:[%s1252_s15 + $0x80] sm:$0xff]  ;;  %v1198_v34 = vld [vmem:[%s1252_s15 + $0x1b8] sm:$0xff] }
  0x19   : > { %479 = vmatpush.bf16.xpose.msra.mxu2 %v1165_v6  ;;  %v1168_v27 = vld [vmem:[%s1252_s15 + $0xc8] sm:$0xff]  ;;  %v1167_v31 = vld [vmem:[%s1252_s15 + $0xc0] sm:$0xff]  ;;  %v1206_v35 = vld [vmem:[%s1252_s15 + $0x1f8] sm:$0xff] }
  0x1a   : > { %540 = vmatpush.bf16.xpose.msra.mxu3 %v1173_v7  ;;  %v174_v36 = vld [vmem:[%s1294_s19 + $0x8] sm:$0xf]  ;;  %v175_v37 = vld [vmem:[%s1294_s19 + $0xc] sm:$0xf]  ;;  %v1181_v38 = vld [vmem:[%s1252_s15 + $0x130] sm:$0xff] }
  0x1b   : > { %v1189_v39 = vld [vmem:[%s1252_s15 + $0x170] sm:$0xff]  ;;  %v172_v42 = vld [vmem:[%s1294_s19] sm:$0xf]  ;;  %v173_v43 = vld [vmem:[%s1294_s19 + $0x4] sm:$0xf] }
  0x1c   : > { %v1197_v40 = vld [vmem:[%s1252_s15 + $0x1b0] sm:$0xff]  ;;  %v1180_v44 = vld [vmem:[%s1252_s15 + $0x128] sm:$0xff]  ;;  %v1179_v48 = vld [vmem:[%s1252_s15 + $0x120] sm:$0xff] }
  0x1d   : > { %v1205_v41 = vld [vmem:[%s1252_s15 + $0x1f0] sm:$0xff]  ;;  %v1188_v45 = vld [vmem:[%s1252_s15 + $0x168] sm:$0xff]  ;;  %v1187_v49 = vld [vmem:[%s1252_s15 + $0x160] sm:$0xff] }
  0x1e   : > { %v1196_v46 = vld [vmem:[%s1252_s15 + $0x1a8] sm:$0xff]  ;;  %v1195_v50 = vld [vmem:[%s1252_s15 + $0x1a0] sm:$0xff]  ;;  %v1178_v52 = vld [vmem:[%s1252_s15 + $0x118] sm:$0xff] }
  0x1f   : > { %358 = vmatpush.bf16.xpose.msra.mxu0 %v1148_v8  ;;  %v1204_v47 = vld [vmem:[%s1252_s15 + $0x1e8] sm:$0xff]  ;;  %v1203_v51 = vld [vmem:[%s1252_s15 + $0x1e0] sm:$0xff]  ;;  %v1186_v53 = vld [vmem:[%s1252_s15 + $0x158] sm:$0xff] }
  0x20   : > { %419 = vmatpush.bf16.xpose.msra.mxu1 %v1156_v9  ;;  %v1194_v54 = vld [vmem:[%s1252_s15 + $0x198] sm:$0xff]  ;;  %v1177_v56 = vld [vmem:[%s1252_s15 + $0x110] sm:$0xff]  ;;  %v1176_v60 = vld [vmem:[%s1252_s15 + $0x108] sm:$0xff] }
  0x21   : > { %480 = vmatpush.bf16.xpose.msra.mxu2 %v1164_v10  ;;  %v1202_v55 = vld [vmem:[%s1252_s15 + $0x1d8] sm:$0xff]  ;;  %v1185_v57 = vld [vmem:[%s1252_s15 + $0x150] sm:$0xff]  ;;  %v1184_v61 = vld [vmem:[%s1252_s15 + $0x148] sm:$0xff] }
  0x22   : > { %541 = vmatpush.bf16.xpose.msra.mxu3 %v1172_v11  ;;  %v1193_v58 = vld [vmem:[%s1252_s15 + $0x190] sm:$0xff]  ;;  %v1192_v62 = vld [vmem:[%s1252_s15 + $0x188] sm:$0xff]  ;;  %v1175_v0 = vld [vmem:[%s1252_s15 + $0x100] sm:$0xff] }
  0x23   : > { %v1201_v59 = vld [vmem:[%s1252_s15 + $0x1d0] sm:$0xff]  ;;  %v1200_v63 = vld [vmem:[%s1252_s15 + $0x1c8] sm:$0xff]  ;;  %v1183_v1 = vld [vmem:[%s1252_s15 + $0x140] sm:$0xff] }
  0x24   : > { %v1191_v2 = vld [vmem:[%s1252_s15 + $0x180] sm:$0xff]  ;;  %v176_v4 = vld [vmem:[%s1294_s19 + $0x10] sm:$0xf]  ;;  %v177_v5 = vld [vmem:[%s1294_s19 + $0x14] sm:$0xf] }
  0x25   : > { %v1199_v3 = vld [vmem:[%s1252_s15 + $0x1c0] sm:$0xff]  ;;  %v178_v6 = vld [vmem:[%s1294_s19 + $0x18] sm:$0xf]  ;;  %v179_v7 = vld [vmem:[%s1294_s19 + $0x1c] sm:$0xf] }
  0x27   : > { %359 = vmatpush.bf16.xpose.msra.mxu0 %v1147_v12 }
  0x28   : > { %420 = vmatpush.bf16.xpose.msra.mxu1 %v1155_v13 }
  0x29   : > { %481 = vmatpush.bf16.xpose.msra.mxu2 %v1163_v14 }
  0x2a   : > { %542 = vmatpush.bf16.xpose.msra.mxu3 %v1171_v15 }
  0x2f   : > { %360 = vmatpush.bf16.xpose.msra.mxu0 %v1146_v16 }
  0x30   : > { %421 = vmatpush.bf16.xpose.msra.mxu1 %v1154_v17 }
  0x31   : > { %482 = vmatpush.bf16.xpose.msra.mxu2 %v1162_v18 }
  0x32   : > { %543 = vmatpush.bf16.xpose.msra.mxu3 %v1170_v19 }
  0x37   : > { %361 = vmatpush.bf16.xpose.msra.mxu0 %v1145_v20 }
  0x38   : > { %422 = vmatpush.bf16.xpose.msra.mxu1 %v1153_v21 }
  0x39   : > { %483 = vmatpush.bf16.xpose.msra.mxu2 %v1161_v22 }
  0x3a   : > { %544 = vmatpush.bf16.xpose.msra.mxu3 %v1169_v23 }
  0x3f   : > { %362 = vmatpush.bf16.xpose.msra.mxu0 %v1144_v24 }
  0x40   : > { %423 = vmatpush.bf16.xpose.msra.mxu1 %v1152_v25 }
  0x41   : > { %484 = vmatpush.bf16.xpose.msra.mxu2 %v1160_v26 }
  0x42   : > { %545 = vmatpush.bf16.xpose.msra.mxu3 %v1168_v27 }
  0x47   : > { %363 = vmatpush.bf16.xpose.msra.mxu0 %v1143_v28 }
  0x48   : > { %424 = vmatpush.bf16.xpose.msra.mxu1 %v1151_v29 }
  0x49   : > { %485 = vmatpush.bf16.xpose.msra.mxu2 %v1159_v30 }
  0x4a   : > { %546 = vmatpush.bf16.xpose.msra.mxu3 %v1167_v31 }
  0x4e   : > { %364 = vmatmul.bf16.vlgmr.msra.gmra.mxu0 %v172_v42 }
  0x4f   : > { %600 = vmatpush.bf16.xpose.msrb.mxu0 %v1182_v32  ;;  %425 = vmatmul.bf16.vlgmr.msra.gmra.mxu1 %v173_v43 }
  0x50   : > { %661 = vmatpush.bf16.xpose.msrb.mxu1 %v1190_v33  ;;  %486 = vmatmul.bf16.vlgmr.msra.gmra.mxu2 %v174_v36 }
  0x51   : > { %722 = vmatpush.bf16.xpose.msrb.mxu2 %v1198_v34  ;;  %547 = vmatmul.bf16.vlgmr.msra.gmra.mxu3 %v175_v37 }
  0x52   : > { %783 = vmatpush.bf16.xpose.msrb.mxu3 %v1206_v35 }
  0x57   : > { %601 = vmatpush.bf16.xpose.msrb.mxu0 %v1181_v38 }
  0x58   : > { %662 = vmatpush.bf16.xpose.msrb.mxu1 %v1189_v39 }
  0x59   : > { %723 = vmatpush.bf16.xpose.msrb.mxu2 %v1197_v40 }
  0x5a   : > { %784 = vmatpush.bf16.xpose.msrb.mxu3 %v1205_v41 }
  0x5f   : > { %602 = vmatpush.bf16.xpose.msrb.mxu0 %v1180_v44 }
  0x60   : > { %663 = vmatpush.bf16.xpose.msrb.mxu1 %v1188_v45 }
  0x61   : > { %724 = vmatpush.bf16.xpose.msrb.mxu2 %v1196_v46 }
  0x62   : > { %785 = vmatpush.bf16.xpose.msrb.mxu3 %v1204_v47 }
  0x67   : > { %603 = vmatpush.bf16.xpose.msrb.mxu0 %v1179_v48 }
  0x68   : > { %664 = vmatpush.bf16.xpose.msrb.mxu1 %v1187_v49 }
  0x69   : > { %725 = vmatpush.bf16.xpose.msrb.mxu2 %v1195_v50 }
  0x6a   : > { %786 = vmatpush.bf16.xpose.msrb.mxu3 %v1203_v51 }
  0x6f   : > { %604 = vmatpush.bf16.xpose.msrb.mxu0 %v1178_v52 }
  0x70   : > { %665 = vmatpush.bf16.xpose.msrb.mxu1 %v1186_v53 }
  0x71   : > { %726 = vmatpush.bf16.xpose.msrb.mxu2 %v1194_v54 }
  0x72   : > { %787 = vmatpush.bf16.xpose.msrb.mxu3 %v1202_v55 }
  0x77   : > { %605 = vmatpush.bf16.xpose.msrb.mxu0 %v1177_v56 }
  0x78   : > { %666 = vmatpush.bf16.xpose.msrb.mxu1 %v1185_v57 }
  0x79   : > { %727 = vmatpush.bf16.xpose.msrb.mxu2 %v1193_v58 }
  0x7a   : > { %788 = vmatpush.bf16.xpose.msrb.mxu3 %v1201_v59 }
  0x7f   : > { %606 = vmatpush.bf16.xpose.msrb.mxu0 %v1176_v60 }
  0x80   : > { %667 = vmatpush.bf16.xpose.msrb.mxu1 %v1184_v61 }
  0x81   : > { %728 = vmatpush.bf16.xpose.msrb.mxu2 %v1192_v62 }
  0x82   : > { %789 = vmatpush.bf16.xpose.msrb.mxu3 %v1200_v63 }
  0x87   : > { %607 = vmatpush.bf16.xpose.msrb.mxu0 %v1175_v0 }
  0x88   : > { %668 = vmatpush.bf16.xpose.msrb.mxu1 %v1183_v1 }
  0x89   : > { %729 = vmatpush.bf16.xpose.msrb.mxu2 %v1191_v2 }
  0x8a   : > { %790 = vmatpush.bf16.xpose.msrb.mxu3 %v1199_v3 }
  0x8e   : > { %608 = vmatmul.bf16.vlgmr.msrb.gmra.mxu0 %v176_v4 }
  0x8f   : > { %669 = vmatmul.bf16.vlgmr.msrb.gmra.mxu1 %v177_v5 }
  0x90   : > { %730 = vmatmul.bf16.vlgmr.msrb.gmra.mxu2 %v178_v6 }
  0x91   : > { %791 = vmatmul.bf16.vlgmr.msrb.gmra.mxu3 %v179_v7 }
  0xcb   : > { %v365_v8 = vpop.f32.mrf.mxu0 }
  0xcc   : > { %v426_v9 = vpop.f32.mrf.mxu1  ;;  %796 = vst [vmem:[%s170_s23] sm:$0xff] %v365_v8 }
  0xcd   : > { %797 = vst [vmem:[%s170_s23 + $0x8] sm:$0xff] %v426_v9 }
  0xd3   : > { %v487_v10 = vpop.f32.mrf.mxu2  ;;  %v367_v12 = vpop.f32.mrf.mxu0 }
  0xd4   : > { %v548_v11 = vpop.f32.mrf.mxu3  ;;  %798 = vst [vmem:[%s170_s23 + $0x10] sm:$0xff] %v487_v10  ;;  %v428_v13 = vpop.f32.mrf.mxu1 }
  0xd5   : > { %799 = vst [vmem:[%s170_s23 + $0x18] sm:$0xff] %v548_v11 }
  0xdb   : > { %v489_v14 = vpop.f32.mrf.mxu2 }
  0xdc   : > { %v550_v15 = vpop.f32.mrf.mxu3 }
 0x10b   : > { %v609_v16 = vpop.f32.mrf.mxu0 }
 0x10c   : > { %v670_v17 = vpop.f32.mrf.mxu1  ;;  %800 = vst [vmem:[%s170_s23 + $0x20] sm:$0xff] %v609_v16 }
 0x10d   : > { %801 = vst [vmem:[%s170_s23 + $0x28] sm:$0xff] %v670_v17 }
 0x113   : > { %v731_v18 = vpop.f32.mrf.mxu2  ;;  %v611_v20 = vpop.f32.mrf.mxu0 }
 0x114   : > { %v792_v19 = vpop.f32.mrf.mxu3  ;;  %802 = vst [vmem:[%s170_s23 + $0x30] sm:$0xff] %v731_v18  ;;  %v672_v21 = vpop.f32.mrf.mxu1 }
 0x115   : > { %803 = vst [vmem:[%s170_s23 + $0x38] sm:$0xff] %v792_v19 }
 0x11b   : > { %v733_v22 = vpop.f32.mrf.mxu2 }
 0x11c   : > { %v794_v23 = vpop.f32.mrf.mxu3 }
 0x11d PF: > { %s12_s9 = sadd.s32 1, %s1221_s9  }
 0x11e   : > { %p9_p4 = scmp.ge.s32.totalorder %s12_s9, 4  }
 0x120   :  { %11 = sbr.rel (!%p9_p4) target bundleno = 1 (0x1), region = 61 }

// kernel: cost_e2e_forward.41
= control target key start
LH: loop header
LB: loop body
LE: loop exit
PB: predicated region body
PF: predicated region fallthrough
CT: control target
= control target key end

     0   :  { %s209_s1 = inlined_call_operand.vmem [shape: bf16[128,128], index: 1, kind: input, shape index: {}]   ;;  %s210_s2 = inlined_call_operand.vmem [shape: f32[1,128], index: 2, kind: input, shape index: {}]   ;;  %s211_s0 = inlined_call_operand.vmem [shape: bf16[8,128], index: 0, kind: input, shape index: {}]   ;;  %s212_s3 = inlined_call_operand.vmem [shape: f32[8,128], index: 3, kind: output, shape index: {}]  }
   0x1   :  { %v154_v0 = vld [vmem:[%s209_s1 + $0x38] sm:$0xff]  ;;  %v153_v1 = vld [vmem:[%s209_s1 + $0x30] sm:$0xff]  ;;  %v152_v2 = vld [vmem:[%s209_s1 + $0x28] sm:$0xff] }
   0x2   :  { %85 = vmatpush.bf16.msra.mxu0 %v154_v0  ;;  %v151_v3 = vld [vmem:[%s209_s1 + $0x20] sm:$0xff]  ;;  %v150_v4 = vld [vmem:[%s209_s1 + $0x18] sm:$0xff]  ;;  %v149_v5 = vld [vmem:[%s209_s1 + $0x10] sm:$0xff] }
   0x3   :  { %v148_v6 = vld [vmem:[%s209_s1 + $0x8] sm:$0xff]  ;;  %v147_v7 = vld [vmem:[%s209_s1] sm:$0xff] }
   0x4   :  { %v20_v8 = vld [vmem:[%s211_s0] sm:$0xf] }
   0x5   :  { %v155_v9 = vld [vmem:[%s210_s2] ss:$0 sm:$0xff] }
   0x6   :  { %86 = vmatpush.bf16.msra.mxu0 %v153_v1 }
   0xa   :  { %87 = vmatpush.bf16.msra.mxu0 %v152_v2 }
   0xe   :  { %88 = vmatpush.bf16.msra.mxu0 %v151_v3 }
  0x12   :  { %89 = vmatpush.bf16.msra.mxu0 %v150_v4 }
  0x16   :  { %90 = vmatpush.bf16.msra.mxu0 %v149_v5 }
  0x1a   :  { %91 = vmatpush.bf16.msra.mxu0 %v148_v6 }
  0x1e   :  { %92 = vmatpush.bf16.msra.mxu0 %v147_v7 }
  0x21   :  { %93 = vmatmul.bf16.vlgmr.msra.gmra.mxu0 %v20_v8 }
  0x9e   :  { %v94_v10 = vpop.f32.mrf.mxu0 }
  0x9f   :  { %v108_v11 = vadd.f32 %v155_v9, %v94_v10 }
  0xa1   :  { %v109_v12 = vmax.f32 %v108_v11, 0.0 }
  0xa3   :  { %110 = vst [vmem:[%s212_s3] sm:$0xff] %v109_v12 }
  0xa6   :  { %v96_v13 = vpop.f32.mrf.mxu0 }

// kernel: cost_e2e_forward.37
= control target key start
LH: loop header
LB: loop body
LE: loop exit
PB: predicated region body
PF: predicated region fallthrough
CT: control target
= control target key end

     0   :  { %s1623_s12 = smov 0   ;;  %s1625_s13 = smov 0   ;;  %s1781_s0 = inlined_call_operand.vmem [shape: f32[2,144,128], index: 0, kind: input, shape index: {}]   ;;  %s1782_s1 = inlined_call_operand.vmem [shape: bf16[128,128,128], index: 1, kind: input, shape index: {}]   ;;  %s1783_s2 = inlined_call_operand.vmem [shape: f32[1,128], index: 2, kind: input, shape index: {}]   ;;  %s1784_s3 = inlined_call_operand.vmem [shape: f32[2,16,128], index: 3, kind: output, shape index: {}]  }
   0x1   :  { %s1627_s14 = smov 0   ;;  %s1629_s15 = smov 0  }
   0x2   :  { %s1631_s16 = smov 0  }
   0x3 LB: > { %s22_s17 = sadd.s32 1, %s1592_s14  ;;  %s25_s18 = sadd.s32 1, %s1596_s15  ;;  %s1600_s16 = sphi %s1631_s16, %s13_s16   ;;  %s1596_s15 = sphi %s1629_s15, %s1788_s15   ;;  %s1592_s14 = sphi %s1627_s14, %s1787_s14   ;;  %s1588_s13 = sphi %s1625_s13, %s1786_s13   ;;  %s1584_s12 = sphi %s1623_s12, %s1785_s12  }
   0x4   : > { %p23_p0 = scmp.ge.s32.totalorder %s22_s17, 16  ;;  %p1052_p1 = scmp.ge.s32.totalorder %s1600_s16, 1 }
   0x5   : > { %p161_p2 = scmp.lt.s32.totalorder %s1600_s16, 33 }
   0x6   : > { %s1790_s17 = smov (%p23_p0, %s22_s17), 0  ;;  %s1792_s18 = smov (!%p23_p0, %s25_s18), %s1596_s15 }
   0x7   : > { %p162_p3 = pnand %p1052_p1, %p161_p2  ;;  %p27_p4 = scmp.ge.s32.totalorder %s1792_s18, 2 }
   0x8   : > { %p191_p5 = scmp.lt.s32.totalorder (!%p162_p3), %s1588_s13, 1  ;;  %s1656_s19 = sshll.u32 (!%p162_p3), %s1584_s12, 3 }
   0x9   : > { %s1794_s18 = smov (%p27_p4, %s1792_s18), 0  ;;  %165 = sbr.rel (%p162_p3) target bundleno = 243 (0xf3), region = 32 }
   0xa   : > { %p197_p6 = scmp.lt.s32.totalorder (!%p162_p3), %s1656_s19, 127  ;;  %p1059_p7 = scmp.ne.s32.totalorder (!%p162_p3), %s1584_s12, 0 }
   0xe   : > { %s1796_s13 = smov (!%p191_p5, %s1588_s13), 1  ;;  %211 = sbr.rel (%p1059_p7) target bundleno = 22 (0x16), region = 36 }
   0xf   : > { %s198_s20 = scalar_select %p197_p6, %s1656_s19, 127 }
  0x10   : > { %s1519_s21 = smul.u32 144, %s1796_s13  ;;  %s1454_s22 = sshll.u32 %s1796_s13, 4 }
  0x11   : > { %s1453_s23 = sshll.u32 %s198_s20, 6  ;;  %s1663_s26 = scalar_lea.vmem %s1784_s3, %s1454_s22 }
  0x12   : > { %s1668_s29 = scalar_lea.vmem %s1781_s0, %s1519_s21  ;;  %s1673_s5 = scalar_lea.vmem %s1782_s1, %s1453_s23 }
  0x13   : > { %v1602_v0 = vmov 0.0  }
  0x14   : > { %212 = vst [vmem:[#allocation2] sm:$0xff] %v1602_v0 }
  0x15   : > { %213 = vst [vmem:[#allocation2 + $0x8] sm:$0xff] %v1602_v0 }
  0x16 PF: > { %v1462_v1 = vld [vmem:[%s1673_s5 + $0x38] sm:$0xff]  ;;  %v1461_v4 = vld [vmem:[%s1673_s5 + $0x30] sm:$0xff]  ;;  %v1460_v8 = vld [vmem:[%s1673_s5 + $0x28] sm:$0xff]  ;;  %s1706_s6 = scalar_lea.vmem %s1668_s29, %s1656_s19  ;;  %p1450_p8 = scmp.ne.s32.totalorder %s1584_s12, 15 }
  0x17   : > { %v1470_v2 = vld [vmem:[%s1673_s5 + $0x78] sm:$0xff]  ;;  %285 = vmatpush.bf16.msra.mxu0 %v1462_v1  ;;  %v1469_v5 = vld [vmem:[%s1673_s5 + $0x70] sm:$0xff]  ;;  %v1468_v9 = vld [vmem:[%s1673_s5 + $0x68] sm:$0xff] }
  0x18   : > { %v1478_v3 = vld [vmem:[%s1673_s5 + $0xb8] sm:$0xff]  ;;  %375 = vmatpush.bf16.msra.mxu1 %v1470_v2  ;;  %v1477_v6 = vld [vmem:[%s1673_s5 + $0xb0] sm:$0xff]  ;;  %v1476_v10 = vld [vmem:[%s1673_s5 + $0xa8] sm:$0xff] }
  0x19   : > { %465 = vmatpush.bf16.msra.mxu2 %v1478_v3  ;;  %v1486_v7 = vld [vmem:[%s1673_s5 + $0xf8] sm:$0xff]  ;;  %v1485_v11 = vld [vmem:[%s1673_s5 + $0xf0] sm:$0xff]  ;;  %v1459_v12 = vld [vmem:[%s1673_s5 + $0x20] sm:$0xff] }
  0x1a   : > { %555 = vmatpush.bf16.msra.mxu3 %v1486_v7  ;;  %v1467_v13 = vld [vmem:[%s1673_s5 + $0x60] sm:$0xff]  ;;  %v1484_v15 = vld [vmem:[%s1673_s5 + $0xe8] sm:$0xff]  ;;  %v1458_v16 = vld [vmem:[%s1673_s5 + $0x18] sm:$0xff] }
  0x1b   : > { %286 = vmatpush.bf16.msra.mxu0 %v1461_v4  ;;  %v1475_v14 = vld [vmem:[%s1673_s5 + $0xa0] sm:$0xff]  ;;  %v1466_v17 = vld [vmem:[%s1673_s5 + $0x58] sm:$0xff]  ;;  %v1457_v20 = vld [vmem:[%s1673_s5 + $0x10] sm:$0xff] }
  0x1c   : > { %376 = vmatpush.bf16.msra.mxu1 %v1469_v5  ;;  %v1474_v18 = vld [vmem:[%s1673_s5 + $0x98] sm:$0xff]  ;;  %v1483_v19 = vld [vmem:[%s1673_s5 + $0xe0] sm:$0xff]  ;;  %v1465_v21 = vld [vmem:[%s1673_s5 + $0x50] sm:$0xff] }
  0x1d   : > { %466 = vmatpush.bf16.msra.mxu2 %v1477_v6  ;;  %v1473_v22 = vld [vmem:[%s1673_s5 + $0x90] sm:$0xff]  ;;  %v1482_v23 = vld [vmem:[%s1673_s5 + $0xd8] sm:$0xff]  ;;  %v1456_v24 = vld [vmem:[%s1673_s5 + $0x8] sm:$0xff] }
  0x1e   : > { %556 = vmatpush.bf16.msra.mxu3 %v1485_v11  ;;  %v1464_v25 = vld [vmem:[%s1673_s5 + $0x48] sm:$0xff]  ;;  %v1481_v27 = vld [vmem:[%s1673_s5 + $0xd0] sm:$0xff]  ;;  %v1455_v28 = vld [vmem:[%s1673_s5] sm:$0xff] }
  0x1f   : > { %287 = vmatpush.bf16.msra.mxu0 %v1460_v8  ;;  %v1472_v26 = vld [vmem:[%s1673_s5 + $0x88] sm:$0xff]  ;;  %v1463_v29 = vld [vmem:[%s1673_s5 + $0x40] sm:$0xff]  ;;  %v1494_v32 = vld [vmem:[%s1673_s5 + $0x138] sm:$0xff] }
  0x20   : > { %377 = vmatpush.bf16.msra.mxu1 %v1468_v9  ;;  %v216_v30 = vld [vmem:[%s1706_s6] sm:$0xff]  ;;  %v217_v31 = vld [vmem:[%s1706_s6 + $0x8] sm:$0xff]  ;;  %v1502_v39 = vld [vmem:[%s1673_s5 + $0x178] sm:$0xff] }
  0x21   : > { %467 = vmatpush.bf16.msra.mxu2 %v1476_v10  ;;  %v1094_v33 = vld [vmem:[%s1706_s6 + $0x1] sm:$0xff]  ;;  %v1095_v34 = vld [vmem:[%s1706_s6 + $0x9] sm:$0xff]  ;;  %v220_v40 = vpack.c.bf16 %v217_v31, %v216_v30  ;;  %v1510_v45 = vld [vmem:[%s1673_s5 + $0x1b8] sm:$0xff] }
  0x22   : > { %557 = vmatpush.bf16.msra.mxu3 %v1484_v15  ;;  %v1471_v35 = vld [vmem:[%s1673_s5 + $0x80] sm:$0xff]  ;;  %v1146_v37 = vld [vmem:[%s1706_s6 + $0xa] sm:$0xff]  ;;  %v309_v41 = vpack.c.bf16 %v1095_v34, %v1094_v33  ;;  %v1518_v49 = vld [vmem:[%s1673_s5 + $0x1f8] sm:$0xff] }
  0x23   : > { %288 = vmatpush.bf16.msra.mxu0 %v1459_v12  ;;  %v1145_v36 = vld [vmem:[%s1706_s6 + $0x2] sm:$0xff]  ;;  %v1493_v43 = vld [vmem:[%s1673_s5 + $0x130] sm:$0xff]  ;;  %v1490_v59 = vld [vmem:[%s1673_s5 + $0x118] sm:$0xff] }
  0x24   : > { %378 = vmatpush.bf16.msra.mxu1 %v1467_v13  ;;  %v1480_v38 = vld [vmem:[%s1673_s5 + $0xc8] sm:$0xff]  ;;  %v399_v42 = vpack.c.bf16 %v1146_v37, %v1145_v36  ;;  %v1479_v44 = vld [vmem:[%s1673_s5 + $0xc0] sm:$0xff]  ;;  %v1501_v46 = vld [vmem:[%s1673_s5 + $0x170] sm:$0xff] }
  0x25   : > { %468 = vmatpush.bf16.msra.mxu2 %v1475_v14  ;;  %v1196_v47 = vld [vmem:[%s1706_s6 + $0x3] sm:$0xff]  ;;  %v1197_v48 = vld [vmem:[%s1706_s6 + $0xb] sm:$0xff]  ;;  %v1498_v60 = vld [vmem:[%s1673_s5 + $0x158] sm:$0xff] }
  0x26   : > { %558 = vmatpush.bf16.msra.mxu3 %v1483_v19  ;;  %v1492_v50 = vld [vmem:[%s1673_s5 + $0x128] sm:$0xff]  ;;  %v489_v51 = vpack.c.bf16 %v1197_v48, %v1196_v47  ;;  %v1509_v53 = vld [vmem:[%s1673_s5 + $0x1b0] sm:$0xff]  ;;  %v1491_v55 = vld [vmem:[%s1673_s5 + $0x120] sm:$0xff] }
  0x27   : > { %289 = vmatpush.bf16.msra.mxu0 %v1458_v16  ;;  %v1500_v52 = vld [vmem:[%s1673_s5 + $0x168] sm:$0xff]  ;;  %v1517_v54 = vld [vmem:[%s1673_s5 + $0x1f0] sm:$0xff]  ;;  %v1499_v56 = vld [vmem:[%s1673_s5 + $0x160] sm:$0xff] }
  0x28   : > { %379 = vmatpush.bf16.msra.mxu1 %v1466_v17  ;;  %v1508_v57 = vld [vmem:[%s1673_s5 + $0x1a8] sm:$0xff]  ;;  %v1507_v61 = vld [vmem:[%s1673_s5 + $0x1a0] sm:$0xff]  ;;  %v1489_v63 = vld [vmem:[%s1673_s5 + $0x110] sm:$0xff] }
  0x29   : > { %469 = vmatpush.bf16.msra.mxu2 %v1474_v18  ;;  %v1516_v58 = vld [vmem:[%s1673_s5 + $0x1e8] sm:$0xff]  ;;  %v1515_v62 = vld [vmem:[%s1673_s5 + $0x1e0] sm:$0xff]  ;;  %v1497_v0 = vld [vmem:[%s1673_s5 + $0x150] sm:$0xff] }
  0x2a   : > { %559 = vmatpush.bf16.msra.mxu3 %v1482_v23  ;;  %v1506_v1 = vld [vmem:[%s1673_s5 + $0x198] sm:$0xff]  ;;  %v1488_v3 = vld [vmem:[%s1673_s5 + $0x108] sm:$0xff]  ;;  %v1505_v5 = vld [vmem:[%s1673_s5 + $0x190] sm:$0xff] }
  0x2b   : > { %290 = vmatpush.bf16.msra.mxu0 %v1457_v20  ;;  %v1514_v2 = vld [vmem:[%s1673_s5 + $0x1d8] sm:$0xff]  ;;  %v1496_v4 = vld [vmem:[%s1673_s5 + $0x148] sm:$0xff]  ;;  %v1513_v6 = vld [vmem:[%s1673_s5 + $0x1d0] sm:$0xff] }
  0x2c   : > { %380 = vmatpush.bf16.msra.mxu1 %v1465_v21  ;;  %v1487_v7 = vld [vmem:[%s1673_s5 + $0x100] sm:$0xff]  ;;  %v1248_v9 = vld [vmem:[%s1706_s6 + $0xc] sm:$0xff] }
  0x2d   : > { %470 = vmatpush.bf16.msra.mxu2 %v1473_v22  ;;  %v1247_v8 = vld [vmem:[%s1706_s6 + $0x4] sm:$0xff]  ;;  %v1299_v13 = vld [vmem:[%s1706_s6 + $0xd] sm:$0xff] }
  0x2e   : > { %560 = vmatpush.bf16.msra.mxu3 %v1481_v27  ;;  %v1504_v10 = vld [vmem:[%s1673_s5 + $0x188] sm:$0xff]  ;;  %v1495_v11 = vld [vmem:[%s1673_s5 + $0x140] sm:$0xff]  ;;  %v579_v15 = vpack.c.bf16 %v1248_v9, %v1247_v8 }
  0x2f   : > { %291 = vmatpush.bf16.msra.mxu0 %v1456_v24  ;;  %v1298_v12 = vld [vmem:[%s1706_s6 + $0x5] sm:$0xff]  ;;  %v1350_v19 = vld [vmem:[%s1706_s6 + $0xe] sm:$0xff] }
  0x30   : > { %381 = vmatpush.bf16.msra.mxu1 %v1464_v25  ;;  %v1512_v14 = vld [vmem:[%s1673_s5 + $0x1c8] sm:$0xff]  ;;  %v669_v16 = vpack.c.bf16 %v1299_v13, %v1298_v12  ;;  %v1503_v17 = vld [vmem:[%s1673_s5 + $0x180] sm:$0xff] }
  0x31   : > { %471 = vmatpush.bf16.msra.mxu2 %v1472_v26  ;;  %v1349_v18 = vld [vmem:[%s1706_s6 + $0x6] sm:$0xff]  ;;  %v1401_v22 = vld [vmem:[%s1706_s6 + $0xf] sm:$0xff] }
  0x32   : > { %561 = vmatpush.bf16.msra.mxu3 %v1480_v38  ;;  %v1511_v20 = vld [vmem:[%s1673_s5 + $0x1c0] sm:$0xff]  ;;  %v759_v23 = vpack.c.bf16 %v1350_v19, %v1349_v18  ;;  %v219_v33 = vld [vmem:[#allocation2 + $0x8] sm:$0xff] }
  0x33   : > { %292 = vmatpush.bf16.msra.mxu0 %v1455_v28  ;;  %v1400_v21 = vld [vmem:[%s1706_s6 + $0x7] sm:$0xff] }
  0x34   : > { %382 = vmatpush.bf16.msra.mxu1 %v1463_v29  ;;  %v849_v24 = vpack.c.bf16 %v1401_v22, %v1400_v21  ;;  %v218_v26 = vld [vmem:[#allocation2] sm:$0xff] }
  0x35   : > { %472 = vmatpush.bf16.msra.mxu2 %v1471_v35 }
  0x36   : > { %293 = vmatmul.bf16.vlgmr.msra.gmra.mxu0 %v220_v40  ;;  %562 = vmatpush.bf16.msra.mxu3 %v1479_v44 }
  0x37   : > { %645 = vmatpush.bf16.msrb.mxu0 %v1494_v32  ;;  %383 = vmatmul.bf16.vlgmr.msra.gmra.mxu1 %v309_v41 }
  0x38   : > { %735 = vmatpush.bf16.msrb.mxu1 %v1502_v39  ;;  %473 = vmatmul.bf16.vlgmr.msra.gmra.mxu2 %v399_v42 }
  0x39   : > { %825 = vmatpush.bf16.msrb.mxu2 %v1510_v45  ;;  %563 = vmatmul.bf16.vlgmr.msra.gmra.mxu3 %v489_v51 }
  0x3a   : > { %915 = vmatpush.bf16.msrb.mxu3 %v1518_v49 }
  0x3b   : > { %646 = vmatpush.bf16.msrb.mxu0 %v1493_v43 }
  0x3c   : > { %736 = vmatpush.bf16.msrb.mxu1 %v1501_v46 }
  0x3d   : > { %826 = vmatpush.bf16.msrb.mxu2 %v1509_v53 }
  0x3e   : > { %916 = vmatpush.bf16.msrb.mxu3 %v1517_v54 }
  0x3f   : > { %647 = vmatpush.bf16.msrb.mxu0 %v1492_v50 }
  0x40   : > { %737 = vmatpush.bf16.msrb.mxu1 %v1500_v52 }
  0x41   : > { %827 = vmatpush.bf16.msrb.mxu2 %v1508_v57 }
  0x42   : > { %917 = vmatpush.bf16.msrb.mxu3 %v1516_v58 }
  0x43   : > { %648 = vmatpush.bf16.msrb.mxu0 %v1491_v55 }
  0x44   : > { %738 = vmatpush.bf16.msrb.mxu1 %v1499_v56 }
  0x45   : > { %828 = vmatpush.bf16.msrb.mxu2 %v1507_v61 }
  0x46   : > { %918 = vmatpush.bf16.msrb.mxu3 %v1515_v62 }
  0x47   : > { %649 = vmatpush.bf16.msrb.mxu0 %v1490_v59 }
  0x48   : > { %739 = vmatpush.bf16.msrb.mxu1 %v1498_v60 }
  0x49   : > { %829 = vmatpush.bf16.msrb.mxu2 %v1506_v1 }
  0x4a   : > { %919 = vmatpush.bf16.msrb.mxu3 %v1514_v2 }
  0x4b   : > { %650 = vmatpush.bf16.msrb.mxu0 %v1489_v63 }
  0x4c   : > { %740 = vmatpush.bf16.msrb.mxu1 %v1497_v0 }
  0x4d   : > { %830 = vmatpush.bf16.msrb.mxu2 %v1505_v5 }
  0x4e   : > { %920 = vmatpush.bf16.msrb.mxu3 %v1513_v6 }
  0x4f   : > { %651 = vmatpush.bf16.msrb.mxu0 %v1488_v3 }
  0x50   : > { %741 = vmatpush.bf16.msrb.mxu1 %v1496_v4 }
  0x51   : > { %831 = vmatpush.bf16.msrb.mxu2 %v1504_v10 }
  0x52   : > { %921 = vmatpush.bf16.msrb.mxu3 %v1512_v14 }
  0x53   : > { %652 = vmatpush.bf16.msrb.mxu0 %v1487_v7 }
  0x54   : > { %742 = vmatpush.bf16.msrb.mxu1 %v1495_v11 }
  0x55   : > { %832 = vmatpush.bf16.msrb.mxu2 %v1503_v17 }
  0x56   : > { %653 = vmatmul.bf16.vlgmr.msrb.gmra.mxu0 %v579_v15  ;;  %922 = vmatpush.bf16.msrb.mxu3 %v1511_v20 }
  0x57   : > { %743 = vmatmul.bf16.vlgmr.msrb.gmra.mxu1 %v669_v16 }
  0x58   : > { %833 = vmatmul.bf16.vlgmr.msrb.gmra.mxu2 %v759_v23 }
  0x59   : > { %923 = vmatmul.bf16.vlgmr.msrb.gmra.mxu3 %v849_v24 }
  0xb3   : > { %v294_v25 = vpop.f32.mrf.mxu0 }
  0xb4   : > { %v384_v27 = vpop.f32.mrf.mxu1  ;;  %v299_v28 = vadd.f32 %v294_v25, %v218_v26 }
  0xb6   : > { %v389_v32 = vadd.f32 %v384_v27, %v299_v28 }
  0xbb   : > { %v296_v29 = vpop.f32.mrf.mxu0  ;;  %v474_v30 = vpop.f32.mrf.mxu2 }
  0xbc   : > { %v564_v31 = vpop.f32.mrf.mxu3  ;;  %v386_v34 = vpop.f32.mrf.mxu1  ;;  %v300_v35 = vadd.f32 %v296_v29, %v219_v33  ;;  %v479_v36 = vadd.f32 %v474_v30, %v389_v32 }
  0xbe   : > { %v390_v39 = vadd.f32 %v386_v34, %v300_v35  ;;  %v569_v40 = vadd.f32 %v564_v31, %v479_v36 }
  0xc3   : > { %v476_v38 = vpop.f32.mrf.mxu2 }
  0xc4   : > { %v566_v41 = vpop.f32.mrf.mxu3  ;;  %v480_v44 = vadd.f32 %v476_v38, %v390_v39 }
  0xc6   : > { %v570_v48 = vadd.f32 %v566_v41, %v480_v44 }
  0xd3   : > { %v654_v37 = vpop.f32.mrf.mxu0 }
  0xd4   : > { %v659_v42 = vadd.f32 %v654_v37, %v569_v40  ;;  %v744_v43 = vpop.f32.mrf.mxu1 }
  0xd6   : > { %v749_v45 = vadd.f32 %v744_v43, %v659_v42 }
  0xdb   : > { %v656_v46 = vpop.f32.mrf.mxu0  ;;  %v834_v47 = vpop.f32.mrf.mxu2 }
  0xdc   : > { %v839_v49 = vadd.f32 %v834_v47, %v749_v45  ;;  %v924_v50 = vpop.f32.mrf.mxu3  ;;  %v660_v51 = vadd.f32 %v656_v46, %v570_v48  ;;  %v746_v53 = vpop.f32.mrf.mxu1 }
  0xde   : > { %v929_v52 = vadd.f32 %v924_v50, %v839_v49  ;;  %v750_v54 = vadd.f32 %v746_v53, %v660_v51 }
  0xe0   : > { %931 = vst [vmem:[#allocation2] sm:$0xff] %v929_v52 }
  0xe3   : > { %v836_v55 = vpop.f32.mrf.mxu2 }
  0xe4   : > { %v840_v56 = vadd.f32 %v836_v55, %v750_v54  ;;  %v926_v57 = vpop.f32.mrf.mxu3  ;;  %936 = sbr.rel (%p1450_p8) target bundleno = 243 (0xf3), region = 40 }
  0xe6   : > { %v930_v58 = vadd.f32 %v926_v57, %v840_v56 }
  0xe8   : > { %932 = vst [vmem:[#allocation2 + $0x8] sm:$0xff] %v930_v58 }
  0xe9   : > { %v937_v59 = vld [vmem:[#allocation2] sm:$0xff] }
  0xea   : > { %v1561_v60 = vld [vmem:[%s1783_s2] ss:$0 sm:$0xff] }
  0xeb   : > { %v943_v62 = vadd.f32 %v1561_v60, %v937_v59 }
  0xed   : > { %945 = vst [vmem:[%s1663_s26] sm:$0xff] %v943_v62 }
  0xef   : > { %v938_v61 = vld [vmem:[#allocation2 + $0x8] sm:$0xff] }
  0xf0   : > { %v944_v63 = vadd.f32 %v1561_v60, %v938_v61 }
  0xf2   : > { %946 = vst [vmem:[%s1663_s26 + $0x8] sm:$0xff] %v944_v63 }
  0xf3 PF: > { %s13_s16 = sadd.s32 1, %s1600_s16   ;;  %s1785_s12 = smov %s1592_s14 }
  0xf4   : > { %p10_p9 = scmp.ge.s32.totalorder %s13_s16, 34   ;;  %s1786_s13 = smov %s1596_s15 }
  0xf5   : > { %s1787_s14 = smov %s1790_s17  ;;  %s1788_s15 = smov %s1794_s18 }
  0xf6   :  { %12 = sbr.rel (!%p10_p9) target bundleno = 3 (0x3), region = 88 }

// kernel: cost_e2e_forward.42
= control target key start
LH: loop header
LB: loop body
LE: loop exit
PB: predicated region body
PF: predicated region fallthrough
CT: control target
= control target key end

     0   :  { %s208_s1 = inlined_call_operand.vmem [shape: bf16[128,128], index: 1, kind: input, shape index: {}]   ;;  %s209_s2 = inlined_call_operand.vmem [shape: f32[1,128], index: 2, kind: input, shape index: {}]   ;;  %s210_s0 = inlined_call_operand.vmem [shape: bf16[8,128], index: 0, kind: input, shape index: {}]   ;;  %s211_s3 = inlined_call_operand.vmem [shape: f32[8,128], index: 3, kind: output, shape index: {}]  }
   0x1   :  { %v153_v0 = vld [vmem:[%s208_s1 + $0x38] sm:$0xff]  ;;  %v152_v1 = vld [vmem:[%s208_s1 + $0x30] sm:$0xff]  ;;  %v151_v2 = vld [vmem:[%s208_s1 + $0x28] sm:$0xff] }
   0x2   :  { %85 = vmatpush.bf16.msra.mxu0 %v153_v0  ;;  %v150_v3 = vld [vmem:[%s208_s1 + $0x20] sm:$0xff]  ;;  %v149_v4 = vld [vmem:[%s208_s1 + $0x18] sm:$0xff]  ;;  %v148_v5 = vld [vmem:[%s208_s1 + $0x10] sm:$0xff] }
   0x3   :  { %v147_v6 = vld [vmem:[%s208_s1 + $0x8] sm:$0xff]  ;;  %v146_v7 = vld [vmem:[%s208_s1] sm:$0xff] }
   0x4   :  { %v20_v8 = vld [vmem:[%s210_s0] sm:$0xf] }
   0x5   :  { %v154_v9 = vld [vmem:[%s209_s2] ss:$0 sm:$0xff] }
   0x6   :  { %86 = vmatpush.bf16.msra.mxu0 %v152_v1 }
   0xa   :  { %87 = vmatpush.bf16.msra.mxu0 %v151_v2 }
   0xe   :  { %88 = vmatpush.bf16.msra.mxu0 %v150_v3 }
  0x12   :  { %89 = vmatpush.bf16.msra.mxu0 %v149_v4 }
  0x16   :  { %90 = vmatpush.bf16.msra.mxu0 %v148_v5 }
  0x1a   :  { %91 = vmatpush.bf16.msra.mxu0 %v147_v6 }
  0x1e   :  { %92 = vmatpush.bf16.msra.mxu0 %v146_v7 }
  0x21   :  { %93 = vmatmul.bf16.vlgmr.msra.gmra.mxu0 %v20_v8 }
  0x9e   :  { %v94_v10 = vpop.f32.mrf.mxu0 }
  0x9f   :  { %v108_v11 = vadd.f32 %v154_v9, %v94_v10 }
  0xa1   :  { %109 = vst [vmem:[%s211_s3] sm:$0xff] %v108_v11 }
  0xa6   :  { %v96_v12 = vpop.f32.mrf.mxu0 }

// kernel: cost_e2e_forward.39
= control target key start
LH: loop header
LB: loop body
LE: loop exit
PB: predicated region body
PF: predicated region fallthrough
CT: control target
= control target key end

     0   :  { %s284_s1 = inlined_call_operand.vmem [shape: bf16[128,128], index: 1, kind: input, shape index: {}]   ;;  %s285_s2 = inlined_call_operand.vmem [shape: f32[1,128], index: 2, kind: input, shape index: {}]   ;;  %s286_s0 = inlined_call_operand.vmem [shape: bf16[32,128], index: 0, kind: input, shape index: {}]   ;;  %s287_s3 = inlined_call_operand.vmem [shape: f32[32,128], index: 3, kind: output, shape index: {}]  }
   0x1   :  { %v209_v0 = vld [vmem:[%s284_s1 + $0x38] sm:$0xff]  ;;  %v208_v1 = vld [vmem:[%s284_s1 + $0x30] sm:$0xff]  ;;  %v207_v2 = vld [vmem:[%s284_s1 + $0x28] sm:$0xff] }
   0x2   :  { %106 = vmatpush.bf16.msra.mxu0 %v209_v0  ;;  %210 = vmatpush.bf16.msra.mxu1 %v209_v0  ;;  %v206_v3 = vld [vmem:[%s284_s1 + $0x20] sm:$0xff]  ;;  %v205_v4 = vld [vmem:[%s284_s1 + $0x18] sm:$0xff]  ;;  %v204_v5 = vld [vmem:[%s284_s1 + $0x10] sm:$0xff] }
   0x3   :  { %v203_v6 = vld [vmem:[%s284_s1 + $0x8] sm:$0xff]  ;;  %v202_v7 = vld [vmem:[%s284_s1] sm:$0xff] }
   0x4   :  { %v200_v8 = vld [vmem:[%s286_s0] sm:$0xff]  ;;  %v201_v9 = vld [vmem:[%s286_s0 + $0x8] sm:$0xff] }
   0x5   :  { %v218_v10 = vld [vmem:[%s285_s2] ss:$0 sm:$0xff] }
   0x6   :  { %107 = vmatpush.bf16.msra.mxu0 %v208_v1  ;;  %211 = vmatpush.bf16.msra.mxu1 %v208_v1 }
   0xa   :  { %108 = vmatpush.bf16.msra.mxu0 %v207_v2  ;;  %212 = vmatpush.bf16.msra.mxu1 %v207_v2 }
   0xe   :  { %109 = vmatpush.bf16.msra.mxu0 %v206_v3  ;;  %213 = vmatpush.bf16.msra.mxu1 %v206_v3 }
  0x12   :  { %110 = vmatpush.bf16.msra.mxu0 %v205_v4  ;;  %214 = vmatpush.bf16.msra.mxu1 %v205_v4 }
  0x16   :  { %111 = vmatpush.bf16.msra.mxu0 %v204_v5  ;;  %215 = vmatpush.bf16.msra.mxu1 %v204_v5 }
  0x1a   :  { %112 = vmatpush.bf16.msra.mxu0 %v203_v6  ;;  %216 = vmatpush.bf16.msra.mxu1 %v203_v6 }
  0x1e   :  { %113 = vmatpush.bf16.msra.mxu0 %v202_v7  ;;  %217 = vmatpush.bf16.msra.mxu1 %v202_v7 }
  0x21   :  { %114 = vmatmul.bf16.vlgmr.msra.gmra.mxu0 %v200_v8  ;;  %119 = vmatmul.bf16.vlgmr.msra.gmra.mxu1 %v201_v9 }
  0x9e   :  { %v115_v11 = vpop.f32.mrf.mxu0  ;;  %v120_v12 = vpop.f32.mrf.mxu1 }
  0x9f   :  { %v144_v13 = vadd.f32 %v218_v10, %v115_v11  ;;  %v146_v14 = vadd.f32 %v218_v10, %v120_v12 }
  0xa1   :  { %v148_v15 = vmax.f32 %v144_v13, 0.0  ;;  %v150_v16 = vmax.f32 %v146_v14, 0.0 }
  0xa3   :  { %152 = vst [vmem:[%s287_s3] sm:$0xff] %v148_v15 }
  0xa4   :  { %154 = vst [vmem:[%s287_s3 + $0x10] sm:$0xff] %v150_v16 }
  0xa6   :  { %v117_v17 = vpop.f32.mrf.mxu0  ;;  %v122_v18 = vpop.f32.mrf.mxu1 }
  0xa7   :  { %v145_v19 = vadd.f32 %v218_v10, %v117_v17  ;;  %v147_v20 = vadd.f32 %v218_v10, %v122_v18 }
  0xa9   :  { %v149_v21 = vmax.f32 %v145_v19, 0.0  ;;  %v151_v22 = vmax.f32 %v147_v20, 0.0 }
  0xab   :  { %153 = vst [vmem:[%s287_s3 + $0x8] sm:$0xff] %v149_v21 }
  0xac   :  { %155 = vst [vmem:[%s287_s3 + $0x18] sm:$0xff] %v151_v22 }

</bundles_post_ra>
